<compile_context>
chip_gen: v6e
topology: v6e:2x2x1
jax: 0.10.0
libtpu: 0.0.40
codegen_flags: <defaults>
</compile_context>

<pallas_src>
import functools

import jax
import jax.numpy as jnp
from jax.experimental import pallas as pl
from jax.experimental.pallas import tpu as pltpu

NUM_DIRECTIONS = 4
NUM_OUTPUTS = 6

_VMEM_SPEC = pl.BlockSpec(memory_space=pltpu.MemorySpace.VMEM)


# ------------------------------ fused kernel ------------------------------- #

def _fused_forward_kernel(xcol_ref, onehot_ref, w1_ref, b1_ref, w2_ref, b2_ref,
                          mask_ref, w1f_ref, w1d_ref, b1h_ref, w2h_ref, b2h_ref,
                          out_ref, z_scr, p2_scr, *, batch, pad0):
    f32 = jnp.float32
    rows_q = 16 * batch          # rows per parity quadrant of the 8x8 map

    # ---- conv1 (K folded to 36) + bias + ReLU + 2x2 max-pool ----------------
    # xcol_ref[q1] holds the im2col rows whose conv1 outputs fall in pool
    # window position q1, so pool1 is an elementwise max over q1.
    m = None
    for q1 in range(4):
        yq = jnp.dot(xcol_ref[q1], w1_ref[...], preferred_element_type=f32)
        m = yq if m is None else jnp.maximum(m, yq)
    p1 = jnp.maximum(m + b1_ref[...], 0.0)                  # (4*rows_q, 8)

    # ---- conv2: one tap-expanded matmul + shifted/masked accumulation -------
    # z[r, t*16:(t+1)*16] = contribution of pooled1 position r through tap t.
    # Stage z per input-parity quadrant in a zero-padded scratch so every tap
    # becomes a constant-offset read + mask + add (conv "same" padding falls
    # out of the zero bands / masks).
    zeros_band = jnp.zeros((4, pad0, 144), f32)
    z_scr[:, pl.ds(0, pad0), :] = zeros_band
    z_scr[:, pl.ds(pad0 + rows_q, pad0), :] = zeros_band
    for q2 in range(4):
        zq = jnp.dot(p1[q2 * rows_q:(q2 + 1) * rows_q, :], w2_ref[...],
                     preferred_element_type=f32)            # (rows_q, 144)
        z_scr[q2, pl.ds(pad0, rows_q), :] = zq

    pooled2 = None
    for hp in range(2):          # conv2 output parity == pool2 window position
        for wp in range(2):
            acc = jnp.zeros((rows_q, 16), f32)
            for kh in range(3):
                for kw in range(3):
                    dh, dw = kh - 1, kw - 1
                    ph, pw = (hp + dh) % 2, (wp + dw) % 2
                    sh, sw = (hp + dh - ph) // 2, (wp + dw - pw) // 2
                    qsrc = 2 * ph + pw
                    tap = kh * 3 + kw
                    d = batch * (4 * sh + sw)
                    piece = z_scr[qsrc, pl.ds(pad0 + d, rows_q),
                                  pl.ds(tap * 16, 16)]
                    if (sh, sw) != (0, 0):
                        piece = piece * mask_ref[sh + 1, sw + 1]
                    acc = acc + piece
            q_out = jnp.maximum(acc + b2_ref[...], 0.0)      # conv2 + ReLU
            pooled2 = q_out if pooled2 is None else jnp.maximum(pooled2, q_out)

    p2_scr[...] = pooled2        # (16*batch, 16): rows=(h4,w4,b), lanes=channel

    # ---- merged policy / value heads ----------------------------------------
    acc_h = jnp.dot(onehot_ref[...], w1d_ref[...],
                    preferred_element_type=f32) + b1h_ref[...]
    for s in range(16):          # contract over the 4x4 pooled spatial grid
        rows = p2_scr[pl.ds(batch * s, batch), :]            # (batch, 16)
        acc_h = acc_h + jnp.dot(rows, w1f_ref[s], preferred_element_type=f32)
    h1 = jnp.maximum(acc_h, 0.0)
    out_ref[...] = jnp.dot(h1, w2h_ref[...],
                           preferred_element_type=f32) + b2h_ref[...]


# ----------------------- host-side prep (XLA glue) ------------------------- #

def _prepare_inputs(view_nchw, direction):
    """Raw obs -> (quadrant-ordered conv1 im2col, one-hot direction)."""
    B = view_nchw.shape[0]
    x = jnp.transpose(view_nchw.astype(jnp.float32), (0, 2, 3, 1))  # NHWC
    xp = jnp.pad(x, ((0, 0), (1, 1), (1, 1), (0, 0)))               # (B,18,18,4)
    cols = jnp.stack([xp[:, kh:kh + 16, kw:kw + 16, :]
                      for kh in range(3) for kw in range(3)], axis=-2)
    cols = cols.reshape(B, 16, 16, 36)
    # conv1 output coord H1 = 4*h4 + 2*p2h + p1h (same for W1); order rows as
    # (q1=pool1 window pos, q2=pool2 window pos, h4, w4, b) for in-kernel pools.
    cols = cols.reshape(B, 4, 2, 2, 4, 2, 2, 36)
    cols = jnp.transpose(cols, (3, 6, 2, 5, 1, 4, 0, 7))
    xcol = cols.reshape(4, 64 * B, 36)
    one_hot = jax.nn.one_hot(direction.astype(jnp.int32), NUM_DIRECTIONS,
                             dtype=jnp.float32)
    return xcol, one_hot


def _prepare_weights(params, batch):
    """Fold / permute the module weights into the kernel's layouts (offline)."""
    f32 = jnp.float32
    (w1, b1), (w2, b2) = params["conv"]
    w1cat = w1.reshape(36, 8)                                    # (kh,kw,ci)->K
    b1r = b1.reshape(1, 8)
    w2cat = jnp.transpose(w2, (2, 0, 1, 3)).reshape(8, 144)      # ci x (tap,co)
    b2r = b2.reshape(1, 16)

    (wp1, bp1, _), (wp2, bp2, _) = params["linear"]
    (wv1, bv1, _), (wv2, bv2, _) = params["value"]
    W1 = jnp.concatenate([wp1, wv1], axis=1)                     # (260, 64)
    b1h = jnp.concatenate([bp1, bv1]).reshape(1, 64)
    # Permute rows 0..255 from PyTorch NCHW-flatten (c*16 + s) to (s, c) order.
    w1f = jnp.transpose(W1[:256].reshape(16, 16, 64), (1, 0, 2))  # (s, c, 64)
    w1d = W1[256:]                                                # (4, 64)
    w2h = jnp.zeros((64, 8), f32)
    w2h = w2h.at[:32, :NUM_OUTPUTS].set(wp2)
    w2h = w2h.at[32:, NUM_OUTPUTS:NUM_OUTPUTS + 1].set(wv2)
    b2h = jnp.concatenate([bp2, bv2, jnp.zeros((1,), f32)]).reshape(1, 8)

    # Boundary masks for the 9 conv2 block-shifts (depend only on (sh, sw)).
    r = jnp.arange(16 * batch)
    h4 = r // (4 * batch)
    w4 = (r // batch) % 4
    mrows = []
    for sh in (-1, 0, 1):
        row = []
        for sw in (-1, 0, 1):
            v = ((h4 + sh >= 0) & (h4 + sh < 4) &
                 (w4 + sw >= 0) & (w4 + sw < 4))
            row.append(v.astype(f32).reshape(16 * batch, 1))
        mrows.append(jnp.stack(row))
    masks = jnp.stack(mrows)                                      # (3,3,16B,1)
    return w1cat, b1r, w2cat, b2r, masks, w1f, w1d, b1h, w2h, b2h


# ------------------------------- the model --------------------------------- #

def init_params(key):
    """Deterministic synthetic parameters matching the module's config shapes."""
    ks = jax.random.split(key, 12)

    def dense(k, shape):
        return jax.random.normal(k, shape, jnp.float32) * 0.1

    conv = [
        (dense(ks[0], (3, 3, 4, 8)), dense(ks[1], (8,))),
        (dense(ks[2], (3, 3, 8, 16)), dense(ks[3], (16,))),
    ]
    feat = 16 * 4 * 4 + NUM_DIRECTIONS          # 256 conv features + one-hot
    lin = [
        (dense(ks[4], (feat, 32)), dense(ks[5], (32,)), True),
        (dense(ks[6], (32, NUM_OUTPUTS)), dense(ks[7], (NUM_OUTPUTS,)), False),
    ]
    val = [
        (dense(ks[8], (feat, 32)), dense(ks[9], (32,)), True),
        (dense(ks[10], (32, 1)), dense(ks[11], (1,)), False),
    ]
    return {"conv": conv, "linear": lin, "value": val}


@jax.jit
def custom_model_forward(view_nchw, direction, params):
    """Returns (logits, value) exactly as CustomModel.forward / value_function."""
    B = view_nchw.shape[0]
    xcol, one_hot = _prepare_inputs(view_nchw, direction)
    (w1cat, b1r, w2cat, b2r, masks,
     w1f, w1d, b1h, w2h, b2h) = _prepare_weights(params, B)

    rows_q = 16 * B
    pad0 = ((5 * B + 7) // 8) * 8               # >= max |block shift|, 8-aligned
    kern = functools.partial(_fused_forward_kernel, batch=B, pad0=pad0)

    out = pl.pallas_call(
        kern,
        out_shape=jax.ShapeDtypeStruct((B, 8), jnp.float32),
        in_specs=[_VMEM_SPEC] * 12,
        out_specs=_VMEM_SPEC,
        scratch_shapes=[
            pltpu.VMEM((4, rows_q + 2 * pad0, 144), jnp.float32),
            pltpu.VMEM((rows_q, 16), jnp.float32),
        ],
    )(xcol, one_hot, w1cat, b1r, w2cat, b2r, masks, w1f, w1d, b1h, w2h, b2h)

    logits = out[:, :NUM_OUTPUTS]
    value = out[:, NUM_OUTPUTS]
    return logits, value


# ------------------------- pure-JAX reference ------------------------------ #

def reference_forward(view_nchw, direction, params):
    f32 = jnp.float32
    hi = jax.lax.Precision.HIGHEST
    x = view_nchw.astype(f32)
    for (w, b) in params["conv"]:
        w_oihw = jnp.transpose(w, (3, 2, 0, 1))
        x = jax.lax.conv_general_dilated(
            x, w_oihw, window_strides=(1, 1), padding=((1, 1), (1, 1)),
            dimension_numbers=("NCHW", "OIHW", "NCHW"), precision=hi)
        x = jnp.maximum(x + b[None, :, None, None], 0.0)
        Bn, C, H, W = x.shape
        x = x.reshape(Bn, C, H // 2, 2, W // 2, 2).max(axis=(3, 5))
    flat = x.reshape(x.shape[0], -1)                       # NCHW channel-major
    one_hot = jax.nn.one_hot(direction.astype(jnp.int32), NUM_DIRECTIONS,
                             dtype=f32)
    feat = jnp.concatenate([flat, one_hot], axis=1)

    def mlp(h, layers):
        for (w, b, act) in layers:
            h = jnp.dot(h, w, precision=hi) + b
            if act:
                h = jnp.maximum(h, 0.0)
        return h

    logits = mlp(feat, params["linear"])
    value = mlp(feat, params["value"])
    return logits, value[:, 0]


if __name__ == "__main__":
    key = jax.random.PRNGKey(0)
    k_view, k_dir, k_params = jax.random.split(key, 3)

    # obs['view']: [B=2, C=4, H=16, W=16] (NCHW, as the torch module receives it)
    view = jax.random.normal(k_view, (2, 4, 16, 16), jnp.float32)
    # obs['direction']: int in [0, 4)
    direction = jax.random.randint(k_dir, (2,), 0, NUM_DIRECTIONS)
    params = init_params(k_params)

    logits, value = custom_model_forward(view, direction, params)
    jax.block_until_ready((logits, value))

    assert logits.shape == (2, NUM_OUTPUTS), logits.shape
    assert value.shape == (2,), value.shape

    # Unit-test the fused kernel (weight permutation, head merge, conv shifts)
    # against a plain-JAX reference of the original module.
    ref_logits, ref_value = reference_forward(view, direction, params)
    assert jnp.allclose(logits, ref_logits, rtol=2e-2, atol=2e-2), (
        logits, ref_logits)
    assert jnp.allclose(value, ref_value, rtol=2e-2, atol=2e-2), (
        value, ref_value)

    print("KERNEL_OK")
</pallas_src>

<mosaic_0001>
module attributes {stable_mosaic.version = 11 : i64} {
  func.func @_fused_forward_kernel(%arg0: memref<4x128x36xf32, #tpu.memory_space<vmem>>, %arg1: memref<2x4xf32, #tpu.memory_space<vmem>>, %arg2: memref<36x8xf32, #tpu.memory_space<vmem>>, %arg3: memref<1x8xf32, #tpu.memory_space<vmem>>, %arg4: memref<8x144xf32, #tpu.memory_space<vmem>>, %arg5: memref<1x16xf32, #tpu.memory_space<vmem>>, %arg6: memref<3x3x32x1xf32, #tpu.memory_space<vmem>>, %arg7: memref<16x16x64xf32, #tpu.memory_space<vmem>>, %arg8: memref<4x64xf32, #tpu.memory_space<vmem>>, %arg9: memref<1x64xf32, #tpu.memory_space<vmem>>, %arg10: memref<64x8xf32, #tpu.memory_space<vmem>>, %arg11: memref<1x8xf32, #tpu.memory_space<vmem>>, %arg12: memref<2x8xf32, #tpu.memory_space<vmem>>, %arg13: memref<4x64x144xf32, #tpu.memory_space<vmem>>, %arg14: memref<32x16xf32, #tpu.memory_space<vmem>>) attributes {dimension_semantics = [], scalar_prefetch = 0 : i64, scratch_operands = 2 : i64, tpu.core_type = #tpu.core_type<tc>} {
    %c0 = arith.constant 0 : index
    %c0_0 = arith.constant 0 : index
    %c0_1 = arith.constant 0 : index
    %0 = vector.load %arg0[%c0, %c0_0, %c0_1] : memref<4x128x36xf32, #tpu.memory_space<vmem>>, vector<1x128x36xf32>
    %1 = vector.shape_cast %0 : vector<1x128x36xf32> to vector<128x36xf32>
    %c0_2 = arith.constant 0 : index
    %c0_3 = arith.constant 0 : index
    %2 = vector.load %arg2[%c0_2, %c0_3] : memref<36x8xf32, #tpu.memory_space<vmem>>, vector<36x8xf32>
    %cst = arith.constant dense<0.000000e+00> : vector<128x8xf32>
    %3 = tpu.matmul %1, %2, %cst {dimension_numbers = #tpu.dot_dimension_numbers<[1], [0], [0], [1], [0, 0, 1, 1], [], []>} : vector<128x36xf32>, vector<36x8xf32>, vector<128x8xf32> -> vector<128x8xf32>
    %c1 = arith.constant 1 : index
    %c0_4 = arith.constant 0 : index
    %c0_5 = arith.constant 0 : index
    %4 = vector.load %arg0[%c1, %c0_4, %c0_5] : memref<4x128x36xf32, #tpu.memory_space<vmem>>, vector<1x128x36xf32>
    %5 = vector.shape_cast %4 : vector<1x128x36xf32> to vector<128x36xf32>
    %c0_6 = arith.constant 0 : index
    %c0_7 = arith.constant 0 : index
    %6 = vector.load %arg2[%c0_6, %c0_7] : memref<36x8xf32, #tpu.memory_space<vmem>>, vector<36x8xf32>
    %cst_8 = arith.constant dense<0.000000e+00> : vector<128x8xf32>
    %7 = tpu.matmul %5, %6, %cst_8 {dimension_numbers = #tpu.dot_dimension_numbers<[1], [0], [0], [1], [0, 0, 1, 1], [], []>} : vector<128x36xf32>, vector<36x8xf32>, vector<128x8xf32> -> vector<128x8xf32>
    %8 = arith.maximumf %3, %7 : vector<128x8xf32>
    %c2 = arith.constant 2 : index
    %c0_9 = arith.constant 0 : index
    %c0_10 = arith.constant 0 : index
    %9 = vector.load %arg0[%c2, %c0_9, %c0_10] : memref<4x128x36xf32, #tpu.memory_space<vmem>>, vector<1x128x36xf32>
    %10 = vector.shape_cast %9 : vector<1x128x36xf32> to vector<128x36xf32>
    %c0_11 = arith.constant 0 : index
    %c0_12 = arith.constant 0 : index
    %11 = vector.load %arg2[%c0_11, %c0_12] : memref<36x8xf32, #tpu.memory_space<vmem>>, vector<36x8xf32>
    %cst_13 = arith.constant dense<0.000000e+00> : vector<128x8xf32>
    %12 = tpu.matmul %10, %11, %cst_13 {dimension_numbers = #tpu.dot_dimension_numbers<[1], [0], [0], [1], [0, 0, 1, 1], [], []>} : vector<128x36xf32>, vector<36x8xf32>, vector<128x8xf32> -> vector<128x8xf32>
    %13 = arith.maximumf %8, %12 : vector<128x8xf32>
    %c3 = arith.constant 3 : index
    %c0_14 = arith.constant 0 : index
    %c0_15 = arith.constant 0 : index
    %14 = vector.load %arg0[%c3, %c0_14, %c0_15] : memref<4x128x36xf32, #tpu.memory_space<vmem>>, vector<1x128x36xf32>
    %15 = vector.shape_cast %14 : vector<1x128x36xf32> to vector<128x36xf32>
    %c0_16 = arith.constant 0 : index
    %c0_17 = arith.constant 0 : index
    %16 = vector.load %arg2[%c0_16, %c0_17] : memref<36x8xf32, #tpu.memory_space<vmem>>, vector<36x8xf32>
    %cst_18 = arith.constant dense<0.000000e+00> : vector<128x8xf32>
    %17 = tpu.matmul %15, %16, %cst_18 {dimension_numbers = #tpu.dot_dimension_numbers<[1], [0], [0], [1], [0, 0, 1, 1], [], []>} : vector<128x36xf32>, vector<36x8xf32>, vector<128x8xf32> -> vector<128x8xf32>
    %18 = arith.maximumf %13, %17 : vector<128x8xf32>
    %c0_19 = arith.constant 0 : index
    %c0_20 = arith.constant 0 : index
    %19 = vector.load %arg3[%c0_19, %c0_20] : memref<1x8xf32, #tpu.memory_space<vmem>>, vector<1x8xf32>
    %20 = vector.broadcast %19 : vector<1x8xf32> to vector<128x8xf32>
    %21 = arith.addf %18, %20 : vector<128x8xf32>
    %cst_21 = arith.constant 0.000000e+00 : f32
    %22 = vector.broadcast %cst_21 : f32 to vector<128x8xf32>
    %23 = arith.maximumf %21, %22 : vector<128x8xf32>
    %cst_22 = arith.constant 0.000000e+00 : f32
    %24 = vector.broadcast %cst_22 : f32 to vector<4x16x144xf32>
    %c0_23 = arith.constant 0 : index
    %c0_24 = arith.constant 0 : index
    %c0_25 = arith.constant 0 : index
    %25 = vector.load %arg13[%c0_23, %c0_24, %c0_25] : memref<4x64x144xf32, #tpu.memory_space<vmem>>, vector<4x16x144xf32>
    tpu.vector_store %arg13[%c0_23, %c0_24, %c0_25], %24 {strides = array<i32>} : memref<4x64x144xf32, #tpu.memory_space<vmem>>, vector<4x16x144xf32>,
    %c0_26 = arith.constant 0 : index
    %c48 = arith.constant 48 : index
    %c0_27 = arith.constant 0 : index
    %26 = vector.load %arg13[%c0_26, %c48, %c0_27] : memref<4x64x144xf32, #tpu.memory_space<vmem>>, vector<4x16x144xf32>
    tpu.vector_store %arg13[%c0_26, %c48, %c0_27], %24 {strides = array<i32>} : memref<4x64x144xf32, #tpu.memory_space<vmem>>, vector<4x16x144xf32>,
    %27 = vector.extract_strided_slice %23 {offsets = [0, 0], sizes = [32, 8], strides = [1, 1]} : vector<128x8xf32> to vector<32x8xf32>
    %c0_28 = arith.constant 0 : index
    %c0_29 = arith.constant 0 : index
    %28 = vector.load %arg4[%c0_28, %c0_29] : memref<8x144xf32, #tpu.memory_space<vmem>>, vector<8x144xf32>
    %cst_30 = arith.constant dense<0.000000e+00> : vector<32x144xf32>
    %29 = tpu.matmul %27, %28, %cst_30 {dimension_numbers = #tpu.dot_dimension_numbers<[1], [0], [0], [1], [0, 0, 1, 1], [], []>} : vector<32x8xf32>, vector<8x144xf32>, vector<32x144xf32> -> vector<32x144xf32>
    %c0_31 = arith.constant 0 : index
    %c16 = arith.constant 16 : index
    %c0_32 = arith.constant 0 : index
    %30 = vector.load %arg13[%c0_31, %c16, %c0_32] : memref<4x64x144xf32, #tpu.memory_space<vmem>>, vector<1x32x144xf32>
    %31 = vector.shape_cast %30 : vector<1x32x144xf32> to vector<32x144xf32>
    %32 = vector.shape_cast %29 : vector<32x144xf32> to vector<1x32x144xf32>
    tpu.vector_store %arg13[%c0_31, %c16, %c0_32], %32 {strides = array<i32>} : memref<4x64x144xf32, #tpu.memory_space<vmem>>, vector<1x32x144xf32>,
    %33 = vector.extract_strided_slice %23 {offsets = [32, 0], sizes = [32, 8], strides = [1, 1]} : vector<128x8xf32> to vector<32x8xf32>
    %c0_33 = arith.constant 0 : index
    %c0_34 = arith.constant 0 : index
    %34 = vector.load %arg4[%c0_33, %c0_34] : memref<8x144xf32, #tpu.memory_space<vmem>>, vector<8x144xf32>
    %cst_35 = arith.constant dense<0.000000e+00> : vector<32x144xf32>
    %35 = tpu.matmul %33, %34, %cst_35 {dimension_numbers = #tpu.dot_dimension_numbers<[1], [0], [0], [1], [0, 0, 1, 1], [], []>} : vector<32x8xf32>, vector<8x144xf32>, vector<32x144xf32> -> vector<32x144xf32>
    %c1_36 = arith.constant 1 : index
    %c16_37 = arith.constant 16 : index
    %c0_38 = arith.constant 0 : index
    %36 = vector.load %arg13[%c1_36, %c16_37, %c0_38] : memref<4x64x144xf32, #tpu.memory_space<vmem>>, vector<1x32x144xf32>
    %37 = vector.shape_cast %36 : vector<1x32x144xf32> to vector<32x144xf32>
    %38 = vector.shape_cast %35 : vector<32x144xf32> to vector<1x32x144xf32>
    tpu.vector_store %arg13[%c1_36, %c16_37, %c0_38], %38 {strides = array<i32>} : memref<4x64x144xf32, #tpu.memory_space<vmem>>, vector<1x32x144xf32>,
    %39 = vector.extract_strided_slice %23 {offsets = [64, 0], sizes = [32, 8], strides = [1, 1]} : vector<128x8xf32> to vector<32x8xf32>
    %c0_39 = arith.constant 0 : index
    %c0_40 = arith.constant 0 : index
    %40 = vector.load %arg4[%c0_39, %c0_40] : memref<8x144xf32, #tpu.memory_space<vmem>>, vector<8x144xf32>
    %cst_41 = arith.constant dense<0.000000e+00> : vector<32x144xf32>
    %41 = tpu.matmul %39, %40, %cst_41 {dimension_numbers = #tpu.dot_dimension_numbers<[1], [0], [0], [1], [0, 0, 1, 1], [], []>} : vector<32x8xf32>, vector<8x144xf32>, vector<32x144xf32> -> vector<32x144xf32>
    %c2_42 = arith.constant 2 : index
    %c16_43 = arith.constant 16 : index
    %c0_44 = arith.constant 0 : index
    %42 = vector.load %arg13[%c2_42, %c16_43, %c0_44] : memref<4x64x144xf32, #tpu.memory_space<vmem>>, vector<1x32x144xf32>
    %43 = vector.shape_cast %42 : vector<1x32x144xf32> to vector<32x144xf32>
    %44 = vector.shape_cast %41 : vector<32x144xf32> to vector<1x32x144xf32>
    tpu.vector_store %arg13[%c2_42, %c16_43, %c0_44], %44 {strides = array<i32>} : memref<4x64x144xf32, #tpu.memory_space<vmem>>, vector<1x32x144xf32>,
    %45 = vector.extract_strided_slice %23 {offsets = [96, 0], sizes = [32, 8], strides = [1, 1]} : vector<128x8xf32> to vector<32x8xf32>
    %c0_45 = arith.constant 0 : index
    %c0_46 = arith.constant 0 : index
    %46 = vector.load %arg4[%c0_45, %c0_46] : memref<8x144xf32, #tpu.memory_space<vmem>>, vector<8x144xf32>
    %cst_47 = arith.constant dense<0.000000e+00> : vector<32x144xf32>
    %47 = tpu.matmul %45, %46, %cst_47 {dimension_numbers = #tpu.dot_dimension_numbers<[1], [0], [0], [1], [0, 0, 1, 1], [], []>} : vector<32x8xf32>, vector<8x144xf32>, vector<32x144xf32> -> vector<32x144xf32>
    %c3_48 = arith.constant 3 : index
    %c16_49 = arith.constant 16 : index
    %c0_50 = arith.constant 0 : index
    %48 = vector.load %arg13[%c3_48, %c16_49, %c0_50] : memref<4x64x144xf32, #tpu.memory_space<vmem>>, vector<1x32x144xf32>
    %49 = vector.shape_cast %48 : vector<1x32x144xf32> to vector<32x144xf32>
    %50 = vector.shape_cast %47 : vector<32x144xf32> to vector<1x32x144xf32>
    tpu.vector_store %arg13[%c3_48, %c16_49, %c0_50], %50 {strides = array<i32>} : memref<4x64x144xf32, #tpu.memory_space<vmem>>, vector<1x32x144xf32>,
    %cst_51 = arith.constant 0.000000e+00 : f32
    %51 = vector.broadcast %cst_51 : f32 to vector<32x16xf32>
    %c3_52 = arith.constant 3 : index
    %c6 = arith.constant 6 : index
    %c0_53 = arith.constant 0 : index
    %52 = vector.load %arg13[%c3_52, %c6, %c0_53] : memref<4x64x144xf32, #tpu.memory_space<vmem>>, vector<1x32x16xf32>
    %53 = vector.shape_cast %52 : vector<1x32x16xf32> to vector<32x16xf32>
    %c0_54 = arith.constant 0 : index
    %c0_55 = arith.constant 0 : index
    %c0_56 = arith.constant 0 : index
    %c0_57 = arith.constant 0 : index
    %54 = vector.load %arg6[%c0_54, %c0_55, %c0_56, %c0_57] : memref<3x3x32x1xf32, #tpu.memory_space<vmem>>, vector<1x1x32x1xf32>
    %55 = vector.shape_cast %54 : vector<1x1x32x1xf32> to vector<32x1xf32>
    %56 = vector.broadcast %55 : vector<32x1xf32> to vector<32x16xf32>
    %57 = arith.mulf %53, %56 : vector<32x16xf32>
    %58 = arith.addf %51, %57 : vector<32x16xf32>
    %c2_58 = arith.constant 2 : index
    %c8 = arith.constant 8 : index
    %c16_59 = arith.constant 16 : index
    %59 = vector.load %arg13[%c2_58, %c8, %c16_59] : memref<4x64x144xf32, #tpu.memory_space<vmem>>, vector<1x32x16xf32>
    %60 = vector.shape_cast %59 : vector<1x32x16xf32> to vector<32x16xf32>
    %c0_60 = arith.constant 0 : index
    %c1_61 = arith.constant 1 : index
    %c0_62 = arith.constant 0 : index
    %c0_63 = arith.constant 0 : index
    %61 = vector.load %arg6[%c0_60, %c1_61, %c0_62, %c0_63] : memref<3x3x32x1xf32, #tpu.memory_space<vmem>>, vector<1x1x32x1xf32>
    %62 = vector.shape_cast %61 : vector<1x1x32x1xf32> to vector<32x1xf32>
    %63 = vector.broadcast %62 : vector<32x1xf32> to vector<32x16xf32>
    %64 = arith.mulf %60, %63 : vector<32x16xf32>
    %65 = arith.addf %58, %64 : vector<32x16xf32>
    %c3_64 = arith.constant 3 : index
    %c8_65 = arith.constant 8 : index
    %c32 = arith.constant 32 : index
    %66 = vector.load %arg13[%c3_64, %c8_65, %c32] : memref<4x64x144xf32, #tpu.memory_space<vmem>>, vector<1x32x16xf32>
    %67 = vector.shape_cast %66 : vector<1x32x16xf32> to vector<32x16xf32>
    %c0_66 = arith.constant 0 : index
    %c1_67 = arith.constant 1 : index
    %c0_68 = arith.constant 0 : index
    %c0_69 = arith.constant 0 : index
    %68 = vector.load %arg6[%c0_66, %c1_67, %c0_68, %c0_69] : memref<3x3x32x1xf32, #tpu.memory_space<vmem>>, vector<1x1x32x1xf32>
    %69 = vector.shape_cast %68 : vector<1x1x32x1xf32> to vector<32x1xf32>
    %70 = vector.broadcast %69 : vector<32x1xf32> to vector<32x16xf32>
    %71 = arith.mulf %67, %70 : vector<32x16xf32>
    %72 = arith.addf %65, %71 : vector<32x16xf32>
    %c1_70 = arith.constant 1 : index
    %c14 = arith.constant 14 : index
    %c48_71 = arith.constant 48 : index
    %73 = vector.load %arg13[%c1_70, %c14, %c48_71] : memref<4x64x144xf32, #tpu.memory_space<vmem>>, vector<1x32x16xf32>
    %74 = vector.shape_cast %73 : vector<1x32x16xf32> to vector<32x16xf32>
    %c1_72 = arith.constant 1 : index
    %c0_73 = arith.constant 0 : index
    %c0_74 = arith.constant 0 : index
    %c0_75 = arith.constant 0 : index
    %75 = vector.load %arg6[%c1_72, %c0_73, %c0_74, %c0_75] : memref<3x3x32x1xf32, #tpu.memory_space<vmem>>, vector<1x1x32x1xf32>
    %76 = vector.shape_cast %75 : vector<1x1x32x1xf32> to vector<32x1xf32>
    %77 = vector.broadcast %76 : vector<32x1xf32> to vector<32x16xf32>
    %78 = arith.mulf %74, %77 : vector<32x16xf32>
    %79 = arith.addf %72, %78 : vector<32x16xf32>
    %c0_76 = arith.constant 0 : index
    %c16_77 = arith.constant 16 : index
    %c64 = arith.constant 64 : index
    %80 = vector.load %arg13[%c0_76, %c16_77, %c64] : memref<4x64x144xf32, #tpu.memory_space<vmem>>, vector<1x32x16xf32>
    %81 = vector.shape_cast %80 : vector<1x32x16xf32> to vector<32x16xf32>
    %82 = arith.addf %79, %81 : vector<32x16xf32>
    %c1_78 = arith.constant 1 : index
    %c16_79 = arith.constant 16 : index
    %c80 = arith.constant 80 : index
    %83 = vector.load %arg13[%c1_78, %c16_79, %c80] : memref<4x64x144xf32, #tpu.memory_space<vmem>>, vector<1x32x16xf32>
    %84 = vector.shape_cast %83 : vector<1x32x16xf32> to vector<32x16xf32>
    %85 = arith.addf %82, %84 : vector<32x16xf32>
    %c3_80 = arith.constant 3 : index
    %c14_81 = arith.constant 14 : index
    %c96 = arith.constant 96 : index
    %86 = vector.load %arg13[%c3_80, %c14_81, %c96] : memref<4x64x144xf32, #tpu.memory_space<vmem>>, vector<1x32x16xf32>
    %87 = vector.shape_cast %86 : vector<1x32x16xf32> to vector<32x16xf32>
    %c1_82 = arith.constant 1 : index
    %c0_83 = arith.constant 0 : index
    %c0_84 = arith.constant 0 : index
    %c0_85 = arith.constant 0 : index
    %88 = vector.load %arg6[%c1_82, %c0_83, %c0_84, %c0_85] : memref<3x3x32x1xf32, #tpu.memory_space<vmem>>, vector<1x1x32x1xf32>
    %89 = vector.shape_cast %88 : vector<1x1x32x1xf32> to vector<32x1xf32>
    %90 = vector.broadcast %89 : vector<32x1xf32> to vector<32x16xf32>
    %91 = arith.mulf %87, %90 : vector<32x16xf32>
    %92 = arith.addf %85, %91 : vector<32x16xf32>
    %c2_86 = arith.constant 2 : index
    %c16_87 = arith.constant 16 : index
    %c112 = arith.constant 112 : index
    %93 = vector.load %arg13[%c2_86, %c16_87, %c112] : memref<4x64x144xf32, #tpu.memory_space<vmem>>, vector<1x32x16xf32>
    %94 = vector.shape_cast %93 : vector<1x32x16xf32> to vector<32x16xf32>
    %95 = arith.addf %92, %94 : vector<32x16xf32>
    %c3_88 = arith.constant 3 : index
    %c16_89 = arith.constant 16 : index
    %c128 = arith.constant 128 : index
    %96 = vector.load %arg13[%c3_88, %c16_89, %c128] : memref<4x64x144xf32, #tpu.memory_space<vmem>>, vector<1x32x16xf32>
    %97 = vector.shape_cast %96 : vector<1x32x16xf32> to vector<32x16xf32>
    %98 = arith.addf %95, %97 : vector<32x16xf32>
    %c0_90 = arith.constant 0 : index
    %c0_91 = arith.constant 0 : index
    %99 = vector.load %arg5[%c0_90, %c0_91] : memref<1x16xf32, #tpu.memory_space<vmem>>, vector<1x16xf32>
    %100 = vector.broadcast %99 : vector<1x16xf32> to vector<32x16xf32>
    %101 = arith.addf %98, %100 : vector<32x16xf32>
    %cst_92 = arith.constant 0.000000e+00 : f32
    %102 = vector.broadcast %cst_92 : f32 to vector<32x16xf32>
    %103 = arith.maximumf %101, %102 : vector<32x16xf32>
    %cst_93 = arith.constant 0.000000e+00 : f32
    %104 = vector.broadcast %cst_93 : f32 to vector<32x16xf32>
    %c2_94 = arith.constant 2 : index
    %c8_95 = arith.constant 8 : index
    %c0_96 = arith.constant 0 : index
    %105 = vector.load %arg13[%c2_94, %c8_95, %c0_96] : memref<4x64x144xf32, #tpu.memory_space<vmem>>, vector<1x32x16xf32>
    %106 = vector.shape_cast %105 : vector<1x32x16xf32> to vector<32x16xf32>
    %c0_97 = arith.constant 0 : index
    %c1_98 = arith.constant 1 : index
    %c0_99 = arith.constant 0 : index
    %c0_100 = arith.constant 0 : index
    %107 = vector.load %arg6[%c0_97, %c1_98, %c0_99, %c0_100] : memref<3x3x32x1xf32, #tpu.memory_space<vmem>>, vector<1x1x32x1xf32>
    %108 = vector.shape_cast %107 : vector<1x1x32x1xf32> to vector<32x1xf32>
    %109 = vector.broadcast %108 : vector<32x1xf32> to vector<32x16xf32>
    %110 = arith.mulf %106, %109 : vector<32x16xf32>
    %111 = arith.addf %104, %110 : vector<32x16xf32>
    %c3_101 = arith.constant 3 : index
    %c8_102 = arith.constant 8 : index
    %c16_103 = arith.constant 16 : index
    %112 = vector.load %arg13[%c3_101, %c8_102, %c16_103] : memref<4x64x144xf32, #tpu.memory_space<vmem>>, vector<1x32x16xf32>
    %113 = vector.shape_cast %112 : vector<1x32x16xf32> to vector<32x16xf32>
    %c0_104 = arith.constant 0 : index
    %c1_105 = arith.constant 1 : index
    %c0_106 = arith.constant 0 : index
    %c0_107 = arith.constant 0 : index
    %114 = vector.load %arg6[%c0_104, %c1_105, %c0_106, %c0_107] : memref<3x3x32x1xf32, #tpu.memory_space<vmem>>, vector<1x1x32x1xf32>
    %115 = vector.shape_cast %114 : vector<1x1x32x1xf32> to vector<32x1xf32>
    %116 = vector.broadcast %115 : vector<32x1xf32> to vector<32x16xf32>
    %117 = arith.mulf %113, %116 : vector<32x16xf32>
    %118 = arith.addf %111, %117 : vector<32x16xf32>
    %c2_108 = arith.constant 2 : index
    %c10 = arith.constant 10 : index
    %c32_109 = arith.constant 32 : index
    %119 = vector.load %arg13[%c2_108, %c10, %c32_109] : memref<4x64x144xf32, #tpu.memory_space<vmem>>, vector<1x32x16xf32>
    %120 = vector.shape_cast %119 : vector<1x32x16xf32> to vector<32x16xf32>
    %c0_110 = arith.constant 0 : index
    %c2_111 = arith.constant 2 : index
    %c0_112 = arith.constant 0 : index
    %c0_113 = arith.constant 0 : index
    %121 = vector.load %arg6[%c0_110, %c2_111, %c0_112, %c0_113] : memref<3x3x32x1xf32, #tpu.memory_space<vmem>>, vector<1x1x32x1xf32>
    %122 = vector.shape_cast %121 : vector<1x1x32x1xf32> to vector<32x1xf32>
    %123 = vector.broadcast %122 : vector<32x1xf32> to vector<32x16xf32>
    %124 = arith.mulf %120, %123 : vector<32x16xf32>
    %125 = arith.addf %118, %124 : vector<32x16xf32>
    %c0_114 = arith.constant 0 : index
    %c16_115 = arith.constant 16 : index
    %c48_116 = arith.constant 48 : index
    %126 = vector.load %arg13[%c0_114, %c16_115, %c48_116] : memref<4x64x144xf32, #tpu.memory_space<vmem>>, vector<1x32x16xf32>
    %127 = vector.shape_cast %126 : vector<1x32x16xf32> to vector<32x16xf32>
    %128 = arith.addf %125, %127 : vector<32x16xf32>
    %c1_117 = arith.constant 1 : index
    %c16_118 = arith.constant 16 : index
    %c64_119 = arith.constant 64 : index
    %129 = vector.load %arg13[%c1_117, %c16_118, %c64_119] : memref<4x64x144xf32, #tpu.memory_space<vmem>>, vector<1x32x16xf32>
    %130 = vector.shape_cast %129 : vector<1x32x16xf32> to vector<32x16xf32>
    %131 = arith.addf %128, %130 : vector<32x16xf32>
    %c0_120 = arith.constant 0 : index
    %c18 = arith.constant 18 : index
    %c80_121 = arith.constant 80 : index
    %132 = vector.load %arg13[%c0_120, %c18, %c80_121] : memref<4x64x144xf32, #tpu.memory_space<vmem>>, vector<1x32x16xf32>
    %133 = vector.shape_cast %132 : vector<1x32x16xf32> to vector<32x16xf32>
    %c1_122 = arith.constant 1 : index
    %c2_123 = arith.constant 2 : index
    %c0_124 = arith.constant 0 : index
    %c0_125 = arith.constant 0 : index
    %134 = vector.load %arg6[%c1_122, %c2_123, %c0_124, %c0_125] : memref<3x3x32x1xf32, #tpu.memory_space<vmem>>, vector<1x1x32x1xf32>
    %135 = vector.shape_cast %134 : vector<1x1x32x1xf32> to vector<32x1xf32>
    %136 = vector.broadcast %135 : vector<32x1xf32> to vector<32x16xf32>
    %137 = arith.mulf %133, %136 : vector<32x16xf32>
    %138 = arith.addf %131, %137 : vector<32x16xf32>
    %c2_126 = arith.constant 2 : index
    %c16_127 = arith.constant 16 : index
    %c96_128 = arith.constant 96 : index
    %139 = vector.load %arg13[%c2_126, %c16_127, %c96_128] : memref<4x64x144xf32, #tpu.memory_space<vmem>>, vector<1x32x16xf32>
    %140 = vector.shape_cast %139 : vector<1x32x16xf32> to vector<32x16xf32>
    %141 = arith.addf %138, %140 : vector<32x16xf32>
    %c3_129 = arith.constant 3 : index
    %c16_130 = arith.constant 16 : index
    %c112_131 = arith.constant 112 : index
    %142 = vector.load %arg13[%c3_129, %c16_130, %c112_131] : memref<4x64x144xf32, #tpu.memory_space<vmem>>, vector<1x32x16xf32>
    %143 = vector.shape_cast %142 : vector<1x32x16xf32> to vector<32x16xf32>
    %144 = arith.addf %141, %143 : vector<32x16xf32>
    %c2_132 = arith.constant 2 : index
    %c18_133 = arith.constant 18 : index
    %c128_134 = arith.constant 128 : index
    %145 = vector.load %arg13[%c2_132, %c18_133, %c128_134] : memref<4x64x144xf32, #tpu.memory_space<vmem>>, vector<1x32x16xf32>
    %146 = vector.shape_cast %145 : vector<1x32x16xf32> to vector<32x16xf32>
    %c1_135 = arith.constant 1 : index
    %c2_136 = arith.constant 2 : index
    %c0_137 = arith.constant 0 : index
    %c0_138 = arith.constant 0 : index
    %147 = vector.load %arg6[%c1_135, %c2_136, %c0_137, %c0_138] : memref<3x3x32x1xf32, #tpu.memory_space<vmem>>, vector<1x1x32x1xf32>
    %148 = vector.shape_cast %147 : vector<1x1x32x1xf32> to vector<32x1xf32>
    %149 = vector.broadcast %148 : vector<32x1xf32> to vector<32x16xf32>
    %150 = arith.mulf %146, %149 : vector<32x16xf32>
    %151 = arith.addf %144, %150 : vector<32x16xf32>
    %c0_139 = arith.constant 0 : index
    %c0_140 = arith.constant 0 : index
    %152 = vector.load %arg5[%c0_139, %c0_140] : memref<1x16xf32, #tpu.memory_space<vmem>>, vector<1x16xf32>
    %153 = vector.broadcast %152 : vector<1x16xf32> to vector<32x16xf32>
    %154 = arith.addf %151, %153 : vector<32x16xf32>
    %cst_141 = arith.constant 0.000000e+00 : f32
    %155 = vector.broadcast %cst_141 : f32 to vector<32x16xf32>
    %156 = arith.maximumf %154, %155 : vector<32x16xf32>
    %157 = arith.maximumf %103, %156 : vector<32x16xf32>
    %cst_142 = arith.constant 0.000000e+00 : f32
    %158 = vector.broadcast %cst_142 : f32 to vector<32x16xf32>
    %c1_143 = arith.constant 1 : index
    %c14_144 = arith.constant 14 : index
    %c0_145 = arith.constant 0 : index
    %159 = vector.load %arg13[%c1_143, %c14_144, %c0_145] : memref<4x64x144xf32, #tpu.memory_space<vmem>>, vector<1x32x16xf32>
    %160 = vector.shape_cast %159 : vector<1x32x16xf32> to vector<32x16xf32>
    %c1_146 = arith.constant 1 : index
    %c0_147 = arith.constant 0 : index
    %c0_148 = arith.constant 0 : index
    %c0_149 = arith.constant 0 : index
    %161 = vector.load %arg6[%c1_146, %c0_147, %c0_148, %c0_149] : memref<3x3x32x1xf32, #tpu.memory_space<vmem>>, vector<1x1x32x1xf32>
    %162 = vector.shape_cast %161 : vector<1x1x32x1xf32> to vector<32x1xf32>
    %163 = vector.broadcast %162 : vector<32x1xf32> to vector<32x16xf32>
    %164 = arith.mulf %160, %163 : vector<32x16xf32>
    %165 = arith.addf %158, %164 : vector<32x16xf32>
    %c0_150 = arith.constant 0 : index
    %c16_151 = arith.constant 16 : index
    %c16_152 = arith.constant 16 : index
    %166 = vector.load %arg13[%c0_150, %c16_151, %c16_152] : memref<4x64x144xf32, #tpu.memory_space<vmem>>, vector<1x32x16xf32>
    %167 = vector.shape_cast %166 : vector<1x32x16xf32> to vector<32x16xf32>
    %168 = arith.addf %165, %167 : vector<32x16xf32>
    %c1_153 = arith.constant 1 : index
    %c16_154 = arith.constant 16 : index
    %c32_155 = arith.constant 32 : index
    %169 = vector.load %arg13[%c1_153, %c16_154, %c32_155] : memref<4x64x144xf32, #tpu.memory_space<vmem>>, vector<1x32x16xf32>
    %170 = vector.shape_cast %169 : vector<1x32x16xf32> to vector<32x16xf32>
    %171 = arith.addf %168, %170 : vector<32x16xf32>
    %c3_156 = arith.constant 3 : index
    %c14_157 = arith.constant 14 : index
    %c48_158 = arith.constant 48 : index
    %172 = vector.load %arg13[%c3_156, %c14_157, %c48_158] : memref<4x64x144xf32, #tpu.memory_space<vmem>>, vector<1x32x16xf32>
    %173 = vector.shape_cast %172 : vector<1x32x16xf32> to vector<32x16xf32>
    %c1_159 = arith.constant 1 : index
    %c0_160 = arith.constant 0 : index
    %c0_161 = arith.constant 0 : index
    %c0_162 = arith.constant 0 : index
    %174 = vector.load %arg6[%c1_159, %c0_160, %c0_161, %c0_162] : memref<3x3x32x1xf32, #tpu.memory_space<vmem>>, vector<1x1x32x1xf32>
    %175 = vector.shape_cast %174 : vector<1x1x32x1xf32> to vector<32x1xf32>
    %176 = vector.broadcast %175 : vector<32x1xf32> to vector<32x16xf32>
    %177 = arith.mulf %173, %176 : vector<32x16xf32>
    %178 = arith.addf %171, %177 : vector<32x16xf32>
    %c2_163 = arith.constant 2 : index
    %c16_164 = arith.constant 16 : index
    %c64_165 = arith.constant 64 : index
    %179 = vector.load %arg13[%c2_163, %c16_164, %c64_165] : memref<4x64x144xf32, #tpu.memory_space<vmem>>, vector<1x32x16xf32>
    %180 = vector.shape_cast %179 : vector<1x32x16xf32> to vector<32x16xf32>
    %181 = arith.addf %178, %180 : vector<32x16xf32>
    %c3_166 = arith.constant 3 : index
    %c16_167 = arith.constant 16 : index
    %c80_168 = arith.constant 80 : index
    %182 = vector.load %arg13[%c3_166, %c16_167, %c80_168] : memref<4x64x144xf32, #tpu.memory_space<vmem>>, vector<1x32x16xf32>
    %183 = vector.shape_cast %182 : vector<1x32x16xf32> to vector<32x16xf32>
    %184 = arith.addf %181, %183 : vector<32x16xf32>
    %c1_169 = arith.constant 1 : index
    %c22 = arith.constant 22 : index
    %c96_170 = arith.constant 96 : index
    %185 = vector.load %arg13[%c1_169, %c22, %c96_170] : memref<4x64x144xf32, #tpu.memory_space<vmem>>, vector<1x32x16xf32>
    %186 = vector.shape_cast %185 : vector<1x32x16xf32> to vector<32x16xf32>
    %c2_171 = arith.constant 2 : index
    %c0_172 = arith.constant 0 : index
    %c0_173 = arith.constant 0 : index
    %c0_174 = arith.constant 0 : index
    %187 = vector.load %arg6[%c2_171, %c0_172, %c0_173, %c0_174] : memref<3x3x32x1xf32, #tpu.memory_space<vmem>>, vector<1x1x32x1xf32>
    %188 = vector.shape_cast %187 : vector<1x1x32x1xf32> to vector<32x1xf32>
    %189 = vector.broadcast %188 : vector<32x1xf32> to vector<32x16xf32>
    %190 = arith.mulf %186, %189 : vector<32x16xf32>
    %191 = arith.addf %184, %190 : vector<32x16xf32>
    %c0_175 = arith.constant 0 : index
    %c24 = arith.constant 24 : index
    %c112_176 = arith.constant 112 : index
    %192 = vector.load %arg13[%c0_175, %c24, %c112_176] : memref<4x64x144xf32, #tpu.memory_space<vmem>>, vector<1x32x16xf32>
    %193 = vector.shape_cast %192 : vector<1x32x16xf32> to vector<32x16xf32>
    %c2_177 = arith.constant 2 : index
    %c1_178 = arith.constant 1 : index
    %c0_179 = arith.constant 0 : index
    %c0_180 = arith.constant 0 : index
    %194 = vector.load %arg6[%c2_177, %c1_178, %c0_179, %c0_180] : memref<3x3x32x1xf32, #tpu.memory_space<vmem>>, vector<1x1x32x1xf32>
    %195 = vector.shape_cast %194 : vector<1x1x32x1xf32> to vector<32x1xf32>
    %196 = vector.broadcast %195 : vector<32x1xf32> to vector<32x16xf32>
    %197 = arith.mulf %193, %196 : vector<32x16xf32>
    %198 = arith.addf %191, %197 : vector<32x16xf32>
    %c1_181 = arith.constant 1 : index
    %c24_182 = arith.constant 24 : index
    %c128_183 = arith.constant 128 : index
    %199 = vector.load %arg13[%c1_181, %c24_182, %c128_183] : memref<4x64x144xf32, #tpu.memory_space<vmem>>, vector<1x32x16xf32>
    %200 = vector.shape_cast %199 : vector<1x32x16xf32> to vector<32x16xf32>
    %c2_184 = arith.constant 2 : index
    %c1_185 = arith.constant 1 : index
    %c0_186 = arith.constant 0 : index
    %c0_187 = arith.constant 0 : index
    %201 = vector.load %arg6[%c2_184, %c1_185, %c0_186, %c0_187] : memref<3x3x32x1xf32, #tpu.memory_space<vmem>>, vector<1x1x32x1xf32>
    %202 = vector.shape_cast %201 : vector<1x1x32x1xf32> to vector<32x1xf32>
    %203 = vector.broadcast %202 : vector<32x1xf32> to vector<32x16xf32>
    %204 = arith.mulf %200, %203 : vector<32x16xf32>
    %205 = arith.addf %198, %204 : vector<32x16xf32>
    %c0_188 = arith.constant 0 : index
    %c0_189 = arith.constant 0 : index
    %206 = vector.load %arg5[%c0_188, %c0_189] : memref<1x16xf32, #tpu.memory_space<vmem>>, vector<1x16xf32>
    %207 = vector.broadcast %206 : vector<1x16xf32> to vector<32x16xf32>
    %208 = arith.addf %205, %207 : vector<32x16xf32>
    %cst_190 = arith.constant 0.000000e+00 : f32
    %209 = vector.broadcast %cst_190 : f32 to vector<32x16xf32>
    %210 = arith.maximumf %208, %209 : vector<32x16xf32>
    %211 = arith.maximumf %157, %210 : vector<32x16xf32>
    %cst_191 = arith.constant 0.000000e+00 : f32
    %212 = vector.broadcast %cst_191 : f32 to vector<32x16xf32>
    %c0_192 = arith.constant 0 : index
    %c16_193 = arith.constant 16 : index
    %c0_194 = arith.constant 0 : index
    %213 = vector.load %arg13[%c0_192, %c16_193, %c0_194] : memref<4x64x144xf32, #tpu.memory_space<vmem>>, vector<1x32x16xf32>
    %214 = vector.shape_cast %213 : vector<1x32x16xf32> to vector<32x16xf32>
    %215 = arith.addf %212, %214 : vector<32x16xf32>
    %c1_195 = arith.constant 1 : index
    %c16_196 = arith.constant 16 : index
    %c16_197 = arith.constant 16 : index
    %216 = vector.load %arg13[%c1_195, %c16_196, %c16_197] : memref<4x64x144xf32, #tpu.memory_space<vmem>>, vector<1x32x16xf32>
    %217 = vector.shape_cast %216 : vector<1x32x16xf32> to vector<32x16xf32>
    %218 = arith.addf %215, %217 : vector<32x16xf32>
    %c0_198 = arith.constant 0 : index
    %c18_199 = arith.constant 18 : index
    %c32_200 = arith.constant 32 : index
    %219 = vector.load %arg13[%c0_198, %c18_199, %c32_200] : memref<4x64x144xf32, #tpu.memory_space<vmem>>, vector<1x32x16xf32>
    %220 = vector.shape_cast %219 : vector<1x32x16xf32> to vector<32x16xf32>
    %c1_201 = arith.constant 1 : index
    %c2_202 = arith.constant 2 : index
    %c0_203 = arith.constant 0 : index
    %c0_204 = arith.constant 0 : index
    %221 = vector.load %arg6[%c1_201, %c2_202, %c0_203, %c0_204] : memref<3x3x32x1xf32, #tpu.memory_space<vmem>>, vector<1x1x32x1xf32>
    %222 = vector.shape_cast %221 : vector<1x1x32x1xf32> to vector<32x1xf32>
    %223 = vector.broadcast %222 : vector<32x1xf32> to vector<32x16xf32>
    %224 = arith.mulf %220, %223 : vector<32x16xf32>
    %225 = arith.addf %218, %224 : vector<32x16xf32>
    %c2_205 = arith.constant 2 : index
    %c16_206 = arith.constant 16 : index
    %c48_207 = arith.constant 48 : index
    %226 = vector.load %arg13[%c2_205, %c16_206, %c48_207] : memref<4x64x144xf32, #tpu.memory_space<vmem>>, vector<1x32x16xf32>
    %227 = vector.shape_cast %226 : vector<1x32x16xf32> to vector<32x16xf32>
    %228 = arith.addf %225, %227 : vector<32x16xf32>
    %c3_208 = arith.constant 3 : index
    %c16_209 = arith.constant 16 : index
    %c64_210 = arith.constant 64 : index
    %229 = vector.load %arg13[%c3_208, %c16_209, %c64_210] : memref<4x64x144xf32, #tpu.memory_space<vmem>>, vector<1x32x16xf32>
    %230 = vector.shape_cast %229 : vector<1x32x16xf32> to vector<32x16xf32>
    %231 = arith.addf %228, %230 : vector<32x16xf32>
    %c2_211 = arith.constant 2 : index
    %c18_212 = arith.constant 18 : index
    %c80_213 = arith.constant 80 : index
    %232 = vector.load %arg13[%c2_211, %c18_212, %c80_213] : memref<4x64x144xf32, #tpu.memory_space<vmem>>, vector<1x32x16xf32>
    %233 = vector.shape_cast %232 : vector<1x32x16xf32> to vector<32x16xf32>
    %c1_214 = arith.constant 1 : index
    %c2_215 = arith.constant 2 : index
    %c0_216 = arith.constant 0 : index
    %c0_217 = arith.constant 0 : index
    %234 = vector.load %arg6[%c1_214, %c2_215, %c0_216, %c0_217] : memref<3x3x32x1xf32, #tpu.memory_space<vmem>>, vector<1x1x32x1xf32>
    %235 = vector.shape_cast %234 : vector<1x1x32x1xf32> to vector<32x1xf32>
    %236 = vector.broadcast %235 : vector<32x1xf32> to vector<32x16xf32>
    %237 = arith.mulf %233, %236 : vector<32x16xf32>
    %238 = arith.addf %231, %237 : vector<32x16xf32>
    %c0_218 = arith.constant 0 : index
    %c24_219 = arith.constant 24 : index
    %c96_220 = arith.constant 96 : index
    %239 = vector.load %arg13[%c0_218, %c24_219, %c96_220] : memref<4x64x144xf32, #tpu.memory_space<vmem>>, vector<1x32x16xf32>
    %240 = vector.shape_cast %239 : vector<1x32x16xf32> to vector<32x16xf32>
    %c2_221 = arith.constant 2 : index
    %c1_222 = arith.constant 1 : index
    %c0_223 = arith.constant 0 : index
    %c0_224 = arith.constant 0 : index
    %241 = vector.load %arg6[%c2_221, %c1_222, %c0_223, %c0_224] : memref<3x3x32x1xf32, #tpu.memory_space<vmem>>, vector<1x1x32x1xf32>
    %242 = vector.shape_cast %241 : vector<1x1x32x1xf32> to vector<32x1xf32>
    %243 = vector.broadcast %242 : vector<32x1xf32> to vector<32x16xf32>
    %244 = arith.mulf %240, %243 : vector<32x16xf32>
    %245 = arith.addf %238, %244 : vector<32x16xf32>
    %c1_225 = arith.constant 1 : index
    %c24_226 = arith.constant 24 : index
    %c112_227 = arith.constant 112 : index
    %246 = vector.load %arg13[%c1_225, %c24_226, %c112_227] : memref<4x64x144xf32, #tpu.memory_space<vmem>>, vector<1x32x16xf32>
    %247 = vector.shape_cast %246 : vector<1x32x16xf32> to vector<32x16xf32>
    %c2_228 = arith.constant 2 : index
    %c1_229 = arith.constant 1 : index
    %c0_230 = arith.constant 0 : index
    %c0_231 = arith.constant 0 : index
    %248 = vector.load %arg6[%c2_228, %c1_229, %c0_230, %c0_231] : memref<3x3x32x1xf32, #tpu.memory_space<vmem>>, vector<1x1x32x1xf32>
    %249 = vector.shape_cast %248 : vector<1x1x32x1xf32> to vector<32x1xf32>
    %250 = vector.broadcast %249 : vector<32x1xf32> to vector<32x16xf32>
    %251 = arith.mulf %247, %250 : vector<32x16xf32>
    %252 = arith.addf %245, %251 : vector<32x16xf32>
    %c0_232 = arith.constant 0 : index
    %c26 = arith.constant 26 : index
    %c128_233 = arith.constant 128 : index
    %253 = vector.load %arg13[%c0_232, %c26, %c128_233] : memref<4x64x144xf32, #tpu.memory_space<vmem>>, vector<1x32x16xf32>
    %254 = vector.shape_cast %253 : vector<1x32x16xf32> to vector<32x16xf32>
    %c2_234 = arith.constant 2 : index
    %c2_235 = arith.constant 2 : index
    %c0_236 = arith.constant 0 : index
    %c0_237 = arith.constant 0 : index
    %255 = vector.load %arg6[%c2_234, %c2_235, %c0_236, %c0_237] : memref<3x3x32x1xf32, #tpu.memory_space<vmem>>, vector<1x1x32x1xf32>
    %256 = vector.shape_cast %255 : vector<1x1x32x1xf32> to vector<32x1xf32>
    %257 = vector.broadcast %256 : vector<32x1xf32> to vector<32x16xf32>
    %258 = arith.mulf %254, %257 : vector<32x16xf32>
    %259 = arith.addf %252, %258 : vector<32x16xf32>
    %c0_238 = arith.constant 0 : index
    %c0_239 = arith.constant 0 : index
    %260 = vector.load %arg5[%c0_238, %c0_239] : memref<1x16xf32, #tpu.memory_space<vmem>>, vector<1x16xf32>
    %261 = vector.broadcast %260 : vector<1x16xf32> to vector<32x16xf32>
    %262 = arith.addf %259, %261 : vector<32x16xf32>
    %cst_240 = arith.constant 0.000000e+00 : f32
    %263 = vector.broadcast %cst_240 : f32 to vector<32x16xf32>
    %264 = arith.maximumf %262, %263 : vector<32x16xf32>
    %265 = arith.maximumf %211, %264 : vector<32x16xf32>
    %c0_241 = arith.constant 0 : index
    %c0_242 = arith.constant 0 : index
    %266 = vector.load %arg14[%c0_241, %c0_242] : memref<32x16xf32, #tpu.memory_space<vmem>>, vector<32x16xf32>
    tpu.vector_store %arg14[%c0_241, %c0_242], %265 {strides = array<i32>} : memref<32x16xf32, #tpu.memory_space<vmem>>, vector<32x16xf32>,
    %c0_243 = arith.constant 0 : index
    %c0_244 = arith.constant 0 : index
    %267 = vector.load %arg1[%c0_243, %c0_244] : memref<2x4xf32, #tpu.memory_space<vmem>>, vector<2x4xf32>
    %c0_245 = arith.constant 0 : index
    %c0_246 = arith.constant 0 : index
    %268 = vector.load %arg8[%c0_245, %c0_246] : memref<4x64xf32, #tpu.memory_space<vmem>>, vector<4x64xf32>
    %cst_247 = arith.constant dense<0.000000e+00> : vector<2x64xf32>
    %269 = tpu.matmul %267, %268, %cst_247 {dimension_numbers = #tpu.dot_dimension_numbers<[1], [0], [0], [1], [0, 0, 1, 1], [], []>} : vector<2x4xf32>, vector<4x64xf32>, vector<2x64xf32> -> vector<2x64xf32>
    %c0_248 = arith.constant 0 : index
    %c0_249 = arith.constant 0 : index
    %270 = vector.load %arg9[%c0_248, %c0_249] : memref<1x64xf32, #tpu.memory_space<vmem>>, vector<1x64xf32>
    %271 = vector.broadcast %270 : vector<1x64xf32> to vector<2x64xf32>
    %272 = arith.addf %269, %271 : vector<2x64xf32>
    %c0_250 = arith.constant 0 : index
    %c0_251 = arith.constant 0 : index
    %273 = vector.load %arg14[%c0_250, %c0_251] : memref<32x16xf32, #tpu.memory_space<vmem>>, vector<2x16xf32>
    %c0_252 = arith.constant 0 : index
    %c0_253 = arith.constant 0 : index
    %c0_254 = arith.constant 0 : index
    %274 = vector.load %arg7[%c0_252, %c0_253, %c0_254] : memref<16x16x64xf32, #tpu.memory_space<vmem>>, vector<1x16x64xf32>
    %275 = vector.shape_cast %274 : vector<1x16x64xf32> to vector<16x64xf32>
    %cst_255 = arith.constant dense<0.000000e+00> : vector<2x64xf32>
    %276 = tpu.matmul %273, %275, %cst_255 {dimension_numbers = #tpu.dot_dimension_numbers<[1], [0], [0], [1], [0, 0, 1, 1], [], []>} : vector<2x16xf32>, vector<16x64xf32>, vector<2x64xf32> -> vector<2x64xf32>
    %277 = arith.addf %272, %276 : vector<2x64xf32>
    %c2_256 = arith.constant 2 : index
    %c0_257 = arith.constant 0 : index
    %278 = vector.load %arg14[%c2_256, %c0_257] : memref<32x16xf32, #tpu.memory_space<vmem>>, vector<2x16xf32>
    %c1_258 = arith.constant 1 : index
    %c0_259 = arith.constant 0 : index
    %c0_260 = arith.constant 0 : index
    %279 = vector.load %arg7[%c1_258, %c0_259, %c0_260] : memref<16x16x64xf32, #tpu.memory_space<vmem>>, vector<1x16x64xf32>
    %280 = vector.shape_cast %279 : vector<1x16x64xf32> to vector<16x64xf32>
    %cst_261 = arith.constant dense<0.000000e+00> : vector<2x64xf32>
    %281 = tpu.matmul %278, %280, %cst_261 {dimension_numbers = #tpu.dot_dimension_numbers<[1], [0], [0], [1], [0, 0, 1, 1], [], []>} : vector<2x16xf32>, vector<16x64xf32>, vector<2x64xf32> -> vector<2x64xf32>
    %282 = arith.addf %277, %281 : vector<2x64xf32>
    %c4 = arith.constant 4 : index
    %c0_262 = arith.constant 0 : index
    %283 = vector.load %arg14[%c4, %c0_262] : memref<32x16xf32, #tpu.memory_space<vmem>>, vector<2x16xf32>
    %c2_263 = arith.constant 2 : index
    %c0_264 = arith.constant 0 : index
    %c0_265 = arith.constant 0 : index
    %284 = vector.load %arg7[%c2_263, %c0_264, %c0_265] : memref<16x16x64xf32, #tpu.memory_space<vmem>>, vector<1x16x64xf32>
    %285 = vector.shape_cast %284 : vector<1x16x64xf32> to vector<16x64xf32>
    %cst_266 = arith.constant dense<0.000000e+00> : vector<2x64xf32>
    %286 = tpu.matmul %283, %285, %cst_266 {dimension_numbers = #tpu.dot_dimension_numbers<[1], [0], [0], [1], [0, 0, 1, 1], [], []>} : vector<2x16xf32>, vector<16x64xf32>, vector<2x64xf32> -> vector<2x64xf32>
    %287 = arith.addf %282, %286 : vector<2x64xf32>
    %c6_267 = arith.constant 6 : index
    %c0_268 = arith.constant 0 : index
    %288 = vector.load %arg14[%c6_267, %c0_268] : memref<32x16xf32, #tpu.memory_space<vmem>>, vector<2x16xf32>
    %c3_269 = arith.constant 3 : index
    %c0_270 = arith.constant 0 : index
    %c0_271 = arith.constant 0 : index
    %289 = vector.load %arg7[%c3_269, %c0_270, %c0_271] : memref<16x16x64xf32, #tpu.memory_space<vmem>>, vector<1x16x64xf32>
    %290 = vector.shape_cast %289 : vector<1x16x64xf32> to vector<16x64xf32>
    %cst_272 = arith.constant dense<0.000000e+00> : vector<2x64xf32>
    %291 = tpu.matmul %288, %290, %cst_272 {dimension_numbers = #tpu.dot_dimension_numbers<[1], [0], [0], [1], [0, 0, 1, 1], [], []>} : vector<2x16xf32>, vector<16x64xf32>, vector<2x64xf32> -> vector<2x64xf32>
    %292 = arith.addf %287, %291 : vector<2x64xf32>
    %c8_273 = arith.constant 8 : index
    %c0_274 = arith.constant 0 : index
    %293 = vector.load %arg14[%c8_273, %c0_274] : memref<32x16xf32, #tpu.memory_space<vmem>>, vector<2x16xf32>
    %c4_275 = arith.constant 4 : index
    %c0_276 = arith.constant 0 : index
    %c0_277 = arith.constant 0 : index
    %294 = vector.load %arg7[%c4_275, %c0_276, %c0_277] : memref<16x16x64xf32, #tpu.memory_space<vmem>>, vector<1x16x64xf32>
    %295 = vector.shape_cast %294 : vector<1x16x64xf32> to vector<16x64xf32>
    %cst_278 = arith.constant dense<0.000000e+00> : vector<2x64xf32>
    %296 = tpu.matmul %293, %295, %cst_278 {dimension_numbers = #tpu.dot_dimension_numbers<[1], [0], [0], [1], [0, 0, 1, 1], [], []>} : vector<2x16xf32>, vector<16x64xf32>, vector<2x64xf32> -> vector<2x64xf32>
    %297 = arith.addf %292, %296 : vector<2x64xf32>
    %c10_279 = arith.constant 10 : index
    %c0_280 = arith.constant 0 : index
    %298 = vector.load %arg14[%c10_279, %c0_280] : memref<32x16xf32, #tpu.memory_space<vmem>>, vector<2x16xf32>
    %c5 = arith.constant 5 : index
    %c0_281 = arith.constant 0 : index
    %c0_282 = arith.constant 0 : index
    %299 = vector.load %arg7[%c5, %c0_281, %c0_282] : memref<16x16x64xf32, #tpu.memory_space<vmem>>, vector<1x16x64xf32>
    %300 = vector.shape_cast %299 : vector<1x16x64xf32> to vector<16x64xf32>
    %cst_283 = arith.constant dense<0.000000e+00> : vector<2x64xf32>
    %301 = tpu.matmul %298, %300, %cst_283 {dimension_numbers = #tpu.dot_dimension_numbers<[1], [0], [0], [1], [0, 0, 1, 1], [], []>} : vector<2x16xf32>, vector<16x64xf32>, vector<2x64xf32> -> vector<2x64xf32>
    %302 = arith.addf %297, %301 : vector<2x64xf32>
    %c12 = arith.constant 12 : index
    %c0_284 = arith.constant 0 : index
    %303 = vector.load %arg14[%c12, %c0_284] : memref<32x16xf32, #tpu.memory_space<vmem>>, vector<2x16xf32>
    %c6_285 = arith.constant 6 : index
    %c0_286 = arith.constant 0 : index
    %c0_287 = arith.constant 0 : index
    %304 = vector.load %arg7[%c6_285, %c0_286, %c0_287] : memref<16x16x64xf32, #tpu.memory_space<vmem>>, vector<1x16x64xf32>
    %305 = vector.shape_cast %304 : vector<1x16x64xf32> to vector<16x64xf32>
    %cst_288 = arith.constant dense<0.000000e+00> : vector<2x64xf32>
    %306 = tpu.matmul %303, %305, %cst_288 {dimension_numbers = #tpu.dot_dimension_numbers<[1], [0], [0], [1], [0, 0, 1, 1], [], []>} : vector<2x16xf32>, vector<16x64xf32>, vector<2x64xf32> -> vector<2x64xf32>
    %307 = arith.addf %302, %306 : vector<2x64xf32>
    %c14_289 = arith.constant 14 : index
    %c0_290 = arith.constant 0 : index
    %308 = vector.load %arg14[%c14_289, %c0_290] : memref<32x16xf32, #tpu.memory_space<vmem>>, vector<2x16xf32>
    %c7 = arith.constant 7 : index
    %c0_291 = arith.constant 0 : index
    %c0_292 = arith.constant 0 : index
    %309 = vector.load %arg7[%c7, %c0_291, %c0_292] : memref<16x16x64xf32, #tpu.memory_space<vmem>>, vector<1x16x64xf32>
    %310 = vector.shape_cast %309 : vector<1x16x64xf32> to vector<16x64xf32>
    %cst_293 = arith.constant dense<0.000000e+00> : vector<2x64xf32>
    %311 = tpu.matmul %308, %310, %cst_293 {dimension_numbers = #tpu.dot_dimension_numbers<[1], [0], [0], [1], [0, 0, 1, 1], [], []>} : vector<2x16xf32>, vector<16x64xf32>, vector<2x64xf32> -> vector<2x64xf32>
    %312 = arith.addf %307, %311 : vector<2x64xf32>
    %c16_294 = arith.constant 16 : index
    %c0_295 = arith.constant 0 : index
    %313 = vector.load %arg14[%c16_294, %c0_295] : memref<32x16xf32, #tpu.memory_space<vmem>>, vector<2x16xf32>
    %c8_296 = arith.constant 8 : index
    %c0_297 = arith.constant 0 : index
    %c0_298 = arith.constant 0 : index
    %314 = vector.load %arg7[%c8_296, %c0_297, %c0_298] : memref<16x16x64xf32, #tpu.memory_space<vmem>>, vector<1x16x64xf32>
    %315 = vector.shape_cast %314 : vector<1x16x64xf32> to vector<16x64xf32>
    %cst_299 = arith.constant dense<0.000000e+00> : vector<2x64xf32>
    %316 = tpu.matmul %313, %315, %cst_299 {dimension_numbers = #tpu.dot_dimension_numbers<[1], [0], [0], [1], [0, 0, 1, 1], [], []>} : vector<2x16xf32>, vector<16x64xf32>, vector<2x64xf32> -> vector<2x64xf32>
    %317 = arith.addf %312, %316 : vector<2x64xf32>
    %c18_300 = arith.constant 18 : index
    %c0_301 = arith.constant 0 : index
    %318 = vector.load %arg14[%c18_300, %c0_301] : memref<32x16xf32, #tpu.memory_space<vmem>>, vector<2x16xf32>
    %c9 = arith.constant 9 : index
    %c0_302 = arith.constant 0 : index
    %c0_303 = arith.constant 0 : index
    %319 = vector.load %arg7[%c9, %c0_302, %c0_303] : memref<16x16x64xf32, #tpu.memory_space<vmem>>, vector<1x16x64xf32>
    %320 = vector.shape_cast %319 : vector<1x16x64xf32> to vector<16x64xf32>
    %cst_304 = arith.constant dense<0.000000e+00> : vector<2x64xf32>
    %321 = tpu.matmul %318, %320, %cst_304 {dimension_numbers = #tpu.dot_dimension_numbers<[1], [0], [0], [1], [0, 0, 1, 1], [], []>} : vector<2x16xf32>, vector<16x64xf32>, vector<2x64xf32> -> vector<2x64xf32>
    %322 = arith.addf %317, %321 : vector<2x64xf32>
    %c20 = arith.constant 20 : index
    %c0_305 = arith.constant 0 : index
    %323 = vector.load %arg14[%c20, %c0_305] : memref<32x16xf32, #tpu.memory_space<vmem>>, vector<2x16xf32>
    %c10_306 = arith.constant 10 : index
    %c0_307 = arith.constant 0 : index
    %c0_308 = arith.constant 0 : index
    %324 = vector.load %arg7[%c10_306, %c0_307, %c0_308] : memref<16x16x64xf32, #tpu.memory_space<vmem>>, vector<1x16x64xf32>
    %325 = vector.shape_cast %324 : vector<1x16x64xf32> to vector<16x64xf32>
    %cst_309 = arith.constant dense<0.000000e+00> : vector<2x64xf32>
    %326 = tpu.matmul %323, %325, %cst_309 {dimension_numbers = #tpu.dot_dimension_numbers<[1], [0], [0], [1], [0, 0, 1, 1], [], []>} : vector<2x16xf32>, vector<16x64xf32>, vector<2x64xf32> -> vector<2x64xf32>
    %327 = arith.addf %322, %326 : vector<2x64xf32>
    %c22_310 = arith.constant 22 : index
    %c0_311 = arith.constant 0 : index
    %328 = vector.load %arg14[%c22_310, %c0_311] : memref<32x16xf32, #tpu.memory_space<vmem>>, vector<2x16xf32>
    %c11 = arith.constant 11 : index
    %c0_312 = arith.constant 0 : index
    %c0_313 = arith.constant 0 : index
    %329 = vector.load %arg7[%c11, %c0_312, %c0_313] : memref<16x16x64xf32, #tpu.memory_space<vmem>>, vector<1x16x64xf32>
    %330 = vector.shape_cast %329 : vector<1x16x64xf32> to vector<16x64xf32>
    %cst_314 = arith.constant dense<0.000000e+00> : vector<2x64xf32>
    %331 = tpu.matmul %328, %330, %cst_314 {dimension_numbers = #tpu.dot_dimension_numbers<[1], [0], [0], [1], [0, 0, 1, 1], [], []>} : vector<2x16xf32>, vector<16x64xf32>, vector<2x64xf32> -> vector<2x64xf32>
    %332 = arith.addf %327, %331 : vector<2x64xf32>
    %c24_315 = arith.constant 24 : index
    %c0_316 = arith.constant 0 : index
    %333 = vector.load %arg14[%c24_315, %c0_316] : memref<32x16xf32, #tpu.memory_space<vmem>>, vector<2x16xf32>
    %c12_317 = arith.constant 12 : index
    %c0_318 = arith.constant 0 : index
    %c0_319 = arith.constant 0 : index
    %334 = vector.load %arg7[%c12_317, %c0_318, %c0_319] : memref<16x16x64xf32, #tpu.memory_space<vmem>>, vector<1x16x64xf32>
    %335 = vector.shape_cast %334 : vector<1x16x64xf32> to vector<16x64xf32>
    %cst_320 = arith.constant dense<0.000000e+00> : vector<2x64xf32>
    %336 = tpu.matmul %333, %335, %cst_320 {dimension_numbers = #tpu.dot_dimension_numbers<[1], [0], [0], [1], [0, 0, 1, 1], [], []>} : vector<2x16xf32>, vector<16x64xf32>, vector<2x64xf32> -> vector<2x64xf32>
    %337 = arith.addf %332, %336 : vector<2x64xf32>
    %c26_321 = arith.constant 26 : index
    %c0_322 = arith.constant 0 : index
    %338 = vector.load %arg14[%c26_321, %c0_322] : memref<32x16xf32, #tpu.memory_space<vmem>>, vector<2x16xf32>
    %c13 = arith.constant 13 : index
    %c0_323 = arith.constant 0 : index
    %c0_324 = arith.constant 0 : index
    %339 = vector.load %arg7[%c13, %c0_323, %c0_324] : memref<16x16x64xf32, #tpu.memory_space<vmem>>, vector<1x16x64xf32>
    %340 = vector.shape_cast %339 : vector<1x16x64xf32> to vector<16x64xf32>
    %cst_325 = arith.constant dense<0.000000e+00> : vector<2x64xf32>
    %341 = tpu.matmul %338, %340, %cst_325 {dimension_numbers = #tpu.dot_dimension_numbers<[1], [0], [0], [1], [0, 0, 1, 1], [], []>} : vector<2x16xf32>, vector<16x64xf32>, vector<2x64xf32> -> vector<2x64xf32>
    %342 = arith.addf %337, %341 : vector<2x64xf32>
    %c28 = arith.constant 28 : index
    %c0_326 = arith.constant 0 : index
    %343 = vector.load %arg14[%c28, %c0_326] : memref<32x16xf32, #tpu.memory_space<vmem>>, vector<2x16xf32>
    %c14_327 = arith.constant 14 : index
    %c0_328 = arith.constant 0 : index
    %c0_329 = arith.constant 0 : index
    %344 = vector.load %arg7[%c14_327, %c0_328, %c0_329] : memref<16x16x64xf32, #tpu.memory_space<vmem>>, vector<1x16x64xf32>
    %345 = vector.shape_cast %344 : vector<1x16x64xf32> to vector<16x64xf32>
    %cst_330 = arith.constant dense<0.000000e+00> : vector<2x64xf32>
    %346 = tpu.matmul %343, %345, %cst_330 {dimension_numbers = #tpu.dot_dimension_numbers<[1], [0], [0], [1], [0, 0, 1, 1], [], []>} : vector<2x16xf32>, vector<16x64xf32>, vector<2x64xf32> -> vector<2x64xf32>
    %347 = arith.addf %342, %346 : vector<2x64xf32>
    %c30 = arith.constant 30 : index
    %c0_331 = arith.constant 0 : index
    %348 = vector.load %arg14[%c30, %c0_331] : memref<32x16xf32, #tpu.memory_space<vmem>>, vector<2x16xf32>
    %c15 = arith.constant 15 : index
    %c0_332 = arith.constant 0 : index
    %c0_333 = arith.constant 0 : index
    %349 = vector.load %arg7[%c15, %c0_332, %c0_333] : memref<16x16x64xf32, #tpu.memory_space<vmem>>, vector<1x16x64xf32>
    %350 = vector.shape_cast %349 : vector<1x16x64xf32> to vector<16x64xf32>
    %cst_334 = arith.constant dense<0.000000e+00> : vector<2x64xf32>
    %351 = tpu.matmul %348, %350, %cst_334 {dimension_numbers = #tpu.dot_dimension_numbers<[1], [0], [0], [1], [0, 0, 1, 1], [], []>} : vector<2x16xf32>, vector<16x64xf32>, vector<2x64xf32> -> vector<2x64xf32>
    %352 = arith.addf %347, %351 : vector<2x64xf32>
    %cst_335 = arith.constant 0.000000e+00 : f32
    %353 = vector.broadcast %cst_335 : f32 to vector<2x64xf32>
    %354 = arith.maximumf %352, %353 : vector<2x64xf32>
    %c0_336 = arith.constant 0 : index
    %c0_337 = arith.constant 0 : index
    %355 = vector.load %arg10[%c0_336, %c0_337] : memref<64x8xf32, #tpu.memory_space<vmem>>, vector<64x8xf32>
    %cst_338 = arith.constant dense<0.000000e+00> : vector<2x8xf32>
    %356 = tpu.matmul %354, %355, %cst_338 {dimension_numbers = #tpu.dot_dimension_numbers<[1], [0], [0], [1], [0, 0, 1, 1], [], []>} : vector<2x64xf32>, vector<64x8xf32>, vector<2x8xf32> -> vector<2x8xf32>
    %c0_339 = arith.constant 0 : index
    %c0_340 = arith.constant 0 : index
    %357 = vector.load %arg11[%c0_339, %c0_340] : memref<1x8xf32, #tpu.memory_space<vmem>>, vector<1x8xf32>
    %358 = vector.broadcast %357 : vector<1x8xf32> to vector<2x8xf32>
    %359 = arith.addf %356, %358 : vector<2x8xf32>
    %c0_341 = arith.constant 0 : index
    %c0_342 = arith.constant 0 : index
    %360 = vector.load %arg12[%c0_341, %c0_342] : memref<2x8xf32, #tpu.memory_space<vmem>>, vector<2x8xf32>
    tpu.vector_store %arg12[%c0_341, %c0_342], %359 {strides = array<i32>} : memref<2x8xf32, #tpu.memory_space<vmem>>, vector<2x8xf32>,
    return
  }
}

</mosaic_0001>

<bundles_post_ra>
// kernel: custom_model_forward.1
= control target key start
LH: loop header
LB: loop body
LE: loop exit
PB: predicated region body
PF: predicated region fallthrough
CT: control target
= control target key end

     0   :  { %vm111_vm0 = vcmask 1043456   ;;  %v4765_v2 = vmov 0   ;;  %vm62_vm1 = vcmask 293888   ;;  %s4767_s15 = smov 112   ;;  %vm978_vm2 = vcmask 130048   ;;  %s4769_s16 = smov 32   ;;  %s6721_s2 = inlined_call_operand.vmem [shape: f32[36,8], index: 2, kind: input, shape index: {}]   ;;  %s6722_s0 = inlined_call_operand.vmem [shape: f32[4,128,36], index: 0, kind: input, shape index: {}]   ;;  %s6723_s6 = inlined_call_operand.vmem [shape: f32[3,3,32,1], index: 6, kind: input, shape index: {}]   ;;  %s6724_s4 = inlined_call_operand.vmem [shape: f32[8,144], index: 4, kind: input, shape index: {}]   ;;  %s6725_s3 = inlined_call_operand.vmem [shape: f32[1,8], index: 3, kind: input, shape index: {}]   ;;  %s6726_s8 = inlined_call_operand.vmem [shape: f32[4,64], index: 8, kind: input, shape index: {}]   ;;  %s6727_s7 = inlined_call_operand.vmem [shape: f32[16,16,64], index: 7, kind: input, shape index: {}]   ;;  %s6728_s1 = inlined_call_operand.vmem [shape: f32[2,4], index: 1, kind: input, shape index: {}]   ;;  %s6729_s5 = inlined_call_operand.vmem [shape: f32[1,16], index: 5, kind: input, shape index: {}]   ;;  %s6730_s10 = inlined_call_operand.vmem [shape: f32[64,8], index: 10, kind: input, shape index: {}]   ;;  %s6731_s9 = inlined_call_operand.vmem [shape: f32[1,64], index: 9, kind: input, shape index: {}]   ;;  %s6732_s11 = inlined_call_operand.vmem [shape: f32[1,8], index: 11, kind: input, shape index: {}]   ;;  %s6733_s12 = inlined_call_operand.vmem [shape: f32[2,8], index: 12, kind: output, shape index: {}]  }
   0x1   :  { %v4843_v0 = vld [vmem:[%s6721_s2 + $0x20] sm:$0xf]  ;;  %v4848_v1 = vld [vmem:[%s6721_s2 + $0x18] sm:$0xff]  ;;  %4760 = vset.pattern.permute.xlu1 %v4765_v2  ;;  %4759 = vset.pattern.permute.xlu0 %v4765_v2  ;;  %v4861_v3 = vld [vmem:[%s6721_s2 + $0x10] sm:$0xff]  ;;  %vm1012_vm3 = vcmask 64512   ;;  %vm1483_vm4 = vcmask 1045504  }
   0x2   :  { %4467 = vmatprep.subr.msk.mxu0 %vm111_vm0, %v4843_v0  ;;  %4501 = vmatprep.subr.msk.mxu1 %vm111_vm0, %v4843_v0  ;;  %v4870_v4 = vld [vmem:[%s6721_s2 + $0x8] sm:$0xff]  ;;  %v4879_v5 = vld [vmem:[%s6721_s2] sm:$0xff]  ;;  %v43_v10 = vld [vmem:[%s6722_s0 + $0x10] sm:$0xff]  ;;  %s4770_s2 = smov 80   ;;  %s4772_s19 = smov 48   ;;  %vm1896_vm5 = vcmask 1041408  }
   0x3   :  { %4468 = vmatpush3.msk.msra.mxu0 %vm111_vm0, %v4843_v0  ;;  %4502 = vmatpush3.msk.msra.mxu1 %vm111_vm0, %v4843_v0  ;;  %v41_v6 = vld [vmem:[%s6722_s0] sm:$0xff]  ;;  %v42_v8 = vld [vmem:[%s6722_s0 + $0x8] sm:$0xff]  ;;  %v4130_v11 = vld [vmem:[%s6722_s0 + $0x90] sm:$0xff]  ;;  %s4773_s20 = smov 16   ;;  %vm4774_vm6 = vmmov 0   ;;  %vm2691_vm7 = vcmask 31744  }
   0x4   :  { %4469 = vmatprep.subr.mxu0 %v4848_v1  ;;  %4503 = vmatprep.subr.mxu1 %v4848_v1  ;;  %v4128_v7 = vld [vmem:[%s6722_s0 + $0x80] sm:$0xff]  ;;  %v4129_v9 = vld [vmem:[%s6722_s0 + $0x88] sm:$0xff]  ;;  %v44_v12 = vld [vmem:[%s6722_s0 + $0x18] sm:$0xff]  ;;  %vm2675_vm8 = vcmask 130054   ;;  %vm2680_vm9 = vcmask 128000   ;;  %vm4031_vm10 = vcmask 523264  }
   0x5   :  { %4470 = vmatpush3.msra.mxu0 %v4848_v1  ;;  %4504 = vmatpush3.msra.mxu1 %v4848_v1  ;;  %v4131_v13 = vld [vmem:[%s6722_s0 + $0x98] sm:$0xff]  ;;  %v45_v14 = vld [vmem:[%s6722_s0 + $0x20] sm:$0xff]  ;;  %v46_v16 = vld [vmem:[%s6722_s0 + $0x28] sm:$0xff]  ;;  %vm4105_vm11 = vcmask 58368  }
   0x6   :  { %4471 = vmatprep.subr.mxu0 %v4861_v3  ;;  %4505 = vmatprep.subr.mxu1 %v4861_v3  ;;  %v4132_v15 = vld [vmem:[%s6722_s0 + $0xa0] sm:$0xff]  ;;  %v4133_v17 = vld [vmem:[%s6722_s0 + $0xa8] sm:$0xff]  ;;  %v47_v18 = vld [vmem:[%s6722_s0 + $0x30] sm:$0xff] }
   0x7   :  { %4472 = vmatpush3.msra.mxu0 %v4861_v3  ;;  %4506 = vmatpush3.msra.mxu1 %v4861_v3  ;;  %v4134_v19 = vld [vmem:[%s6722_s0 + $0xb0] sm:$0xff]  ;;  %v48_v20 = vld [vmem:[%s6722_s0 + $0x38] sm:$0xff]  ;;  %v49_v22 = vld [vmem:[%s6722_s0 + $0x40] sm:$0xff] }
   0x8   :  { %4473 = vmatprep.subr.mxu0 %v4870_v4  ;;  %4507 = vmatprep.subr.mxu1 %v4870_v4  ;;  %v4135_v21 = vld [vmem:[%s6722_s0 + $0xb8] sm:$0xff]  ;;  %v4136_v23 = vld [vmem:[%s6722_s0 + $0xc0] sm:$0xff]  ;;  %v50_v24 = vld [vmem:[%s6722_s0 + $0x48] sm:$0xff] }
   0x9   :  { %4474 = vmatpush3.msra.mxu0 %v4870_v4  ;;  %4508 = vmatpush3.msra.mxu1 %v4870_v4  ;;  %v4137_v25 = vld [vmem:[%s6722_s0 + $0xc8] sm:$0xff]  ;;  %v51_v26 = vld [vmem:[%s6722_s0 + $0x50] sm:$0xff]  ;;  %v52_v28 = vld [vmem:[%s6722_s0 + $0x58] sm:$0xff] }
   0xa   :  { %4475 = vmatprep.subr.mxu0 %v4879_v5  ;;  %4509 = vmatprep.subr.mxu1 %v4879_v5  ;;  %v4138_v27 = vld [vmem:[%s6722_s0 + $0xd0] sm:$0xff]  ;;  %v4139_v29 = vld [vmem:[%s6722_s0 + $0xd8] sm:$0xff]  ;;  %v53_v30 = vld [vmem:[%s6722_s0 + $0x60] sm:$0xff] }
   0xb   :  { %4476 = vmatpush3.msra.mxu0 %v4879_v5  ;;  %4477 = vmatprep.mubr.msk.f32.mxu0 %vm62_vm1, %v41_v6  ;;  %v4140_v31 = vld [vmem:[%s6722_s0 + $0xe0] sm:$0xff]  ;;  %v4255_v32 = vld [vmem:[%s6723_s6 + $0x50] sm:$0xff]  ;;  %v54_v34 = vld [vmem:[%s6722_s0 + $0x68] sm:$0xff] }
   0xc   :  { %4510 = vmatpush3.msra.mxu1 %v4879_v5  ;;  %4511 = vmatprep.mubr.msk.f32.mxu1 %vm62_vm1, %v4128_v7  ;;  %v4253_v33 = vld [vmem:[%s6723_s6 + $0x40] sm:$0xff]  ;;  %v4141_v35 = vld [vmem:[%s6722_s0 + $0xe8] sm:$0xff]  ;;  %v55_v36 = vld [vmem:[%s6722_s0 + $0x70] sm:$0xff] }
   0xd   :  { %4478 = vmatmul.mubr.msk.f32.vlgmr.msra.gmra.mxu0 %vm62_vm1, %v42_v8  ;;  %4512 = vmatmul.mubr.msk.f32.vlgmr.msra.gmra.mxu1 %vm62_vm1, %v4129_v9  ;;  %v4142_v37 = vld [vmem:[%s6722_s0 + $0xf0] sm:$0xff]  ;;  %v4244_v38 = vld [vmem:[%s6723_s6 + $0x20] sm:$0xff]  ;;  %v4254_v39 = vld [vmem:[%s6723_s6 + $0x48] sm:$0xff] }
   0xe   :  { %4535 = vmatprep.subr.msk.mxu0 %vm111_vm0, %v4843_v0  ;;  %4480 = vmatprep.mubr.msk.f32.mxu0 %vm62_vm1, %v43_v10  ;;  %v56_v40 = vld [vmem:[%s6722_s0 + $0x78] sm:$0xff]  ;;  %v4161_v42 = vld [vmem:[%s6722_s0 + $0x100] sm:$0xff]  ;;  %v4196_v43 = vld [vmem:[%s6722_s0 + $0x190] sm:$0xff] }
   0xf   :  { %4536 = vmatpush3.msk.msra.mxu0 %vm111_vm0, %v4843_v0  ;;  %4514 = vmatprep.mubr.msk.f32.mxu1 %vm62_vm1, %v4130_v11  ;;  %v4143_v41 = vld [vmem:[%s6722_s0 + $0xf8] sm:$0xff]  ;;  %v4258_v44 = vld [vmem:[%s6723_s6 + $0xa8] sm:$0xff]  ;;  %v4257_v45 = vld [vmem:[%s6723_s6 + $0xa0] sm:$0xff] }
  0x10   :  { %4739 = vmatprep.subr.msk.mxu1 %vm111_vm0, %v4843_v0  ;;  %4537 = vmatprep.subr.mxu0 %v4848_v1  ;;  %v4162_v46 = vld [vmem:[%s6722_s0 + $0x108] sm:$0xff]  ;;  %v4197_v47 = vld [vmem:[%s6722_s0 + $0x198] sm:$0xff]  ;;  %v4163_v48 = vld [vmem:[%s6722_s0 + $0x110] sm:$0xff] }
  0x11   :  { %4481 = vmatmul.mubr.msk.f32.gmra.mxu0 %vm62_vm1, %v44_v12  ;;  %4515 = vmatmul.mubr.msk.f32.gmra.mxu1 %vm62_vm1, %v4131_v13  ;;  %v4198_v49 = vld [vmem:[%s6722_s0 + $0x1a0] sm:$0xff]  ;;  %v4259_v50 = vld [vmem:[%s6723_s6 + $0xb0] sm:$0xff]  ;;  %v4245_v51 = vld [vmem:[%s6723_s6 + $0x28] sm:$0xff] }
  0x12   :  { %4483 = vmatprep.mubr.msk.f32.mxu0 %vm62_vm1, %v45_v14  ;;  %4517 = vmatprep.mubr.msk.f32.mxu1 %vm62_vm1, %v4132_v15  ;;  %v4164_v52 = vld [vmem:[%s6722_s0 + $0x118] sm:$0xff]  ;;  %v4199_v53 = vld [vmem:[%s6722_s0 + $0x1a8] sm:$0xff]  ;;  %v4165_v54 = vld [vmem:[%s6722_s0 + $0x120] sm:$0xff] }
  0x13   :  { %4744 = vmatpush3.msk.msra.mxu1 %vm111_vm0, %v4843_v0  ;;  %4538 = vmatpush3.msra.mxu0 %v4848_v1  ;;  %v4200_v55 = vld [vmem:[%s6722_s0 + $0x1b0] sm:$0xff]  ;;  %v4249_v56 = vld [vmem:[%s6723_s6 + $0x68] sm:$0xff]  ;;  %v4248_v57 = vld [vmem:[%s6723_s6 + $0x60] sm:$0xff] }
  0x14   :  { %4539 = vmatprep.subr.mxu0 %v4861_v3  ;;  %4740 = vmatprep.subr.mxu1 %v4848_v1  ;;  %v4166_v58 = vld [vmem:[%s6722_s0 + $0x128] sm:$0xff]  ;;  %v4201_v59 = vld [vmem:[%s6722_s0 + $0x1b8] sm:$0xff]  ;;  %v4167_v60 = vld [vmem:[%s6722_s0 + $0x130] sm:$0xff] }
  0x15   :  { %4484 = vmatmul.mubr.msk.f32.gmra.mxu0 %vm62_vm1, %v46_v16  ;;  %4518 = vmatmul.mubr.msk.f32.gmra.mxu1 %vm62_vm1, %v4133_v17  ;;  %v4202_v61 = vld [vmem:[%s6722_s0 + $0x1c0] sm:$0xff]  ;;  %v4246_v62 = vld [vmem:[%s6723_s6 + $0x30] sm:$0xff]  ;;  %v4168_v63 = vld [vmem:[%s6722_s0 + $0x138] sm:$0xff] }
  0x16   :  { %4486 = vmatprep.mubr.msk.f32.mxu0 %vm62_vm1, %v47_v18  ;;  %4520 = vmatprep.mubr.msk.f32.mxu1 %vm62_vm1, %v4134_v19  ;;  %v4204_v2 = vld [vmem:[%s6722_s0 + $0x1d0] sm:$0xff]  ;;  %v4261_v6 = vld [vmem:[%s6723_s6 + $0xc0] sm:$0xff]  ;;  %v4170_v7 = vld [vmem:[%s6722_s0 + $0x148] sm:$0xff] }
  0x17   :  { %4540 = vmatpush3.msra.mxu0 %v4861_v3  ;;  %4745 = vmatpush3.msra.mxu1 %v4848_v1  ;;  %v4171_v8 = vld [vmem:[%s6722_s0 + $0x150] sm:$0xff]  ;;  %v4206_v9 = vld [vmem:[%s6722_s0 + $0x1e0] sm:$0xff]  ;;  %v4262_v10 = vld [vmem:[%s6723_s6 + $0xc8] sm:$0xff] }
  0x18   :  { %4741 = vmatprep.subr.mxu1 %v4861_v3  ;;  %4541 = vmatprep.subr.mxu0 %v4870_v4  ;;  %v4172_v11 = vld [vmem:[%s6722_s0 + $0x158] sm:$0xff]  ;;  %v4173_v12 = vld [vmem:[%s6722_s0 + $0x160] sm:$0xff]  ;;  %v4208_v13 = vld [vmem:[%s6722_s0 + $0x1f0] sm:$0xff] }
  0x19   :  { %4487 = vmatmul.mubr.msk.f32.gmra.mxu0 %vm62_vm1, %v48_v20  ;;  %4521 = vmatmul.mubr.msk.f32.gmra.mxu1 %vm62_vm1, %v4135_v21  ;;  %v4266_v14 = vld [vmem:[%s6723_s6 + $0xe8] sm:$0xff]  ;;  %v4175_v16 = vld [vmem:[%s6722_s0 + $0x170] sm:$0xff]  ;;  %v4251_v17 = vld [vmem:[%s6723_s6 + $0x78] sm:$0xff] }
  0x1a   :  { %4489 = vmatprep.mubr.msk.f32.mxu0 %vm62_vm1, %v49_v22  ;;  %4523 = vmatprep.mubr.msk.f32.mxu1 %vm62_vm1, %v4136_v23  ;;  %v4174_v15 = vld [vmem:[%s6722_s0 + $0x168] sm:$0xff]  ;;  %v4176_v18 = vld [vmem:[%s6722_s0 + $0x178] sm:$0xff]  ;;  %v4194_v19 = vld [vmem:[%s6722_s0 + $0x180] sm:$0xff] }
  0x1b   :  { %4746 = vmatpush3.msra.mxu1 %v4861_v3  ;;  %4542 = vmatpush3.msra.mxu0 %v4870_v4  ;;  %v4267_v20 = vld [vmem:[%s6723_s6 + $0xf0] sm:$0xff]  ;;  %v4195_v21 = vld [vmem:[%s6722_s0 + $0x188] sm:$0xff]  ;;  %v4268_v22 = vld [vmem:[%s6723_s6 + $0xf8] sm:$0xff] }
  0x1c   :  { %4543 = vmatprep.subr.mxu0 %v4879_v5  ;;  %4742 = vmatprep.subr.mxu1 %v4870_v4  ;;  %v4256_v23 = vld [vmem:[%s6723_s6 + $0x58] sm:$0xff] }
  0x1d   :  { %4490 = vmatmul.mubr.msk.f32.gmra.mxu0 %vm62_vm1, %v50_v24  ;;  %4524 = vmatmul.mubr.msk.f32.gmra.mxu1 %vm62_vm1, %v4137_v25  ;;  %v1123_v24 = vld [vmem:[%s6724_s4 + $0x8] sm:$0xff]  ;;  %v5241_v25 = vld [vmem:[%s6724_s4] sm:$0xff] }
  0x1e   :  { %4492 = vmatprep.mubr.msk.f32.mxu0 %vm62_vm1, %v51_v26  ;;  %4526 = vmatprep.mubr.msk.f32.mxu1 %vm62_vm1, %v4138_v27  ;;  %v4260_v26 = vld [vmem:[%s6723_s6 + $0xb8] sm:$0xff]  ;;  %v4250_v27 = vld [vmem:[%s6723_s6 + $0x70] sm:$0xff] }
  0x1f   :  { %4544 = vmatpush3.msra.mxu0 %v4879_v5  ;;  %4747 = vmatpush3.msra.mxu1 %v4870_v4 }
  0x20   :  { %4743 = vmatprep.subr.mxu1 %v4879_v5  ;;  %4569 = vmatprep.subr.msk.mxu0 %vm111_vm0, %v4843_v0 }
  0x21   :  { %4493 = vmatmul.mubr.msk.f32.gmra.mxu0 %vm62_vm1, %v52_v28  ;;  %4527 = vmatmul.mubr.msk.f32.gmra.mxu1 %vm62_vm1, %v4139_v29  ;;  %v4265_v28 = vld [vmem:[%s6723_s6 + $0xe0] sm:$0xff]  ;;  %v4247_v29 = vld [vmem:[%s6723_s6 + $0x38] sm:$0xff] }
  0x22   :  { %4495 = vmatprep.mubr.msk.f32.mxu0 %vm62_vm1, %v53_v30  ;;  %4529 = vmatprep.mubr.msk.f32.mxu1 %vm62_vm1, %v4140_v31  ;;  %v4263_v30 = vld [vmem:[%s6723_s6 + $0xd0] sm:$0xff]  ;;  %v1464_v31 = vld [vmem:[%s6723_s6 + $0x8] sm:$0xff] }
  0x23   :  { %4748 = vmatpush3.msra.mxu1 %v4879_v5  ;;  %1890 = vperm.xlu1 %4760, %v4255_v32   ;;  %v4264_v32 = vld [vmem:[%s6723_s6 + $0xd8] sm:$0xff] }
  0x24   :  { %1882 = vperm.xlu0 %4759, %v4253_v33   ;;  %1166 = vmatprep.subr.mxu1 %v1123_v24  ;;  %v4269_v33 = vld [vmem:[%s6723_s6 + $0x100] sm:$0xff] }
  0x25   :  { %4496 = vmatmul.mubr.msk.f32.gmra.mxu0 %vm62_vm1, %v54_v34  ;;  %4530 = vmatmul.mubr.msk.f32.gmra.mxu1 %vm62_vm1, %v4141_v35  ;;  %v6734_v34 = vmov 0.0   ;;  %v1463_v35 = vld [vmem:[%s6723_s6] sm:$0xff] }
  0x26   :  { %4498 = vmatprep.mubr.msk.f32.mxu0 %vm62_vm1, %v55_v36  ;;  %4532 = vmatprep.mubr.msk.f32.mxu1 %vm62_vm1, %v4142_v37  ;;  %977 = vst [vmem:[#allocation2] sm:$0xff] %v6734_v34  ;;  %984 = vst [vmem:[#allocation2 + $0x90] sm:$0xff] %v6734_v34  ;;  %v4271_v36 = vld [vmem:[%s6723_s6 + $0x110] sm:$0xff] }
  0x27   :  { %1517 = vperm.xlu1 %4760, %v4244_v38   ;;  %988 = vst [vmem:[#allocation2 + $0x110] sm:$0xff] %v6734_v34  ;;  %990 = vst [vmem:[#allocation2 + $0x180] sm:$0xff] %v6734_v34  ;;  %v1465_v37 = vld [vmem:[%s6723_s6 + $0x10] sm:$0xff]  ;;  %v1466_v38 = vld [vmem:[%s6723_s6 + $0x18] sm:$0xff] }
  0x28   :  { %1886 = vperm.xlu0 %4759, %v4254_v39   ;;  %992 = vst [vmem:[#allocation2 + $0x190] sm:$0xff] %v6734_v34  ;;  %994 = vst [vmem:[#allocation2 + $0x60] sm:$0xff] %v6734_v34  ;;  %v4270_v39 = vld [vmem:[%s6723_s6 + $0x108] sm:$0xff] }
  0x29   :  { %4499 = vmatmul.mubr.msk.f32.gmra.mxu0 %vm62_vm1, %v56_v40  ;;  %4533 = vmatmul.mubr.msk.f32.gmra.mxu1 %vm62_vm1, %v4143_v41  ;;  %998 = vst [vmem:[#allocation2 + $0xe0] sm:$0xff] %v6734_v34  ;;  %1002 = vst [vmem:[#allocation2 + $0x160] sm:$0xff] %v6734_v34  ;;  %v4272_v40 = vld [vmem:[%s6723_s6 + $0x118] sm:$0xff]  ;;  %s4768_s6 = smov 96  }
  0x2a   :  { %4545 = vmatprep.mubr.msk.f32.mxu0 %vm62_vm1, %v4161_v42  ;;  %4582 = vmatprep.mubr.msk.f32.mxu1 %vm62_vm1, %v4196_v43  ;;  %999 = vst.msk [vmem:[#allocation2 + $0xe8] sm:$0xff] %vm978_vm2, %v6734_v34  ;;  %995 = vst.msk [vmem:[#allocation2 + $0x68] sm:$0xff] %vm978_vm2, %v6734_v34 }
  0x2b   :  { %1992 = vperm.xlu1 %4760, %v4258_v44   ;;  %997 = vst.msk [vmem:[#allocation2 + $0x78] sm:$0xff] %vm978_vm2, %v6734_v34  ;;  %1003 = vst.msk [vmem:[#allocation2 + $0x168] sm:$0xff] %vm978_vm2, %v6734_v34 }
  0x2c   :  { %1988 = vperm.xlu0 %4759, %v4257_v45  }
  0x2d   :  { %4546 = vmatmul.mubr.msk.f32.vlgmr.msra.gmra.mxu0 %vm62_vm1, %v4162_v46  ;;  %4583 = vmatmul.mubr.msk.f32.vlgmr.msra.gmra.mxu1 %vm62_vm1, %v4197_v47 }
  0x2e   :  { %4548 = vmatprep.mubr.msk.f32.mxu0 %vm62_vm1, %v4163_v48  ;;  %4585 = vmatprep.mubr.msk.f32.mxu1 %vm62_vm1, %v4198_v49 }
  0x2f   :  { %4570 = vmatpush3.msk.msra.mxu0 %vm111_vm0, %v4843_v0  ;;  %1996 = vperm.xlu1 %4760, %v4259_v50   ;;  %v4203_v0 = vld [vmem:[%s6722_s0 + $0x1c8] sm:$0xff] }
  0x30   :  { %4571 = vmatprep.subr.mxu0 %v4848_v1  ;;  %1522 = vperm.xlu0 %4759, %v4245_v51  }
  0x31   :  { %4549 = vmatmul.mubr.msk.f32.gmra.mxu0 %vm62_vm1, %v4164_v52  ;;  %4586 = vmatmul.mubr.msk.f32.gmra.mxu1 %vm62_vm1, %v4199_v53 }
  0x32   :  { %4551 = vmatprep.mubr.msk.f32.mxu0 %vm62_vm1, %v4165_v54  ;;  %4588 = vmatprep.mubr.msk.f32.mxu1 %vm62_vm1, %v4200_v55 }
  0x33   :  { %4572 = vmatpush3.msra.mxu0 %v4848_v1  ;;  %1622 = vperm.xlu1 %4760, %v4249_v56   ;;  %v4169_v1 = vld [vmem:[%s6722_s0 + $0x140] sm:$0xff] }
  0x34   :  { %4573 = vmatprep.subr.mxu0 %v4861_v3  ;;  %1618 = vperm.xlu0 %4759, %v4248_v57  }
  0x35   :  { %4552 = vmatmul.mubr.msk.f32.gmra.mxu0 %vm62_vm1, %v4166_v58  ;;  %4589 = vmatmul.mubr.msk.f32.gmra.mxu1 %vm62_vm1, %v4201_v59  ;;  %v1741_v58 = vld [vmem:[#allocation2 + $0x190] sm:$0xc0] }
  0x36   :  { %4554 = vmatprep.mubr.msk.f32.mxu0 %vm62_vm1, %v4167_v60  ;;  %4591 = vmatprep.mubr.msk.f32.mxu1 %vm62_vm1, %v4202_v61 }
  0x37   :  { %4574 = vmatpush3.msra.mxu0 %v4861_v3  ;;  %1527 = vperm.xlu1 %4760, %v4246_v62   ;;  %v4205_v3 = vld [vmem:[%s6722_s0 + $0x1d8] sm:$0xff] }
  0x38   :  { %4575 = vmatprep.subr.mxu0 %v4870_v4  ;;  %1894 = vperm.xlu0 %4759, %v4256_v23  }
  0x39   :  { %4555 = vmatmul.mubr.msk.f32.gmra.mxu0 %vm62_vm1, %v4168_v63  ;;  %4592 = vmatmul.mubr.msk.f32.gmra.mxu1 %vm62_vm1, %v4203_v0  ;;  %v1606_v63 = vld [vmem:[#allocation2 + $0x90] sm:$0xc0] }
  0x3a   :  { %4557 = vmatprep.mubr.msk.f32.mxu0 %vm62_vm1, %v4169_v1  ;;  %4594 = vmatprep.mubr.msk.f32.mxu1 %vm62_vm1, %v4204_v2 }
  0x3b   :  { %4576 = vmatpush3.msra.mxu0 %v4870_v4  ;;  %2271 = vperm.xlu1 %4760, %v4261_v6   ;;  %v4207_v4 = vld [vmem:[%s6722_s0 + $0x1e8] sm:$0xff] }
  0x3c   :  { %4577 = vmatprep.subr.mxu0 %v4879_v5  ;;  %1167 = vmatpush1.msra.mxu1 %v5241_v25 }
  0x3d   :  { %4558 = vmatmul.mubr.msk.f32.gmra.mxu0 %vm62_vm1, %v4170_v7  ;;  %4595 = vmatmul.mubr.msk.f32.gmra.mxu1 %vm62_vm1, %v4205_v3 }
  0x3e   :  { %4560 = vmatprep.mubr.msk.f32.mxu0 %vm62_vm1, %v4171_v8  ;;  %4597 = vmatprep.mubr.msk.f32.mxu1 %vm62_vm1, %v4206_v9 }
  0x3f   :  { %4578 = vmatpush3.msra.mxu0 %v4879_v5  ;;  %2275 = vperm.xlu1 %4760, %v4262_v10   ;;  %v4209_v5 = vld [vmem:[%s6722_s0 + $0x1f8] sm:$0xff] }
  0x40   :  { %1055 = vmatprep.subr.mxu0 %v1123_v24  ;;  %1390 = vmatprep.subr.mxu1 %v1123_v24 }
  0x41   :  { %4561 = vmatmul.mubr.msk.f32.gmra.mxu0 %vm62_vm1, %v4172_v11  ;;  %4598 = vmatmul.mubr.msk.f32.gmra.mxu1 %vm62_vm1, %v4207_v4 }
  0x42   :  { %4563 = vmatprep.mubr.msk.f32.mxu0 %vm62_vm1, %v4173_v12  ;;  %4600 = vmatprep.mubr.msk.f32.mxu1 %vm62_vm1, %v4208_v13 }
  0x43   :  { %2340 = vperm.xlu1 %4760, %v4266_v14   ;;  %2000 = vperm.xlu0 %4759, %v4260_v26  }
  0x45   :  { %4564 = vmatmul.mubr.msk.f32.gmra.mxu0 %vm62_vm1, %v4174_v15  ;;  %4601 = vmatmul.mubr.msk.f32.gmra.mxu1 %vm62_vm1, %v4209_v5 }
  0x46   :  { %4566 = vmatprep.mubr.msk.f32.mxu0 %vm62_vm1, %v4175_v16  ;;  %1200 = vmatprep.mubr.f32.mxu1 %v6734_v34 }
  0x47   :  { %1630 = vperm.xlu1 %4760, %v4251_v17   ;;  %1626 = vperm.xlu0 %4759, %v4250_v27  }
  0x49   :  { %4567 = vmatmul.mubr.msk.f32.gmra.mxu0 %vm62_vm1, %v4176_v18 }
  0x4a   :  { %4579 = vmatprep.mubr.msk.f32.mxu0 %vm62_vm1, %v4194_v19 }
  0x4b   :  { %2345 = vperm.xlu1 %4760, %v4267_v20   ;;  %2335 = vperm.xlu0 %4759, %v4265_v28  }
  0x4d   :  { %4580 = vmatmul.mubr.msk.f32.vlgmr.msra.gmra.mxu0 %vm62_vm1, %v4195_v21 }
  0x4e   :  { %1056 = vmatpush1.msra.mxu0 %v5241_v25  ;;  %1089 = vmatprep.mubr.f32.mxu0 %v6734_v34 }
  0x4f   :  { %2350 = vperm.xlu1 %4760, %v4268_v22   ;;  %1278 = vmatprep.subr.mxu0 %v1123_v24 }
  0x50   :  { %1532 = vperm.xlu0 %4759, %v4247_v29  }
  0x53   :  { %1473 = vperm.xlu1 %4760, %v1464_v31  }
  0x54   :  { %2279 = vperm.xlu0 %4759, %v4263_v30  }
  0x57   :  { %2593 = vperm.xlu1 %4760, %v4269_v33  }
  0x58   :  { %2283 = vperm.xlu0 %4759, %v4264_v32  }
  0x5b   :  { %2601 = vperm.xlu1 %4760, %v4271_v36  }
  0x5c   :  { %1469 = vperm.xlu0 %4759, %v1463_v35  }
  0x5f   :  { %1481 = vperm.xlu1 %4760, %v1466_v38  }
  0x60   :  { %1477 = vperm.xlu0 %4759, %v1465_v37  }
  0x63   :  { %2605 = vperm.xlu1 %4760, %v4272_v40  }
  0x64   :  { %2597 = vperm.xlu0 %4759, %v4270_v39  }
  0x9e   :  { %v5297_v41 = vpop.permute.xlu1 %1890 }
  0x9f   :  { %6769 = vst [vmem:[#allocation4_spill] sm:$0xff] %v5297_v41  ;;  %v5303_v44 = vpop.permute.xlu0 %1882 }
  0xa0   :  { %6771 = vst [vmem:[#allocation6_spill] sm:$0xff] %v5303_v44 }
  0xa2   :  { %v1518_v42 = vpop.permute.xlu1 %1517 }
  0xa3   :  { %v5299_v43 = vmul.f32 0.0, %v1518_v42  ;;  %v5307_v46 = vpop.permute.xlu0 %1886 }
  0xa4   :  { %6773 = vst [vmem:[#allocation8_spill] sm:$0xff] %v5307_v46 }
  0xa5   :  { %6770 = vst [vmem:[#allocation5_spill] sm:$0xff] %v5299_v43  ;;  %1857 = vrot.lane.b32.xlu0 %v5299_v43, %s4767_s15  ;;  %v5318_v51 = vrot.slane %v5299_v43, 2 }
  0xa6   :  { %v5305_v45 = vpop.permute.xlu1 %1992 }
  0xa7   :  { %6772 = vst [vmem:[#allocation7_spill] sm:$0xff] %v5305_v45  ;;  %v5313_v49 = vpop.permute.xlu0 %1988  ;;  %6777 = vst [vmem:[#allocation12_spill] sm:$0xff] %v5318_v51  ;;  %1550 = vrot.lane.b32.xlu1 %v5318_v51, %s4767_s15 }
  0xa8   :  { %6775 = vst [vmem:[#allocation10_spill] sm:$0xff] %v5313_v49  ;;  %v5430_v49 = vld [vmem:[%s6725_s3] ss:$0 sm:$0xff]  ;;  %s4771_s3 = smov 64  }
  0xaa   :  { %v5309_v47 = vpop.permute.xlu1 %1996 }
  0xab   :  { %6774 = vst [vmem:[#allocation9_spill] sm:$0xff] %v5309_v47  ;;  %v5330_v52 = vpop.permute.xlu0 %1522  ;;  %1586 = vrot.lane.b32.xlu1 %v5318_v51, %s4768_s6 }
  0xac   :  { %6778 = vst [vmem:[#allocation13_spill] sm:$0xff] %v5330_v52 }
  0xae   :  { %v5311_v48 = vpop.permute.xlu1 %1622 }
  0xaf   :  { %v1619_v55 = vpop.permute.xlu0 %1618 }
  0xb0   :  { %v5340_v57 = vrot.slane %v1619_v55, 2 }
  0xb2   :  { %v5315_v50 = vpop.permute.xlu1 %1527  ;;  %v1746_v59 = vmul.f32 %v1741_v58, %v5340_v57  ;;  %v5360_v6 = vmul.f32 %v5340_v57, %v1606_v63 }
  0xb3   :  { %6776 = vst [vmem:[#allocation11_spill] sm:$0xff] %v5315_v50 }
  0xb4   :  { %1756 = vrot.lane.b32.xlu1 %v1746_v59, %s4769_s16  ;;  %6783 = vst [vmem:[#allocation18_spill] sm:$0xff] %v5360_v6 }
  0xb6   :  { %v5332_v53 = vpop.permute.xlu1 %2271 }
  0xba   :  { %v5336_v54 = vpop.permute.xlu1 %2275 }
  0xbe   :  { %v5338_v56 = vpop.permute.xlu1 %2340 }
  0xbf   :  { %6779 = vst [vmem:[#allocation14_spill] sm:$0xff] %v5338_v56 }
  0xc2   :  { %v5343_v60 = vpop.permute.xlu1 %1630 }
  0xc6   :  { %v5346_v61 = vpop.permute.xlu1 %2345 }
  0xc7   :  { %6780 = vst [vmem:[#allocation15_spill] sm:$0xff] %v5346_v61 }
  0xca   :  { %v5348_v62 = vpop.permute.xlu1 %2350 }
  0xcb   :  { %6781 = vst [vmem:[#allocation16_spill] sm:$0xff] %v5348_v62  ;;  %v5351_v0 = vmul.f32 0.0, %v5348_v62 }
  0xcd   :  { %6782 = vst [vmem:[#allocation17_spill] sm:$0xff] %v5351_v0  ;;  %v5353_v1 = vpop.f32.mrf.mxu0  ;;  %v5355_v2 = vpop.f32.mrf.mxu1  ;;  %2546 = vrot.lane.b32.xlu0 %v5351_v0, %s4769_s16 }
  0xcf   :  { %v5362_v7 = vpop.f32.mrf.mxu0  ;;  %v5364_v3 = vpop.f32.mrf.mxu1 }
  0xd1   :  { %v5366_v8 = vpop.f32.mrf.mxu0  ;;  %v5368_v9 = vpop.f32.mrf.mxu1  ;;  %1654 = vrot.lane.b32.xlu0 %v5360_v6, %s4770_s2 }
  0xd3   :  { %v5374_v11 = vpop.f32.mrf.mxu0  ;;  %v5376_v4 = vpop.f32.mrf.mxu1 }
  0xd5   :  { %v4485_v12 = vpop.f32.mrf.mxu0  ;;  %v4519_v13 = vpop.f32.mrf.mxu1  ;;  %2192 = vrot.lane.b32.xlu0 %v1746_v59, %s4770_s2 }
  0xd6   :  { %v475_v26 = vmax.f32 %v4485_v12, %v4519_v13 }
  0xd7   :  { %v201_v14 = vpop.f32.mrf.mxu0  ;;  %v411_v15 = vpop.f32.mrf.mxu1 }
  0xd8   :  { %v474_v43 = vmax.f32 %v201_v14, %v411_v15 }
  0xd9   :  { %v4488_v5 = vpop.f32.mrf.mxu0  ;;  %v4522_v16 = vpop.f32.mrf.mxu1 }
  0xda   :  { %v477_v13 = vmax.f32 %v4488_v5, %v4522_v16 }
  0xdb   :  { %v211_v17 = vpop.f32.mrf.mxu0  ;;  %v421_v18 = vpop.f32.mrf.mxu1 }
  0xdc   :  { %v476_v50 = vmax.f32 %v211_v17, %v421_v18 }
  0xdd   :  { %v5379_v19 = vpop.f32.mrf.mxu0  ;;  %v5381_v20 = vpop.f32.mrf.mxu1 }
  0xdf   :  { %v5383_v21 = vpop.f32.mrf.mxu0  ;;  %v5385_v22 = vpop.f32.mrf.mxu1 }
  0xe1   :  { %v5387_v23 = vpop.f32.mrf.mxu0  ;;  %v5389_v24 = vpop.f32.mrf.mxu1 }
  0xe3   :  { %v5393_v27 = vpop.f32.mrf.mxu0  ;;  %v5395_v28 = vpop.f32.mrf.mxu1 }
  0xe5   :  { %v5397_v29 = vpop.f32.mrf.mxu0  ;;  %v5399_v30 = vpop.f32.mrf.mxu1 }
  0xe7   :  { %v5401_v31 = vpop.f32.mrf.mxu0  ;;  %v5403_v32 = vpop.f32.mrf.mxu1 }
  0xe9   :  { %v5405_v33 = vpop.f32.mrf.mxu0  ;;  %v5407_v35 = vpop.f32.mrf.mxu1 }
  0xeb   :  { %v5409_v36 = vpop.f32.mrf.mxu0  ;;  %v5411_v37 = vpop.f32.mrf.mxu1 }
  0xed   :  { %v5413_v38 = vpop.f32.mrf.mxu0  ;;  %v5415_v39 = vpop.f32.mrf.mxu1 }
  0xef   :  { %v5417_v40 = vpop.f32.mrf.mxu0  ;;  %v5419_v42 = vpop.f32.mrf.mxu1 }
  0xf1   :  { %v5421_v55 = vpop.f32.mrf.mxu0  ;;  %v4587_v58 = vpop.f32.mrf.mxu1 }
  0xf3   :  { %v5423_v59 = vpop.f32.mrf.mxu0  ;;  %v863_v63 = vpop.f32.mrf.mxu1 }
  0xf5   :  { %v4553_v10 = vpop.f32.mrf.mxu0  ;;  %v4590_v34 = vpop.f32.mrf.mxu1 }
  0xf6   :  { %v701_v6 = vmax.f32 %v475_v26, %v4553_v10 }
  0xf7   :  { %v637_v0 = vpop.f32.mrf.mxu0  ;;  %v873_v62 = vpop.f32.mrf.mxu1 }
  0xf8   :  { %v700_v44 = vmax.f32 %v474_v43, %v637_v0  ;;  %v927_v51 = vmax.f32 %v701_v6, %v4587_v58  ;;  %v483_v58 = vmax.f32 %v5397_v29, %v5399_v30  ;;  %v484_v29 = vmax.f32 %v5409_v36, %v5411_v37 }
  0xf9   :  { %v4556_v46 = vpop.f32.mrf.mxu0  ;;  %v5425_v41 = vpop.f32.mrf.mxu1  ;;  %v472_v36 = vmax.f32 %v5374_v11, %v5376_v4 }
  0xfa   :  { %v926_v52 = vmax.f32 %v700_v44, %v863_v63  ;;  %v950_v0 = vadd.f32 %v5430_v49, %v927_v51  ;;  %v703_v6 = vmax.f32 %v477_v13, %v4556_v46  ;;  %v482_v13 = vmax.f32 %v5401_v31, %v5403_v32 }
  0xfb   :  { %v647_v47 = vpop.f32.mrf.mxu0  ;;  %v5432_v12 = vpop.f32.mrf.mxu1  ;;  %v471_v31 = vmax.f32 %v5353_v1, %v5355_v2  ;;  %v470_v32 = vmax.f32 %v5362_v7, %v5364_v3 }
  0xfc   :  { %v949_v10 = vadd.f32 %v5430_v49, %v926_v52  ;;  %v702_v14 = vmax.f32 %v476_v50, %v647_v47  ;;  %v6784_v52 = vmov 0.0   ;;  %v966_v50 = vmax.f32 %v950_v0, 0.0 }
  0xfd   :  { %v5435_v15 = vpop.f32.mrf.mxu0  ;;  %v5437_v43 = vpop.f32.mrf.mxu1  ;;  %v929_v16 = vmax.f32 %v703_v6, %v4590_v34  ;;  %v697_v37 = vmax.f32 %v471_v31, %v5413_v38  ;;  %v696_v1 = vmax.f32 %v470_v32, %v5417_v40 }
  0xfe   :  { %v965_v44 = vmax.f32 %v949_v10, 0.0  ;;  %v928_v17 = vmax.f32 %v702_v14, %v873_v62 }
  0xff   :  { %v5440_v18 = vpop.f32.mrf.mxu0  ;;  %v5442_v26 = vpop.f32.mrf.mxu1  ;;  %v952_v34 = vadd.f32 %v5430_v49, %v929_v16 }
 0x100   :  { %4232 = vmatmul.mubr.msk.f32.vlgmr.msra.gmra.mxu1 %vm1012_vm3, %v965_v44  ;;  %v951_v51 = vadd.f32 %v5430_v49, %v928_v17 }
 0x101   :  { %v5445_v5 = vpop.f32.mrf.mxu0  ;;  %1206 = vmatprep.mubr.f32.mxu1 %v6784_v52  ;;  %v4599_v47 = vpop.f32.mrf.mxu1  ;;  %1391 = vmatpush1.msra.mxu1 %v5241_v25  ;;  %v968_v30 = vmax.f32 %v952_v34, 0.0 }
 0x102   :  { %4608 = vmatprep.subr.mxu1 %v6784_v52  ;;  %v967_v10 = vmax.f32 %v951_v51, 0.0 }
 0x103   :  { %v5451_v46 = vpop.f32.mrf.mxu0  ;;  %v903_v62 = vpop.f32.mrf.mxu1 }
 0x104   :  { %4233 = vmatmul.mubr.msk.f32.gmra.mxu1 %vm1012_vm3, %v966_v50 }
 0x105   :  { %v4565_v63 = vpop.f32.mrf.mxu0  ;;  %1212 = vmatprep.mubr.f32.mxu1 %v6784_v52  ;;  %v4602_v44 = vpop.f32.mrf.mxu1 }
 0x106   :  { %v709_v14 = vmax.f32 %v483_v58, %v4565_v63  ;;  %v485_v58 = vmax.f32 %v5405_v33, %v5407_v35 }
 0x107   :  { %v677_v0 = vpop.f32.mrf.mxu0  ;;  %v913_v51 = vpop.f32.mrf.mxu1 }
 0x108   :  { %v708_v6 = vmax.f32 %v482_v13, %v677_v0  ;;  %4234 = vmatmul.mubr.msk.f32.gmra.mxu1 %vm1012_vm3, %v967_v10  ;;  %v935_v50 = vmax.f32 %v709_v14, %v4599_v47  ;;  %v6785_v10 = vmax.f32 %v5366_v8, %v5368_v9 }
 0x109   :  { %v4568_v17 = vpop.f32.mrf.mxu0  ;;  %1218 = vmatprep.mubr.f32.mxu1 %v6784_v52 }
 0x10a   :  { %v934_v45 = vmax.f32 %v708_v6, %v903_v62  ;;  %v958_v7 = vadd.f32 %v5430_v49, %v935_v50  ;;  %v711_v3 = vmax.f32 %v485_v58, %v4568_v17  ;;  %v699_v14 = vmax.f32 %v6785_v10, %v5421_v55 }
 0x10b   :  { %v687_v16 = vpop.f32.mrf.mxu0  ;;  %v480_v50 = vmax.f32 %v5393_v27, %v5395_v28  ;;  %v6786_v27 = vmax.f32 %v5387_v23, %v5389_v24 }
 0x10c   :  { %v957_v63 = vadd.f32 %v5430_v49, %v934_v45  ;;  %v710_v13 = vmax.f32 %v484_v29, %v687_v16  ;;  %4235 = vmatmul.mubr.msk.f32.gmra.mxu1 %vm1012_vm3, %v968_v30  ;;  %v698_v45 = vmax.f32 %v472_v36, %v5423_v59  ;;  %v974_v11 = vmax.f32 %v958_v7, 0.0 }
 0x10d   :  { %v4581_v2 = vpop.f32.mrf.mxu0  ;;  %1424 = vmatprep.mubr.f32.mxu1 %v6784_v52  ;;  %v937_v4 = vmax.f32 %v711_v3, %v4602_v44  ;;  %v478_v44 = vmax.f32 %v5383_v21, %v5385_v22  ;;  %v925_v8 = vmax.f32 %v699_v14, %v5415_v39  ;;  %v479_v21 = vmax.f32 %v5379_v19, %v5381_v20 }
 0x10e   :  { %v973_v47 = vmax.f32 %v957_v63, 0.0  ;;  %v936_v33 = vmax.f32 %v710_v13, %v913_v51  ;;  %v923_v62 = vmax.f32 %v697_v37, %v4581_v2  ;;  %v924_v0 = vmax.f32 %v698_v45, %v5419_v42 }
 0x10f   :  { %v843_v35 = vpop.f32.mrf.mxu0  ;;  %v960_v17 = vadd.f32 %v5430_v49, %v937_v4  ;;  %v704_v42 = vmax.f32 %v478_v44, %v5440_v18  ;;  %v705_v18 = vmax.f32 %v479_v21, %v5435_v15  ;;  %v706_v32 = vmax.f32 %v480_v50, %v5451_v46 }
 0x110   :  { %v922_v34 = vmax.f32 %v696_v1, %v843_v35  ;;  %4240 = vmatmul.mubr.msk.f32.vlgmr.msra.gmra.mxu1 %vm1012_vm3, %v973_v47  ;;  %v959_v38 = vadd.f32 %v5430_v49, %v936_v33  ;;  %v946_v59 = vadd.f32 %v5430_v49, %v923_v62  ;;  %v947_v9 = vadd.f32 %v5430_v49, %v924_v0 }
 0x111   :  { %1430 = vmatprep.mubr.f32.mxu1 %v6784_v52  ;;  %v976_v22 = vmax.f32 %v960_v17, 0.0  ;;  %v930_v30 = vmax.f32 %v704_v42, %v5432_v12  ;;  %v931_v20 = vmax.f32 %v705_v18, %v5425_v41  ;;  %v707_v28 = vmax.f32 %v6786_v27, %v5445_v5 }
 0x112   :  { %v945_v40 = vadd.f32 %v5430_v49, %v922_v34  ;;  %v975_v29 = vmax.f32 %v959_v38, 0.0  ;;  %v962_v55 = vmax.f32 %v946_v59, 0.0  ;;  %v963_v39 = vmax.f32 %v947_v9, 0.0 }
 0x113   :  { %v953_v31 = vadd.f32 %v5430_v49, %v930_v30  ;;  %v954_v12 = vadd.f32 %v5430_v49, %v931_v20  ;;  %v932_v16 = vmax.f32 %v706_v32, %v5442_v26  ;;  %v933_v46 = vmax.f32 %v707_v28, %v5437_v43  ;;  %v5536_v26 = vpop.permute.xlu0 %1894 }
 0x114   :  { %v961_v6 = vmax.f32 %v945_v40, 0.0  ;;  %4241 = vmatmul.mubr.msk.f32.gmra.mxu1 %vm1012_vm3, %v974_v11  ;;  %v2285_v45 = vrot.slane %v5332_v53, 2  ;;  %v2286_v62 = vrot.slane %v5336_v54, 2  ;;  %v6791_v54 = vld [vmem:[#allocation7_spill] sm:$0xff] }
 0x115   :  { %1436 = vmatprep.mubr.f32.mxu1 %v6784_v52  ;;  %v969_v15 = vmax.f32 %v953_v31, 0.0  ;;  %v970_v41 = vmax.f32 %v954_v12, 0.0  ;;  %v955_v51 = vadd.f32 %v5430_v49, %v932_v16  ;;  %v956_v58 = vadd.f32 %v5430_v49, %v933_v46 }
 0x116   :  { %4228 = vmatmul.mubr.msk.f32.vlgmr.msra.gmra.mxu0 %vm1012_vm3, %v961_v6  ;;  %v2287_v0 = vsel %vm1483_vm4, %v2285_v45, %v2286_v62 }
 0x117   :  { %1095 = vmatprep.mubr.f32.mxu0 %v6784_v52  ;;  %1279 = vmatpush1.msra.mxu0 %v5241_v25  ;;  %v948_v25 = vadd.f32 %v5430_v49, %v925_v8  ;;  %v971_v23 = vmax.f32 %v955_v51, 0.0  ;;  %v972_v24 = vmax.f32 %v956_v58, 0.0  ;;  %v5538_v5 = vpop.permute.xlu0 %2000  ;;  %v1633_v49 = vrot.slane %v5311_v48, 2 }
 0x118   :  { %4242 = vmatmul.mubr.msk.f32.gmra.mxu1 %vm1012_vm3, %v975_v29  ;;  %4603 = vmatprep.subr.mxu0 %v6784_v52  ;;  %v5610_v8 = vrot.slane %v5343_v60, 2 }
 0x119   :  { %1442 = vmatprep.mubr.f32.mxu1 %v6784_v52  ;;  %v964_v19 = vmax.f32 %v948_v25, 0.0  ;;  %v5553_v1 = vsel %vm1483_vm4, %v5340_v57, %v1633_v49 }
 0x11a   :  { %4229 = vmatmul.mubr.msk.f32.gmra.mxu0 %vm1012_vm3, %v962_v55 }
 0x11b   :  { %1101 = vmatprep.mubr.f32.mxu0 %v6784_v52  ;;  %v5540_v43 = vpop.permute.xlu0 %1626 }
 0x11c   :  { %4243 = vmatmul.mubr.msk.f32.gmra.mxu1 %vm1012_vm3, %v976_v22  ;;  %v1635_v34 = vrot.slane %v5540_v43, 2 }
 0x11e   :  { %4230 = vmatmul.mubr.msk.f32.gmra.mxu0 %vm1012_vm3, %v963_v39  ;;  %v5595_v59 = vsel %vm1483_vm4, %v1633_v49, %v1635_v34  ;;  %v1638_v25 = vsel %vm1483_vm4, %v1635_v34, %v5610_v8 }
 0x11f   :  { %1107 = vmatprep.mubr.f32.mxu0 %v6784_v52  ;;  %v5542_v63 = vpop.permute.xlu0 %2335 }
 0x120   :  { %6787 = vst [vmem:[#allocation19_spill] sm:$0xff] %v5542_v63 }
 0x122   :  { %4231 = vmatmul.mubr.msk.f32.gmra.mxu0 %vm1012_vm3, %v964_v19 }
 0x123   :  { %1312 = vmatprep.mubr.f32.mxu0 %v6784_v52  ;;  %v5544_v13 = vpop.permute.xlu0 %1532 }
 0x126   :  { %4236 = vmatmul.mubr.msk.f32.vlgmr.msra.gmra.mxu0 %vm1012_vm3, %v969_v15 }
 0x127   :  { %1318 = vmatprep.mubr.f32.mxu0 %v6784_v52  ;;  %v5547_v37 = vpop.permute.xlu0 %2279 }
 0x128   :  { %v2288_v11 = vrot.slane %v5547_v37, 2 }
 0x12a   :  { %4237 = vmatmul.mubr.msk.f32.gmra.mxu0 %vm1012_vm3, %v970_v41  ;;  %v2289_v49 = vsel %vm1483_vm4, %v2286_v62, %v2288_v11  ;;  %v5698_v62 = vrot.slane %v5538_v5, 6  ;;  %v6794_v5 = vld [vmem:[#allocation10_spill] sm:$0xff] }
 0x12b   :  { %1324 = vmatprep.mubr.f32.mxu0 %v6784_v52  ;;  %v5563_v47 = vpop.permute.xlu0 %2283 }
 0x12c   :  { %v6748_v33 = vrot.slane %v5563_v47, 2  ;;  %6793 = vst [vmem:[#allocation7_spill] sm:$0xff] %v5698_v62 }
 0x12e   :  { %4238 = vmatmul.mubr.msk.f32.gmra.mxu0 %vm1012_vm3, %v971_v23  ;;  %v2291_v53 = vsel %vm1483_vm4, %v2288_v11, %v6748_v33 }
 0x12f   :  { %1330 = vmatprep.mubr.f32.mxu0 %v6784_v52 }
 0x132   :  { %4239 = vmatmul.mubr.msk.f32.gmra.mxu0 %vm1012_vm3, %v972_v24 }
 0x1c0   :  { %v1202_v36 = vpop.f32.mrf.mxu1 }
 0x1c1   :  { %1226 = vst [vmem:[#allocation2 + $0xa0] sm:$0xff] %v1202_v36  ;;  %1960 = vrot.lane.b32.xlu1 %v1202_v36, %s4771_s3  ;;  %2436 = vrot.lane.b32.xlu0 %v1202_v36, %s4767_s15  ;;  %v1714_v2 = vrot.slane %v1202_v36, 2  ;;  %v5556_v7 = vmul.f32 %v5553_v1, %v1202_v36 }
 0x1c2   :  { %v1204_v52 = vpop.f32.mrf.mxu1 }
 0x1c4   :  { %v5558_v48 = vpop.f32.mrf.mxu1 }
 0x1c5   :  { %2172 = vrot.lane.b32.xlu1 %v1714_v2, %s4768_s6  ;;  %1656 = vrot.lane.b32.xlu0 %v5556_v7, %s4770_s2  ;;  %v2298_v6 = vmul.f32 %v2287_v0, %v5558_v48  ;;  %v5601_v44 = vmul.f32 %v5595_v59, %v5558_v48  ;;  %v1715_v29 = vrot.slane %v5558_v48, 2  ;;  %v2557_v42 = vmul.f32 %v5542_v63, %v5558_v48 }
 0x1c6   :  { %v1210_v3 = vpop.f32.mrf.mxu1 }
 0x1c7   :  { %1229 = vst.msk [vmem:[#allocation2 + $0xb8] sm:$0xff] %vm978_vm2, %v1210_v3  ;;  %v1716_v21 = vsel %vm1483_vm4, %v1714_v2, %v1715_v29  ;;  %v6792_v3 = vld [vmem:[#allocation9_spill] sm:$0xff] }
 0x1c8   :  { %v5567_v57 = vpop.f32.mrf.mxu1  ;;  %v2259_v35 = vld [vmem:[#allocation2 + $0xa0] sm:$0xc0] }
 0x1c9   :  { %1721 = vrot.lane.b32.xlu1 %v1714_v2, %s4772_s19  ;;  %2438 = vrot.lane.b32.xlu0 %v5558_v48, %s4767_s15  ;;  %v2297_v38 = vmul.f32 %v2285_v45, %v2259_v35  ;;  %v5628_v39 = vmul.f32 %v1638_v25, %v5567_v57  ;;  %v1717_v50 = vrot.slane %v5567_v57, 2  ;;  %v2558_v58 = vmul.f32 %v5338_v56, %v5567_v57 }
 0x1ca   :  { %v1216_v4 = vpop.f32.mrf.mxu1  ;;  %v2299_v36 = vmul.f32 %v2289_v49, %v5567_v57  ;;  %v2005_v35 = vrot.slane %v6792_v3, 6  ;;  %v5784_v3 = vpop.permute.xlu1 %1473 }
 0x1cb   :  { %1231 = vst.msk [vmem:[#allocation2 + $0xc8] sm:$0xff] %vm978_vm2, %v1216_v4  ;;  %6788 = vst [vmem:[#allocation20_spill] sm:$0xff] %v5628_v39  ;;  %v1718_v27 = vsel %vm1483_vm4, %v1715_v29, %v1717_v50 }
 0x1cc   :  { %v5582_v40 = vpop.f32.mrf.mxu1 }
 0x1cd   :  { %1232 = vst [vmem:[#allocation2 + $0xd0] sm:$0xff] %v5582_v40  ;;  %2307 = vrot.lane.b32.xlu1 %v2297_v38, %s4769_s16  ;;  %1962 = vrot.lane.b32.xlu0 %v5558_v48, %s4771_s3  ;;  %v5589_v10 = vmul.f32 %v2291_v53, %v5582_v40  ;;  %v2559_v16 = vmul.f32 %v5346_v61, %v5582_v40  ;;  %v5682_v52 = vrot.slane %v5582_v40, 2  ;;  %v2003_v48 = vrot.slane %v6791_v54, 6 }
 0x1ce   :  { %v1222_v14 = vpop.f32.mrf.mxu1  ;;  %v5715_v53 = vrot.slane %v6794_v5, 6 }
 0x1cf   :  { %1233 = vst.msk [vmem:[#allocation2 + $0xd8] sm:$0xff] %vm978_vm2, %v1222_v14  ;;  %v5703_v11 = vsel %vm1896_vm5, %v2003_v48, %v2005_v35  ;;  %v5719_v14 = vsel %vm1896_vm5, %v2005_v35, %v5698_v62  ;;  %v6802_v35 = vld [vmem:[#allocation11_spill] sm:$0xff] }
 0x1d0   :  { %v5603_v17 = vpop.f32.mrf.mxu1  ;;  %6795 = vst [vmem:[#allocation9_spill] sm:$0xff] %v5715_v53 }
 0x1d1   :  { %2309 = vrot.lane.b32.xlu0 %v2298_v6, %s4769_s16  ;;  %1658 = vrot.lane.b32.xlu1 %v5601_v44, %s4770_s2  ;;  %v6796_v6 = vld [vmem:[#allocation13_spill] sm:$0xff] }
 0x1d2   :  { %v1428_v9 = vpop.f32.mrf.mxu1  ;;  %v1572_v29 = vmul.f32 %v6796_v6, %v5603_v17 }
 0x1d3   :  { %1451 = vst.msk [vmem:[#allocation2 + $0x1a8] sm:$0xff] %vm978_vm2, %v1428_v9 }
 0x1d4   :  { %v5615_v55 = vpop.f32.mrf.mxu1  ;;  %v1610_v46 = vld [vmem:[#allocation2 + $0xd0] sm:$0x3f]  ;;  %v1580_v49 = vrot.slane %v1572_v29, 2 }
 0x1d5   :  { %1452 = vst [vmem:[#allocation2 + $0x1b0] sm:$0xff] %v5615_v55  ;;  %2565 = vrot.lane.b32.xlu0 %v2557_v42, %s4773_s20  ;;  %2174 = vrot.lane.b32.xlu1 %v1716_v21, %s4768_s6  ;;  %v5666_v23 = vmul.f32 %v5610_v8, %v1610_v46  ;;  %v2233_v5 = vrot.slane %v5615_v55, 2 }
 0x1d6   :  { %v5621_v22 = vpop.f32.mrf.mxu0  ;;  %v1434_v60 = vpop.f32.mrf.mxu1 }
 0x1d7   :  { %1114 = vst [vmem:[#allocation2 + $0x20] sm:$0xff] %v5621_v22  ;;  %1453 = vst.msk [vmem:[#allocation2 + $0x1b8] sm:$0xff] %vm978_vm2, %v1434_v60 }
 0x1d8   :  { %v1093_v18 = vpop.f32.mrf.mxu0  ;;  %v5630_v30 = vpop.f32.mrf.mxu1  ;;  %6790 = vst [vmem:[#allocation22_spill] sm:$0xff] %v5666_v23 }
 0x1d9   :  { %1454 = vst [vmem:[#allocation2 + $0x1c0] sm:$0xff] %v5630_v30  ;;  %1723 = vrot.lane.b32.xlu0 %v1716_v21, %s4772_s19  ;;  %1660 = vrot.lane.b32.xlu1 %v5628_v39, %s4770_s2  ;;  %v5638_v19 = vmul.f32 %v1638_v25, %v5630_v30  ;;  %v5738_v18 = vsel %vm1896_vm5, %v5715_v53, %v2003_v48 }
 0x1da   :  { %v5640_v20 = vpop.f32.mrf.mxu0  ;;  %v1440_v31 = vpop.f32.mrf.mxu1  ;;  %v1748_v48 = vmul.f32 %v5595_v59, %v5615_v55 }
 0x1db   :  { %6789 = vst [vmem:[#allocation21_spill] sm:$0xff] %v5640_v20  ;;  %1455 = vst.msk [vmem:[#allocation2 + $0x1c8] sm:$0xff] %vm978_vm2, %v1440_v31  ;;  %v5799_v59 = vpop.permute.xlu0 %1469  ;;  %v1683_v33 = vrot.slane %v5640_v20, 2 }
 0x1dc   :  { %v1099_v32 = vpop.f32.mrf.mxu0  ;;  %v5643_v12 = vpop.f32.mrf.mxu1 }
 0x1dd   :  { %1117 = vst.msk [vmem:[#allocation2 + $0x38] sm:$0xff] %vm978_vm2, %v1099_v32  ;;  %1456 = vst [vmem:[#allocation2 + $0x1d0] sm:$0xff] %v5643_v12  ;;  %2440 = vrot.lane.b32.xlu0 %v5567_v57, %s4767_s15  ;;  %2176 = vrot.lane.b32.xlu1 %v1718_v27, %s4768_s6 }
 0x1de   :  { %v5651_v28 = vpop.f32.mrf.mxu0  ;;  %v1446_v15 = vpop.f32.mrf.mxu1 }
 0x1df   :  { %1118 = vst [vmem:[#allocation2 + $0x40] sm:$0xff] %v5651_v28  ;;  %1457 = vst.msk [vmem:[#allocation2 + $0x1d8] sm:$0xff] %vm978_vm2, %v1446_v15 }
 0x1e0   :  { %v1105_v41 = vpop.f32.mrf.mxu0 }
 0x1e1   :  { %1119 = vst.msk [vmem:[#allocation2 + $0x48] sm:$0xff] %vm978_vm2, %v1105_v41  ;;  %1964 = vrot.lane.b32.xlu0 %v5567_v57, %s4771_s3  ;;  %2569 = vrot.lane.b32.xlu1 %v2559_v16, %s4773_s20  ;;  %v1720_v57 = vsel %vm1483_vm4, %v1717_v50, %v5682_v52  ;;  %v1747_v50 = vmul.f32 %v5553_v1, %v5603_v17 }
 0x1e2   :  { %v5661_v51 = vpop.f32.mrf.mxu0 }
 0x1e4   :  { %v1111_v24 = vpop.f32.mrf.mxu0 }
 0x1e5   :  { %1121 = vst.msk [vmem:[#allocation2 + $0x58] sm:$0xff] %vm978_vm2, %v1111_v24  ;;  %2567 = vrot.lane.b32.xlu0 %v2558_v58, %s4773_s20  ;;  %1662 = vrot.lane.b32.xlu1 %v5666_v23, %s4770_s2  ;;  %v2232_v58 = vrot.slane %v5603_v17, 2 }
 0x1e6   :  { %v5672_v43 = vpop.f32.mrf.mxu0 }
 0x1e7   :  { %1338 = vst [vmem:[#allocation2 + $0x120] sm:$0xff] %v5672_v43 }
 0x1e8   :  { %v1316_v2 = vpop.f32.mrf.mxu0 }
 0x1e9   :  { %1339 = vst.msk [vmem:[#allocation2 + $0x128] sm:$0xff] %vm978_vm2, %v1316_v2  ;;  %2311 = vrot.lane.b32.xlu0 %v2299_v36, %s4769_s16  ;;  %2180 = vrot.lane.b32.xlu1 %v5682_v52, %s4768_s6  ;;  %v6801_v2 = vld [vmem:[#allocation12_spill] sm:$0xff] }
 0x1ea   :  { %v5688_v37 = vpop.f32.mrf.mxu0  ;;  %v1581_v54 = vsel %vm1483_vm4, %v6801_v2, %v1580_v49 }
 0x1ec   :  { %v1322_v45 = vpop.f32.mrf.mxu0 }
 0x1ed   :  { %1341 = vst.msk [vmem:[#allocation2 + $0x138] sm:$0xff] %vm978_vm2, %v1322_v45  ;;  %1725 = vrot.lane.b32.xlu0 %v1718_v27, %s4772_s19  ;;  %2178 = vrot.lane.b32.xlu1 %v1720_v57, %s4768_s6  ;;  %v5791_v45 = vmul.f32 %v6802_v35, %v5615_v55 }
 0x1ee   :  { %v5700_v34 = vpop.f32.mrf.mxu0 }
 0x1ef   :  { %v5712_v38 = vmul.f32 %v5703_v11, %v5700_v34 }
 0x1f0   :  { %v1328_v4 = vpop.f32.mrf.mxu0 }
 0x1f1   :  { %1343 = vst.msk [vmem:[#allocation2 + $0x148] sm:$0xff] %vm978_vm2, %v1328_v4  ;;  %2442 = vrot.lane.b32.xlu0 %v5582_v40, %s4767_s15  ;;  %2484 = vrot.lane.b32.xlu1 %v5603_v17, %s4771_s3  ;;  %v6750_v60 = vrot.slane %v5712_v38, 2  ;;  %v5797_v4 = vpop.permute.xlu1 %2593 }
 0x1f2   :  { %v5721_v0 = vpop.f32.mrf.mxu0 }
 0x1f3   :  { %1344 = vst [vmem:[#allocation2 + $0x150] sm:$0xff] %v5721_v0  ;;  %v5728_v9 = vmul.f32 %v5719_v14, %v5721_v0 }
 0x1f4   :  { %v1334_v42 = vpop.f32.mrf.mxu0  ;;  %v2087_v21 = vld [vmem:[#allocation2 + $0x138] sm:$0xff] }
 0x1f5   :  { %1345 = vst.msk [vmem:[#allocation2 + $0x158] sm:$0xff] %vm978_vm2, %v1334_v42  ;;  %1966 = vrot.lane.b32.xlu0 %v5582_v40, %s4771_s3  ;;  %1859 = vrot.lane.b32.xlu1 %v1572_v29, %s4767_s15  ;;  %v6749_v25 = vrot.slane %v5728_v9, 2  ;;  %v5743_v31 = vmul.f32 %v2087_v21, %v5738_v18  ;;  %v2234_v29 = vsel %vm1483_vm4, %v2232_v58, %v2233_v5  ;;  %v5805_v42 = vpop.permute.xlu1 %2601  ;;  %v5807_v21 = vpop.permute.xlu0 %1477 }
 0x1f7   :  { %6797 = vst [vmem:[#allocation10_spill] sm:$0xff] %v5743_v31  ;;  %v5750_v40 = vsel %vm1483_vm4, %v6750_v60, %v6749_v25  ;;  %v6747_v15 = vrot.slane %v5743_v31, 2 }
 0x1f8   :  { %v2088_v32 = vld [vmem:[#allocation2 + $0x148] sm:$0xff] }
 0x1f9   :  { %1727 = vrot.lane.b32.xlu0 %v1720_v57, %s4772_s19  ;;  %2194 = vrot.lane.b32.xlu1 %v1747_v50, %s4770_s2  ;;  %v2093_v27 = vmul.f32 %v2088_v32, %v5703_v11  ;;  %v1682_v57 = vrot.slane %v5621_v22, 2  ;;  %v5819_v32 = vpop.permute.xlu0 %2597 }
 0x1fb   :  { %v2104_v1 = vrot.slane %v2093_v27, 2  ;;  %v1574_v27 = vmul.f32 %v5544_v13, %v5630_v30  ;;  %v1684_v25 = vsel %vm1483_vm4, %v1682_v57, %v1683_v33 }
 0x1fc   :  { %v2089_v16 = vld [vmem:[#allocation2 + $0x158] sm:$0xff] }
 0x1fd   :  { %2070 = vrot.lane.b32.xlu0 %v5603_v17, %s4773_s20  ;;  %1758 = vrot.lane.b32.xlu1 %v1747_v50, %s4769_s16  ;;  %v5762_v41 = vsel %vm1483_vm4, %v6747_v15, %v2104_v1  ;;  %v5765_v46 = vmul.f32 %v2089_v16, %v5719_v14  ;;  %v1582_v50 = vrot.slane %v5791_v45, 2  ;;  %v2353_v16 = vmul.f32 %v5542_v63, %v5640_v20 }
 0x1fe   :  { %6798 = vst [vmem:[#allocation13_spill] sm:$0xff] %v5762_v41  ;;  %v1584_v15 = vrot.slane %v1574_v27, 2 }
 0x1ff   :  { %6799 = vst [vmem:[#allocation23_spill] sm:$0xff] %v5765_v46  ;;  %v6746_v24 = vrot.slane %v5765_v46, 2 }
 0x201   :  { %2239 = vrot.lane.b32.xlu0 %v2232_v58, %s4772_s19  ;;  %2072 = vrot.lane.b32.xlu1 %v5615_v55, %s4773_s20  ;;  %v5775_v36 = vsel %vm1483_vm4, %v2104_v1, %v6746_v24  ;;  %v1583_v1 = vsel %vm1483_vm4, %v1580_v49, %v1582_v50  ;;  %v2361_v24 = vrot.slane %v2353_v16, 2 }
 0x202   :  { %6800 = vst [vmem:[#allocation24_spill] sm:$0xff] %v5775_v36  ;;  %v1585_v36 = vsel %vm1483_vm4, %v1582_v50, %v1584_v15 }
 0x205   :  { %1588 = vrot.lane.b32.xlu1 %v1581_v54, %s4768_s6  ;;  %2486 = vrot.lane.b32.xlu0 %v5615_v55, %s4771_s3  ;;  %v5817_v55 = vpop.permute.xlu1 %1481  ;;  %v5830_v54 = vpop.permute.xlu0 %1857 }
 0x206   :  { %6803 = vst [vmem:[#allocation12_spill] sm:$0xff] %v5817_v55  ;;  %6804 = vst [vmem:[#allocation11_spill] sm:$0xff] %v5830_v54 }
 0x209   :  { %1760 = vrot.lane.b32.xlu1 %v1748_v48, %s4769_s16  ;;  %1944 = vrot.lane.b32.xlu0 %v5621_v22, %s4770_s2  ;;  %v5828_v58 = vpop.permute.xlu1 %2605  ;;  %v5838_v49 = vpop.permute.xlu0 %2546 }
 0x20a   :  { %6805 = vst [vmem:[#allocation25_spill] sm:$0xff] %v5838_v49 }
 0x20d   :  { %1861 = vrot.lane.b32.xlu0 %v5791_v45, %s4767_s15  ;;  %2152 = vrot.lane.b32.xlu1 %v1682_v57, %s4767_s15  ;;  %v5836_v45 = vpop.permute.xlu1 %1550 }
 0x211   :  { %2196 = vrot.lane.b32.xlu0 %v1748_v48, %s4770_s2  ;;  %1689 = vrot.lane.b32.xlu1 %v1682_v57, %s4771_s3  ;;  %v2235_v48 = vrot.slane %v5630_v30, 2  ;;  %v2016_v57 = vmul.f32 %v5703_v11, %v5651_v28 }
 0x213   :  { %v2027_v39 = vrot.slane %v2016_v57, 2 }
 0x215   :  { %2241 = vrot.lane.b32.xlu0 %v2234_v29, %s4772_s19  ;;  %2074 = vrot.lane.b32.xlu1 %v5630_v30, %s4773_s20  ;;  %v2236_v29 = vsel %vm1483_vm4, %v2233_v5, %v2235_v48 }
 0x219   :  { %1946 = vrot.lane.b32.xlu1 %v5640_v20, %s4770_s2  ;;  %2488 = vrot.lane.b32.xlu0 %v5630_v30, %s4771_s3  ;;  %v5850_v30 = vpop.permute.xlu0 %1654 }
 0x21d   :  { %1590 = vrot.lane.b32.xlu0 %v1583_v1, %s4768_s6  ;;  %1863 = vrot.lane.b32.xlu1 %v1574_v27, %s4767_s15  ;;  %v5848_v1 = vpop.permute.xlu1 %1586  ;;  %v6755_v27 = vrot.slane %v5651_v28, 2 }
 0x21f   :  { %v1686_v46 = vsel %vm1483_vm4, %v1683_v33, %v6755_v27 }
 0x221   :  { %2540 = vrot.lane.b32.xlu0 %v2353_v16, %s4769_s16  ;;  %2198 = vrot.lane.b32.xlu1 %v5638_v19, %s4770_s2  ;;  %v5856_v5 = vpop.permute.xlu1 %1756 }
 0x222   :  { %6806 = vst [vmem:[#allocation26_spill] sm:$0xff] %v5856_v5  ;;  %v5942_v5 = vmul.f32 %v5346_v61, %v5661_v51  ;;  %v1785_v61 = vrot.slane %v5688_v37, 2 }
 0x225   :  { %1762 = vrot.lane.b32.xlu1 %v5638_v19, %s4769_s16  ;;  %2490 = vrot.lane.b32.xlu0 %v5643_v12, %s4771_s3  ;;  %v6753_v19 = vrot.slane %v5643_v12, 2 }
 0x227   :  { %v2238_v60 = vsel %vm1483_vm4, %v2235_v48, %v6753_v19  ;;  %v1976_v48 = vld [vmem:[#allocation2 + $0x20] sm:$0xfc]  ;;  %v2015_v19 = vmul.f32 %v5738_v18, %v5640_v20 }
 0x228   :  { %v2014_v33 = vmul.f32 %v5715_v53, %v1976_v48 }
 0x229   :  { %2243 = vrot.lane.b32.xlu1 %v2236_v29, %s4772_s19  ;;  %2076 = vrot.lane.b32.xlu0 %v5643_v12, %s4773_s20  ;;  %v5858_v29 = vpop.permute.xlu0 %2192  ;;  %v2025_v11 = vrot.slane %v2015_v19, 2 }
 0x22a   :  { %6807 = vst [vmem:[#allocation27_spill] sm:$0xff] %v5858_v29 }
 0x22b   :  { %v2028_v31 = vsel %vm1483_vm4, %v2025_v11, %v2027_v39 }
 0x22d   :  { %2368 = vrot.lane.b32.xlu1 %v2361_v24, %s4773_s20  ;;  %1594 = vrot.lane.b32.xlu0 %v1584_v15, %s4768_s6 }
 0x231   :  { %2154 = vrot.lane.b32.xlu0 %v1684_v25, %s4767_s15  ;;  %2245 = vrot.lane.b32.xlu1 %v2238_v60, %s4772_s19 }
 0x233   :  { %v5867_v16 = vpop.permute.xlu1 %1960  ;;  %v5869_v23 = vpop.permute.xlu0 %2436 }
 0x234   :  { %6808 = vst [vmem:[#allocation28_spill] sm:$0xff] %v5867_v16  ;;  %v2024_v16 = vrot.slane %v2014_v33, 2  ;;  %v2017_v33 = vmul.f32 %v5719_v14, %v5661_v51 }
 0x235   :  { %1691 = vrot.lane.b32.xlu0 %v1684_v25, %s4771_s3  ;;  %2156 = vrot.lane.b32.xlu1 %v1686_v46, %s4767_s15 }
 0x237   :  { %v5880_v60 = vpop.permute.xlu1 %2172  ;;  %v5882_v49 = vpop.permute.xlu0 %1656 }
 0x238   :  { %6809 = vst [vmem:[#allocation29_spill] sm:$0xff] %v5882_v49  ;;  %v5895_v49 = vmul.f32 %v5338_v56, %v5651_v28 }
 0x239   :  { %1592 = vrot.lane.b32.xlu0 %v1585_v36, %s4768_s6  ;;  %1693 = vrot.lane.b32.xlu1 %v1686_v46, %s4771_s3  ;;  %v2026_v36 = vsel %vm1483_vm4, %v2024_v16, %v2025_v11 }
 0x23a   :  { %v6757_v50 = vrot.slane %v5895_v49, 2 }
 0x23b   :  { %v5888_v25 = vpop.permute.xlu1 %1721  ;;  %v5890_v27 = vpop.permute.xlu0 %2438 }
 0x23c   :  { %6810 = vst [vmem:[#allocation30_spill] sm:$0xff] %v5888_v25  ;;  %6811 = vst [vmem:[#allocation31_spill] sm:$0xff] %v5890_v27  ;;  %v2363_v48 = vsel %vm1483_vm4, %v2361_v24, %v6757_v50  ;;  %v6823_v25 = vld [vmem:[#allocation8_spill] sm:$0xff] }
 0x23d   :  { %1948 = vrot.lane.b32.xlu0 %v5651_v28, %s4770_s2  ;;  %2454 = vrot.lane.b32.xlu1 %v2028_v31, %s4768_s6 }
 0x23f   :  { %v5900_v15 = vpop.permute.xlu1 %2307  ;;  %v5902_v46 = vpop.permute.xlu0 %1962 }
 0x240   :  { %6812 = vst [vmem:[#allocation32_spill] sm:$0xff] %v5900_v15  ;;  %v2029_v15 = vrot.slane %v2017_v33, 2 }
 0x241   :  { %2452 = vrot.lane.b32.xlu0 %v2026_v36, %s4768_s6  ;;  %2035 = vrot.lane.b32.xlu1 %v2028_v31, %s4772_s19  ;;  %v1980_v31 = vld [vmem:[#allocation2 + $0x60] sm:$0x3] }
 0x242   :  { %v2018_v24 = vmul.f32 %v5698_v62, %v1980_v31 }
 0x243   :  { %v5908_v19 = vpop.permute.xlu0 %2309  ;;  %v5910_v57 = vpop.permute.xlu1 %1658 }
 0x245   :  { %2033 = vrot.lane.b32.xlu0 %v2026_v36, %s4772_s19  ;;  %2370 = vrot.lane.b32.xlu1 %v2363_v48, %s4773_s20  ;;  %v2030_v36 = vsel %vm1483_vm4, %v2027_v39, %v2029_v15  ;;  %v2031_v48 = vrot.slane %v2018_v24, 2  ;;  %v5949_v39 = vrot.slane %v5661_v51, 2 }
 0x247   :  { %v5919_v16 = vpop.permute.xlu0 %2565  ;;  %v5921_v11 = vpop.permute.xlu1 %2174  ;;  %v2032_v31 = vsel %vm1483_vm4, %v2029_v15, %v2031_v48  ;;  %v6821_v48 = vrot.slane %v5651_v28, 2 }
 0x248   :  { %6813 = vst [vmem:[#allocation33_spill] sm:$0xff] %v5919_v16 }
 0x249   :  { %2542 = vrot.lane.b32.xlu0 %v5895_v49, %s4769_s16  ;;  %2468 = vrot.lane.b32.xlu1 %v5672_v43, %s4770_s2 }
 0x24b   :  { %v5928_v50 = vpop.permute.xlu0 %1723  ;;  %v5930_v14 = vpop.permute.xlu1 %1660 }
 0x24c   :  { %6814 = vst [vmem:[#allocation34_spill] sm:$0xff] %v5928_v50  ;;  %6815 = vst [vmem:[#allocation35_spill] sm:$0xff] %v5930_v14  ;;  %v1688_v50 = vsel %vm1483_vm4, %v6821_v48, %v5949_v39  ;;  %v6826_v48 = vld [vmem:[#allocation6_spill] sm:$0xff] }
 0x24d   :  { %1950 = vrot.lane.b32.xlu0 %v5661_v51, %s4770_s2  ;;  %2456 = vrot.lane.b32.xlu1 %v2030_v36, %s4768_s6  ;;  %v1897_v27 = vrot.slane %v6826_v48, 6 }
 0x24f   :  { %v5936_v33 = vpop.permute.xlu0 %2440  ;;  %v5938_v16 = vpop.permute.xlu1 %2176 }
 0x250   :  { %6816 = vst [vmem:[#allocation36_spill] sm:$0xff] %v5936_v33 }
 0x251   :  { %2544 = vrot.lane.b32.xlu0 %v5942_v5, %s4769_s16  ;;  %2458 = vrot.lane.b32.xlu1 %v2032_v31, %s4768_s6 }
 0x253   :  { %v5951_v14 = vpop.permute.xlu0 %1964  ;;  %v5953_v24 = vpop.permute.xlu1 %2569 }
 0x254   :  { %6817 = vst [vmem:[#allocation37_spill] sm:$0xff] %v5951_v14  ;;  %6818 = vst [vmem:[#allocation38_spill] sm:$0xff] %v5953_v24  ;;  %v1784_v24 = vrot.slane %v5672_v43, 2  ;;  %v6822_v14 = vld [vmem:[#allocation4_spill] sm:$0xff] }
 0x255   :  { %2160 = vrot.lane.b32.xlu0 %v5949_v39, %s4767_s15  ;;  %2039 = vrot.lane.b32.xlu1 %v2032_v31, %s4772_s19  ;;  %v6761_v31 = vrot.slane %v6822_v14, 6 }
 0x256   :  { %v5978_v28 = vsel %vm1483_vm4, %v1784_v24, %v1785_v61 }
 0x257   :  { %v5958_v33 = vpop.permute.xlu0 %2567  ;;  %v5960_v15 = vpop.permute.xlu1 %1662 }
 0x258   :  { %6819 = vst [vmem:[#allocation39_spill] sm:$0xff] %v5958_v33  ;;  %6820 = vst [vmem:[#allocation40_spill] sm:$0xff] %v5960_v15  ;;  %v1898_v33 = vrot.slane %v6823_v25, 6 }
 0x259   :  { %2158 = vrot.lane.b32.xlu0 %v1688_v50, %s4767_s15  ;;  %2051 = vrot.lane.b32.xlu1 %v5688_v37, %s4769_s16 }
 0x25a   :  { %v1901_v20 = vsel %vm1896_vm5, %v1898_v33, %v6761_v31 }
 0x25b   :  { %v5973_v63 = vpop.permute.xlu0 %2311  ;;  %v5975_v15 = vpop.permute.xlu1 %2180 }
 0x25c   :  { %6824 = vst [vmem:[#allocation4_spill] sm:$0xff] %v5973_v63  ;;  %6825 = vst [vmem:[#allocation8_spill] sm:$0xff] %v5975_v15  ;;  %v5992_v15 = vmul.f32 %v1901_v20, %v5688_v37  ;;  %v1899_v63 = vsel %vm1896_vm5, %v1897_v27, %v1898_v33  ;;  %v6008_v20 = vmul.f32 %v6802_v35, %v5688_v37  ;;  %v2500_v33 = vld [vmem:[#allocation2 + $0x120] sm:$0xfc]  ;;  %v6833_v35 = vrot.slane %v5895_v49, 2 }
 0x25d   :  { %1695 = vrot.lane.b32.xlu0 %v1688_v50, %s4771_s3  ;;  %2214 = vrot.lane.b32.xlu1 %v5978_v28, %s4771_s3  ;;  %v1910_v50 = vmul.f32 %v1899_v63, %v5672_v43  ;;  %v6015_v63 = vmul.f32 %v6796_v6, %v5672_v43 }
 0x25e   :  { %6830 = vst [vmem:[#allocation43_spill] sm:$0xff] %v6008_v20  ;;  %v1546_v29 = vrot.slane %v6008_v20, 2  ;;  %v1787_v20 = vrot.slane %v5700_v34, 2 }
 0x25f   :  { %v5987_v54 = vpop.permute.xlu0 %1725  ;;  %v5989_v25 = vpop.permute.xlu1 %2178  ;;  %v1920_v55 = vrot.slane %v1910_v50, 2  ;;  %v1544_v6 = vrot.slane %v6015_v63, 2  ;;  %v2506_v50 = vmul.f32 %v5738_v18, %v5688_v37 }
 0x260   :  { %6827 = vst [vmem:[#allocation6_spill] sm:$0xff] %v5987_v54  ;;  %6828 = vst [vmem:[#allocation41_spill] sm:$0xff] %v5989_v25  ;;  %v6832_v25 = vrot.slane %v5942_v5, 2 }
 0x261   :  { %2049 = vrot.lane.b32.xlu0 %v5672_v43, %s4769_s16  ;;  %2472 = vrot.lane.b32.xlu1 %v5700_v34, %s4770_s2  ;;  %v2505_v43 = vmul.f32 %v2500_v33, %v5715_v53  ;;  %v2516_v33 = vrot.slane %v2506_v50, 2  ;;  %v1788_v50 = vsel %vm1483_vm4, %v1785_v61, %v1787_v20 }
 0x262   :  { %v2365_v41 = vsel %vm1483_vm4, %v6833_v35, %v6832_v25  ;;  %v1547_v35 = vsel %vm1483_vm4, %v1544_v6, %v1546_v29 }
 0x263   :  { %v6000_v48 = vpop.permute.xlu0 %2442  ;;  %v6002_v31 = vpop.permute.xlu1 %2484 }
 0x264   :  { %6829 = vst [vmem:[#allocation42_spill] sm:$0xff] %v6002_v31 }
 0x265   :  { %2037 = vrot.lane.b32.xlu0 %v2030_v36, %s4772_s19  ;;  %2053 = vrot.lane.b32.xlu1 %v5700_v34, %s4769_s16  ;;  %v6834_v36 = vrot.slane %v5992_v15, 2 }
 0x267   :  { %v6017_v31 = vpop.permute.xlu0 %1966  ;;  %v6019_v54 = vpop.permute.xlu1 %1859  ;;  %v1923_v56 = vsel %vm1483_vm4, %v1920_v55, %v6834_v36  ;;  %v2515_v36 = vrot.slane %v2505_v43, 2 }
 0x268   :  { %6831 = vst [vmem:[#allocation44_spill] sm:$0xff] %v6017_v31 }
 0x269   :  { %2372 = vrot.lane.b32.xlu0 %v2365_v41, %s4773_s20  ;;  %1930 = vrot.lane.b32.xlu1 %v1923_v56, %s4768_s6  ;;  %v1873_v41 = vld [vmem:[#allocation2 + $0x110] sm:$0xfc]  ;;  %v2517_v18 = vsel %vm1483_vm4, %v2515_v36, %v2516_v33 }
 0x26b   :  { %v6036_v49 = vpop.permute.xlu0 %1727  ;;  %v6038_v25 = vpop.permute.xlu1 %2194 }
 0x26c   :  { %6835 = vst [vmem:[#allocation45_spill] sm:$0xff] %v6036_v49  ;;  %v1909_v49 = vmul.f32 %v1897_v27, %v1873_v41  ;;  %v1545_v41 = vsel %vm1483_vm4, %v6801_v2, %v1544_v6  ;;  %v6840_v2 = vrot.slane %v6822_v14, 6 }
 0x26d   :  { %2212 = vrot.lane.b32.xlu0 %v1784_v24, %s4771_s3  ;;  %1554 = vrot.lane.b32.xlu1 %v1547_v35, %s4767_s15 }
 0x26e   :  { %v1919_v35 = vrot.slane %v1909_v49, 2 }
 0x26f   :  { %v6043_v31 = vpop.permute.xlu0 %2070  ;;  %v6045_v56 = vpop.permute.xlu1 %1758 }
 0x270   :  { %6836 = vst [vmem:[#allocation46_spill] sm:$0xff] %v6045_v56  ;;  %v1921_v27 = vsel %vm1483_vm4, %v1919_v35, %v1920_v55  ;;  %v6839_v35 = vrot.slane %v5712_v38, 2 }
 0x271   :  { %1791 = vrot.lane.b32.xlu0 %v1784_v24, %s4773_s20  ;;  %2524 = vrot.lane.b32.xlu1 %v2517_v18, %s4772_s19  ;;  %v6065_v24 = vmul.f32 %v5544_v13, %v5700_v34  ;;  %v1902_v13 = vrot.slane %v5536_v26, 6 }
 0x273   :  { %v6051_v43 = vpop.permute.xlu0 %2239  ;;  %v6053_v53 = vpop.permute.xlu1 %2072  ;;  %6837 = vst [vmem:[#allocation47_spill] sm:$0xff] %v6065_v24  ;;  %v1548_v49 = vrot.slane %v6065_v24, 2  ;;  %v1903_v6 = vsel %vm1896_vm5, %v6840_v2, %v1902_v13  ;;  %v6100_v24 = vrot.slane %v5721_v0, 2 }
 0x275   :  { %2470 = vrot.lane.b32.xlu0 %v5688_v37, %s4770_s2  ;;  %2216 = vrot.lane.b32.xlu1 %v1788_v50, %s4771_s3  ;;  %v1549_v38 = vsel %vm1483_vm4, %v1546_v29, %v1548_v49  ;;  %v6842_v29 = vld [vmem:[#allocation16_spill] sm:$0xff] }
 0x277   :  { %v6059_v56 = vpop.permute.xlu1 %1588  ;;  %v6061_v36 = vpop.permute.xlu0 %2486 }
 0x279   :  { %1928 = vrot.lane.b32.xlu0 %v1921_v27, %s4768_s6  ;;  %2055 = vrot.lane.b32.xlu1 %v5721_v0, %s4769_s16  ;;  %v2519_v27 = vsel %vm1483_vm4, %v2516_v33, %v6839_v35  ;;  %v1790_v33 = vsel %vm1483_vm4, %v1787_v20, %v6100_v24 }
 0x27b   :  { %v6071_v61 = vpop.permute.xlu1 %1760  ;;  %v6073_v37 = vpop.permute.xlu0 %1944 }
 0x27c   :  { %6838 = vst [vmem:[#allocation48_spill] sm:$0xff] %v6071_v61  ;;  %v1912_v61 = vmul.f32 %v1903_v6, %v5700_v34  ;;  %v1874_v34 = vld [vmem:[#allocation2 + $0x150] sm:$0x3]  ;;  %v6844_v6 = vrot.slane %v5992_v15, 2  ;;  %v2682_v15 = vld [vmem:[%s6728_s1] sm:$0x3] }
 0x27d   :  { %1552 = vrot.lane.b32.xlu0 %v1545_v41, %s4767_s15  ;;  %1558 = vrot.lane.b32.xlu1 %v1548_v49, %s4767_s15 }
 0x27e   :  { %v1924_v35 = vrot.slane %v1912_v61, 2  ;;  %v1913_v61 = vmul.f32 %v1902_v13, %v1874_v34 }
 0x27f   :  { %v6081_v55 = vpop.permute.xlu0 %1861  ;;  %v6083_v18 = vpop.permute.xlu1 %2152 }
 0x280   :  { %v1925_v20 = vsel %vm1483_vm4, %v6844_v6, %v1924_v35  ;;  %v2769_v6 = vld [vmem:[%s6727_s7] sm:$0xff] }
 0x281   :  { %1793 = vrot.lane.b32.xlu0 %v5978_v28, %s4773_s20  ;;  %2526 = vrot.lane.b32.xlu1 %v2519_v27, %s4772_s19  ;;  %v6114_v27 = vld [vmem:[#allocation2] sm:$0xff] }
 0x282   :  { %4605 = vmatprep.mubr.msk.f32.mxu0 %vm4774_vm6, %v6114_v27  ;;  %4612 = vmatprep.mubr.msk.f32.mxu1 %vm4774_vm6, %v6114_v27 }
 0x283   :  { %v6094_v41 = vpop.permute.xlu0 %2196  ;;  %v6096_v26 = vpop.permute.xlu1 %1689 }
 0x285   :  { %1795 = vrot.lane.b32.xlu0 %v1788_v50, %s4773_s20  ;;  %1556 = vrot.lane.b32.xlu1 %v1549_v38, %s4767_s15  ;;  %v2560_v50 = vmul.f32 %v6114_v27, %v6842_v29  ;;  %v2770_v38 = vld [vmem:[%s6727_s7 + $0x8] sm:$0xff] }
 0x286   :  { %4609 = vmatpush3.msra.mxu1 %v2770_v38  ;;  %v4278_v38 = vld [vmem:[%s6727_s7 + $0x18] sm:$0xff] }
 0x287   :  { %v6105_v28 = vpop.permute.xlu0 %2241  ;;  %v6107_v14 = vpop.permute.xlu1 %2074  ;;  %4610 = vmatprep.subr.mxu1 %v6114_v27 }
 0x288   :  { %6841 = vst [vmem:[#allocation49_spill] sm:$0xff] %v6107_v14  ;;  %4611 = vmatpush3.msra.mxu1 %v2769_v6 }
 0x289   :  { %2474 = vrot.lane.b32.xlu0 %v5721_v0, %s4770_s2  ;;  %2218 = vrot.lane.b32.xlu1 %v1790_v33, %s4771_s3  ;;  %v2683_v0 = vld [vmem:[%s6726_s8] sm:$0xf] }
 0x28a   :  { %4604 = vmatpush3.msk.msra.mxu0 %vm111_vm0, %v2683_v0  ;;  %v1745_v0 = vld [vmem:[#allocation2 + $0x1d0] sm:$0x3f]  ;;  %4622 = vmatprep.subr.mxu1 %v6114_v27 }
 0x28b   :  { %v6118_v49 = vpop.permute.xlu1 %1946  ;;  %v6120_v2 = vpop.permute.xlu0 %2488  ;;  %4606 = vmatmul.mubr.msk.f32.vlgmr.msra.gmra.mxu0 %vm2691_vm7, %v2682_v15  ;;  %4615 = vmatprep.subr.mxu0 %v6114_v27 }
 0x28c   :  { %6843 = vst [vmem:[#allocation16_spill] sm:$0xff] %v6120_v2  ;;  %4616 = vmatpush3.msra.mxu0 %v4278_v38  ;;  %4619 = vmatprep.mubr.msk.f32.mxu0 %vm4774_vm6, %v6114_v27 }
 0x28d   :  { %1932 = vrot.lane.b32.xlu0 %v1925_v20, %s4768_s6  ;;  %2571 = vrot.lane.b32.xlu1 %v2560_v50, %s4773_s20  ;;  %v2504_v50 = vld [vmem:[#allocation2 + $0x160] sm:$0x3]  ;;  %v1926_v20 = vrot.slane %v1913_v61, 2 }
 0x28e   :  { %v2509_v15 = vmul.f32 %v2504_v50, %v5698_v62  ;;  %4617 = vmatprep.subr.mxu0 %v6114_v27 }
 0x28f   :  { %v6139_v13 = vpop.permute.xlu0 %1590  ;;  %v6141_v34 = vpop.permute.xlu1 %1863 }
 0x290   :  { %6845 = vst [vmem:[#allocation50_spill] sm:$0xff] %v6141_v34  ;;  %v1750_v34 = vmul.f32 %v1745_v0, %v5610_v8  ;;  %v2522_v50 = vrot.slane %v2509_v15, 2  ;;  %v6849_v0 = vrot.slane %v5728_v9, 2  ;;  %v6851_v15 = vld [vmem:[#allocation17_spill] sm:$0xff] }
 0x291   :  { %1797 = vrot.lane.b32.xlu0 %v1790_v33, %s4773_s20  ;;  %2528 = vrot.lane.b32.xlu1 %v5750_v40, %s4772_s19  ;;  %v4277_v40 = vld [vmem:[%s6727_s7 + $0x10] sm:$0xff]  ;;  %v1927_v33 = vsel %vm1483_vm4, %v1924_v35, %v1926_v20 }
 0x292   :  { %4618 = vmatpush3.msra.mxu0 %v4277_v40  ;;  %v2523_v35 = vsel %vm1483_vm4, %v6849_v0, %v2522_v50  ;;  %v2366_v40 = vrot.slane %v6851_v15, 2 }
 0x293   :  { %v6157_v61 = vpop.permute.xlu0 %2540  ;;  %v6159_v14 = vpop.permute.xlu1 %2198  ;;  %4629 = vmatprep.subr.mxu0 %v6114_v27 }
 0x294   :  { %6846 = vst [vmem:[#allocation51_spill] sm:$0xff] %v6159_v14 }
 0x295   :  { %1934 = vrot.lane.b32.xlu0 %v1927_v33, %s4768_s6  ;;  %2200 = vrot.lane.b32.xlu1 %v1750_v34, %s4770_s2 }
 0x297   :  { %v6172_v8 = vpop.permute.xlu1 %1762  ;;  %v6174_v6 = vpop.permute.xlu0 %2490 }
 0x298   :  { %6847 = vst [vmem:[#allocation52_spill] sm:$0xff] %v6172_v8  ;;  %6848 = vst [vmem:[#allocation53_spill] sm:$0xff] %v6174_v6 }
 0x299   :  { %2313 = vrot.lane.b32.xlu0 %v5589_v10, %s4769_s16  ;;  %2530 = vrot.lane.b32.xlu1 %v2523_v35, %s4772_s19  ;;  %v6853_v10 = vrot.slane %v5942_v5, 2 }
 0x29b   :  { %v6183_v20 = vpop.permute.xlu1 %2243  ;;  %v6185_v38 = vpop.permute.xlu0 %2076  ;;  %v2367_v50 = vsel %vm1483_vm4, %v6853_v10, %v2366_v40  ;;  %v2263_v10 = vld [vmem:[#allocation2 + $0xe0] sm:$0x3f] }
 0x29c   :  { %6850 = vst [vmem:[#allocation54_spill] sm:$0xff] %v6185_v38  ;;  %v6855_v38 = vrot.slane %v5643_v12, 2 }
 0x29d   :  { %1697 = vrot.lane.b32.xlu0 %v5949_v39, %s4771_s3  ;;  %1729 = vrot.lane.b32.xlu1 %v5682_v52, %s4772_s19 }
 0x29f   :  { %v6192_v9 = vpop.permute.xlu1 %2368  ;;  %v6194_v33 = vpop.permute.xlu0 %1594 }
 0x2a0   :  { %6852 = vst [vmem:[#allocation17_spill] sm:$0xff] %v6194_v33 }
 0x2a1   :  { %2374 = vrot.lane.b32.xlu0 %v2367_v50, %s4773_s20  ;;  %1764 = vrot.lane.b32.xlu1 %v1750_v34, %s4769_s16 }
 0x2a3   :  { %v2155_v0 = vpop.permute.xlu0 %2154  ;;  %v6201_v35 = vpop.permute.xlu1 %2245 }
 0x2a4   :  { %6854 = vst [vmem:[#allocation55_spill] sm:$0xff] %v6201_v35  ;;  %v2168_v39 = vadd.f32 %v2155_v0, %v5556_v7 }
 0x2a5   :  { %2220 = vrot.lane.b32.xlu0 %v6100_v24, %s4771_s3  ;;  %1799 = vrot.lane.b32.xlu1 %v6100_v24, %s4773_s20  ;;  %v6856_v24 = vrot.slane %v5563_v47, 2 }
 0x2a6   :  { %v2188_v52 = vadd.f32 %v5921_v11, %v2168_v39 }
 0x2a7   :  { %v6209_v5 = vpop.permute.xlu0 %1691  ;;  %v2157_v15 = vpop.permute.xlu1 %2156  ;;  %v2301_v0 = vmul.f32 %v6856_v24, %v2263_v10 }
 0x2a8   :  { %v2169_v50 = vadd.f32 %v2157_v15, %v5601_v44  ;;  %v2208_v34 = vadd.f32 %v6038_v25, %v2188_v52 }
 0x2a9   :  { %2247 = vrot.lane.b32.xlu0 %v6855_v38, %s4772_s19  ;;  %2376 = vrot.lane.b32.xlu1 %v2366_v40, %s4773_s20 }
 0x2aa   :  { %v2189_v7 = vadd.f32 %v5938_v16, %v2169_v50 }
 0x2ab   :  { %v6220_v11 = vpop.permute.xlu0 %1592  ;;  %v6222_v39 = vpop.permute.xlu1 %1693 }
 0x2ac   :  { %v6225_v35 = vadd.f32 %v6094_v41, %v2189_v7  ;;  %v2451_v41 = vadd.f32 %v6000_v48, %v5661_v51 }
 0x2ad   :  { %2315 = vrot.lane.b32.xlu0 %v2301_v0, %s4769_s16 }
 0x2af   :  { %v6228_v44 = vpop.permute.xlu0 %1948  ;;  %v6230_v12 = vpop.permute.xlu1 %2454 }
 0x2b0   :  { %6857 = vst [vmem:[#allocation56_spill] sm:$0xff] %v6228_v44 }
 0x2b3   :  { %v2453_v25 = vpop.permute.xlu0 %2452  ;;  %v2036_v38 = vpop.permute.xlu1 %2035 }
 0x2b7   :  { %v6232_v40 = vpop.permute.xlu0 %2033  ;;  %v2371_v16 = vpop.permute.xlu1 %2370 }
 0x2bb   :  { %v6234_v47 = vpop.permute.xlu0 %2542  ;;  %v2469_v52 = vpop.permute.xlu1 %2468 }
 0x2bf   :  { %v6236_v15 = vpop.permute.xlu0 %1950  ;;  %v6238_v10 = vpop.permute.xlu1 %2456 }
 0x2c0   :  { %6858 = vst [vmem:[#allocation57_spill] sm:$0xff] %v6236_v15 }
 0x2c3   :  { %v6242_v50 = vpop.permute.xlu0 %2544  ;;  %v2459_v7 = vpop.permute.xlu1 %2458 }
 0x2c4   :  { %6859 = vst [vmem:[#allocation58_spill] sm:$0xff] %v6242_v50  ;;  %v6244_v24 = vadd.f32 %v2459_v7, %v2451_v41  ;;  %v1458_v41 = vld [vmem:[#allocation2 + $0x180] sm:$0xc0] }
 0x2c6   :  { %6860 = vst [vmem:[#allocation59_spill] sm:$0xff] %v6244_v24  ;;  %v1485_v24 = vrot.slane %v5784_v3, 2 }
 0x2c7   :  { %v6246_v0 = vpop.permute.xlu0 %2160  ;;  %v6248_v8 = vpop.permute.xlu1 %2039 }
 0x2c8   :  { %6861 = vst [vmem:[#allocation60_spill] sm:$0xff] %v6246_v0  ;;  %6862 = vst [vmem:[#allocation61_spill] sm:$0xff] %v6248_v8  ;;  %v1484_v0 = vrot.slane %v5799_v59, 2 }
 0x2cb   :  { %v6250_v62 = vpop.permute.xlu0 %2158  ;;  %v2052_v6 = vpop.permute.xlu1 %2051 }
 0x2cf   :  { %v6252_v33 = vpop.permute.xlu0 %1695  ;;  %v2215_v15 = vpop.permute.xlu1 %2214 }
 0x2d0   :  { %6863 = vst [vmem:[#allocation62_spill] sm:$0xff] %v6252_v33  ;;  %v2228_v14 = vadd.f32 %v2215_v15, %v2208_v34  ;;  %v6768_v34 = vrot.slane %v5807_v21, 2 }
 0x2d2   :  { %v2255_v44 = vadd.f32 %v6105_v28, %v2228_v14  ;;  %v1496_v28 = vmul.f32 %v1484_v0, %v1458_v41  ;;  %v1870_v14 = vadd.f32 %v6019_v54, %v6015_v63  ;;  %v1488_v59 = vsel %vm1483_vm4, %v1485_v24, %v6768_v34  ;;  %v2391_v34 = vld [vmem:[#allocation2 + $0xe8] sm:$0xff] }
 0x2d3   :  { %v6255_v2 = vpop.permute.xlu0 %2049  ;;  %v6257_v51 = vpop.permute.xlu1 %2472  ;;  %v1498_v41 = vmul.f32 %v1488_v59, %v5603_v17 }
 0x2d4   :  { %v2323_v48 = vadd.f32 %v5908_v19, %v2255_v44 }
 0x2d6   :  { %v6260_v7 = vadd.f32 %v2371_v16, %v2323_v48  ;;  %v1565_v16 = vadd.f32 %v5836_v45, %v1496_v28  ;;  %v6867_v48 = vld [vmem:[#allocation18_spill] sm:$0xff]  ;;  %v2448_v45 = vadd.f32 %v5869_v23, %v5621_v22 }
 0x2d7   :  { %v6263_v8 = vpop.permute.xlu0 %2037  ;;  %v6265_v50 = vpop.permute.xlu1 %2053 }
 0x2d8   :  { %6864 = vst [vmem:[#allocation63_spill] sm:$0xff] %v6263_v8  ;;  %6865 = vst [vmem:[#allocation64_spill] sm:$0xff] %v6265_v50  ;;  %v2167_v50 = vadd.f32 %v6083_v18, %v6867_v48  ;;  %v2610_v8 = vrot.slane %v5805_v42, 6  ;;  %v2584_v48 = vld [vmem:[#allocation2 + $0x68] sm:$0xff] }
 0x2da   :  { %v2187_v18 = vadd.f32 %v5880_v60, %v2167_v50  ;;  %v2607_v60 = vrot.slane %v5797_v4, 6 }
 0x2db   :  { %v6271_v15 = vpop.permute.xlu0 %2372  ;;  %v1931_v19 = vpop.permute.xlu1 %1930 }
 0x2dc   :  { %6866 = vst [vmem:[#allocation65_spill] sm:$0xff] %v6271_v15  ;;  %v1941_v44 = vadd.f32 %v1931_v19, %v1870_v14  ;;  %v2612_v15 = vrot.slane %v5828_v58, 6  ;;  %v1601_v19 = vadd.f32 %v5848_v1, %v1565_v16  ;;  %v2585_v58 = vld [vmem:[#allocation2 + $0x78] sm:$0x3]  ;;  %v6294_v1 = vmul.f32 %v2391_v34, %v6842_v29 }
 0x2dd   :  { %v6868_v16 = vld [vmem:[#allocation27_spill] sm:$0xff] }
 0x2de   :  { %v1957_v3 = vadd.f32 %v6118_v49, %v1941_v44  ;;  %v2464_v49 = vadd.f32 %v2453_v25, %v2448_v45  ;;  %v2613_v33 = vsel %vm1896_vm5, %v2610_v8, %v2612_v15  ;;  %v2608_v25 = vrot.slane %v5819_v32, 6  ;;  %v6869_v32 = vld [vmem:[#allocation14_spill] sm:$0xff] }
 0x2df   :  { %v2213_v54 = vpop.permute.xlu0 %2212  ;;  %v1555_v63 = vpop.permute.xlu1 %1554 }
 0x2e0   :  { %v1973_v28 = vadd.f32 %v5902_v46, %v1957_v3  ;;  %v1567_v14 = vadd.f32 %v1555_v63, %v1498_v41  ;;  %v2480_v22 = vadd.f32 %v2469_v52, %v2464_v49  ;;  %v2207_v3 = vadd.f32 %v6868_v16, %v2187_v18  ;;  %v2388_v52 = vld [vmem:[#allocation2 + $0xb8] sm:$0xff]  ;;  %v6870_v63 = vld [vmem:[#allocation13_spill] sm:$0xff] }
 0x2e1   :  { %v6873_v18 = vld [vmem:[#allocation5_spill] sm:$0xff]  ;;  %v6874_v49 = vld [vmem:[#allocation11_spill] sm:$0xff] }
 0x2e2   :  { %v2046_v44 = vadd.f32 %v2036_v38, %v1973_v28  ;;  %v1603_v17 = vadd.f32 %v6139_v13, %v1567_v14  ;;  %v1669_v13 = vadd.f32 %v5850_v30, %v1601_v19  ;;  %v2389_v38 = vld [vmem:[#allocation2 + $0xc8] sm:$0xff]  ;;  %v2227_v45 = vadd.f32 %v2213_v54, %v2207_v3  ;;  %v6871_v28 = vld [vmem:[#allocation42_spill] sm:$0xff]  ;;  %v6872_v14 = vld [vmem:[#allocation12_spill] sm:$0xff] }
 0x2e3   :  { %v6289_v42 = vpop.permute.xlu0 %1791  ;;  %v2525_v59 = vpop.permute.xlu1 %2524  ;;  %v6312_v30 = vmul.f32 %v2389_v38, %v6869_v32  ;;  %v2609_v19 = vsel %vm1896_vm5, %v2607_v60, %v2608_v25  ;;  %v2582_v54 = vld [vmem:[#allocation2 + $0x48] sm:$0xff]  ;;  %v2611_v38 = vsel %vm1896_vm5, %v2608_v25, %v2610_v8  ;;  %v6878_v3 = vld [vmem:[#allocation30_spill] sm:$0xff]  ;;  %v6879_v25 = vrot.slane %v5807_v21, 2 }
 0x2e4   :  { %v2062_v23 = vadd.f32 %v2052_v6, %v2046_v44  ;;  %v1671_v46 = vadd.f32 %v5910_v57, %v1603_v17  ;;  %v6304_v6 = vmul.f32 %v2613_v33, %v2584_v48  ;;  %v6306_v57 = vmul.f32 %v2612_v15, %v2585_v58  ;;  %v6875_v17 = vld [vmem:[#allocation21_spill] sm:$0xff]  ;;  %v6876_v48 = vld [vmem:[#allocation31_spill] sm:$0xff] }
 0x2e5   :  { %v1704_v29 = vadd.f32 %v6096_v26, %v1669_v13  ;;  %v2405_v33 = vrot.slane %v6294_v1, 2  ;;  %v1489_v15 = vrot.slane %v6872_v14, 2  ;;  %v1486_v26 = vsel %vm1483_vm4, %v1484_v0, %v1485_v24  ;;  %v6402_v14 = vld [vmem:[#allocation2 + $0x1c8] sm:$0xff]  ;;  %v4302_v1 = vld [vmem:[%s6727_s7 + $0x98] sm:$0xff] }
 0x2e6   :  { %v2083_v50 = vadd.f32 %v6053_v53, %v2062_v23  ;;  %v6302_v41 = vadd.f32 %v6222_v39, %v1671_v46  ;;  %v2496_v39 = vadd.f32 %v6871_v28, %v2480_v22  ;;  %v1869_v44 = vadd.f32 %v6874_v49, %v6873_v18  ;;  %v6877_v23 = vld [vmem:[#allocation19_spill] sm:$0xff] }
 0x2e7   :  { %v2471_v4 = vpop.permute.xlu0 %2470  ;;  %v6309_v34 = vpop.permute.xlu1 %2216  ;;  %v2449_v58 = vadd.f32 %v6876_v48, %v6875_v17  ;;  %v6327_v46 = vmul.f32 %v2388_v52, %v6877_v23  ;;  %v2390_v22 = vld [vmem:[#allocation2 + $0xd8] sm:$0xff]  ;;  %v2636_v16 = vrot.slane %v6306_v57, 2  ;;  %v1736_v24 = vadd.f32 %v6878_v3, %v1704_v29 }
 0x2e8   :  { %v6315_v53 = vadd.f32 %v6870_v63, %v2083_v50  ;;  %v2536_v13 = vadd.f32 %v2525_v59, %v2496_v39  ;;  %v2634_v50 = vrot.slane %v6304_v6, 2  ;;  %v2401_v28 = vrot.slane %v6312_v30, 2  ;;  %v2581_v18 = vld [vmem:[#allocation2 + $0x38] sm:$0xfc] }
 0x2e9   :  { %v2465_v63 = vadd.f32 %v6230_v12, %v2449_v58  ;;  %v2254_v52 = vadd.f32 %v6051_v43, %v2227_v45  ;;  %v2583_v39 = vld [vmem:[#allocation2 + $0x58] sm:$0xff]  ;;  %v2620_v49 = vmul.f32 %v2609_v19, %v2582_v54  ;;  %v1497_v8 = vmul.f32 %v6114_v27, %v1486_v26  ;;  %v2086_v45 = vld [vmem:[#allocation2 + $0x128] sm:$0xfc]  ;;  %v6881_v19 = vld [vmem:[#allocation26_spill] sm:$0xff] }
 0x2ea   :  { %v1490_v29 = vsel %vm1483_vm4, %v6879_v25, %v1489_v15  ;;  %v6880_v17 = vld [vmem:[#allocation15_spill] sm:$0xff]  ;;  %v2400_v12 = vrot.slane %v6327_v46, 2  ;;  %v2552_v58 = vadd.f32 %v6157_v61, %v2536_v13  ;;  %v1771_v23 = vadd.f32 %v6881_v19, %v1736_v24  ;;  %v6883_v13 = vld [vmem:[#allocation28_spill] sm:$0xff] }
 0x2eb   :  { %v1929_v0 = vpop.permute.xlu0 %1928  ;;  %v6333_v32 = vpop.permute.xlu1 %2055  ;;  %v6345_v48 = vmul.f32 %v2390_v22, %v6880_v17  ;;  %v2481_v43 = vadd.f32 %v2471_v4, %v2465_v63  ;;  %v2619_v26 = vmul.f32 %v2607_v60, %v2581_v18  ;;  %v6353_v21 = vmul.f32 %v2611_v38, %v2583_v39  ;;  %v6882_v22 = vld [vmem:[#allocation32_spill] sm:$0xff]  ;;  %v1811_v4 = vld [vmem:[#allocation2 + $0x1a8] sm:$0xff] }
 0x2ec   :  { %v1940_v59 = vadd.f32 %v1929_v0, %v1869_v44  ;;  %v4762_v0 = vld [vmem:[#allocation2 + $0x1b0] sm:$0xff]  ;;  %v2402_v46 = vsel %vm1483_vm4, %v2400_v12, %v2401_v28  ;;  %v2322_v61 = vadd.f32 %v6882_v22, %v2254_v52  ;;  %v1806_v60 = vadd.f32 %v6289_v42, %v1771_v23  ;;  %v6884_v18 = vld [vmem:[#allocation9_spill] sm:$0xff] }
 0x2ed   :  { %v1499_v25 = vmul.f32 %v4762_v0, %v1490_v29  ;;  %v2630_v24 = vrot.slane %v2620_v49, 2  ;;  %v2091_v38 = vmul.f32 %v2086_v45, %v6884_v18  ;;  %v2403_v39 = vrot.slane %v6345_v48, 2  ;;  %v6885_v29 = vld [vmem:[#allocation33_spill] sm:$0xff]  ;;  %v6374_v45 = vld [vmem:[%s6729_s5] ss:$0 sm:$0xff]  ;;  %v4290_v48 = vld [vmem:[%s6727_s7 + $0x58] sm:$0xff] }
 0x2ee   :  { %v1956_v44 = vadd.f32 %v6073_v37, %v1940_v59  ;;  %v6360_v59 = vld [vmem:[#allocation2 + $0x1b8] sm:$0xff]  ;;  %v2577_v17 = vadd.f32 %v6885_v29, %v2552_v58  ;;  %v2497_v52 = vadd.f32 %v6061_v36, %v2481_v43  ;;  %v1819_v22 = vrot.slane %v1811_v4, 2  ;;  %v1462_v36 = vld [vmem:[#allocation2 + $0x1c0] sm:$0x3f] }
 0x2ef   :  { %v1553_v54 = vpop.permute.xlu0 %1552  ;;  %v6351_v3 = vpop.permute.xlu1 %1558  ;;  %v2632_v42 = vrot.slane %v6353_v21, 2  ;;  %v2383_v58 = vadd.f32 %v6192_v9, %v2322_v61  ;;  %v6887_v61 = vld [vmem:[#allocation10_spill] sm:$0xff] }
 0x2f0   :  { %v1972_v63 = vadd.f32 %v6883_v13, %v1956_v44  ;;  %v1566_v37 = vadd.f32 %v1553_v54, %v1497_v8  ;;  %v2629_v44 = vrot.slane %v2619_v26, 2  ;;  %v1820_v8 = vrot.slane %v6360_v59, 2  ;;  %v6475_v59 = vld [vmem:[#allocation2 + $0x1d8] sm:$0xff] }
 0x2f1   :  { %v1831_v26 = vadd.f32 %v1819_v22, %v1806_v60  ;;  %v2101_v13 = vrot.slane %v2091_v38, 2  ;;  %v6390_v60 = vmul.f32 %v1489_v15, %v1462_v36  ;;  %v4763_v15 = vld [vmem:[#allocation2 + $0x40] sm:$0xff] }
 0x2f2   :  { %v2045_v19 = vadd.f32 %v6232_v40, %v1972_v63  ;;  %v1602_v0 = vadd.f32 %v6059_v56, %v1566_v37  ;;  %v6886_v56 = vld [vmem:[#allocation29_spill] sm:$0xff]  ;;  %v2631_v4 = vsel %vm1483_vm4, %v2629_v44, %v2630_v24  ;;  %v2119_v63 = vadd.f32 %v6374_v45, %v6315_v53  ;;  %v6890_v44 = vld [vmem:[#allocation39_spill] sm:$0xff] }
 0x2f3   :  { %v1794_v54 = vpop.permute.xlu0 %1793  ;;  %v2527_v49 = vpop.permute.xlu1 %2526  ;;  %v2642_v37 = vadd.f32 %v2631_v4, %v2577_v17  ;;  %v1821_v38 = vsel %vm1483_vm4, %v1819_v22, %v1820_v8  ;;  %v1843_v22 = vadd.f32 %v6374_v45, %v1831_v26 }
 0x2f4   :  { %v2061_v40 = vadd.f32 %v6255_v2, %v2045_v19  ;;  %v1670_v23 = vadd.f32 %v6886_v56, %v1602_v0  ;;  %v2537_v43 = vadd.f32 %v2527_v49, %v2497_v52  ;;  %v6888_v2 = vrot.slane %v6887_v61, 2  ;;  %v6889_v0 = vld [vmem:[#allocation34_spill] sm:$0xff] }
 0x2f6   :  { %v2082_v18 = vadd.f32 %v6043_v31, %v2061_v40  ;;  %v1705_v29 = vadd.f32 %v6209_v5, %v1670_v23  ;;  %v2553_v9 = vadd.f32 %v6234_v47, %v2537_v43  ;;  %v2103_v19 = vsel %vm1483_vm4, %v2101_v13, %v6888_v2  ;;  %v6891_v40 = vld [vmem:[#allocation36_spill] sm:$0xff]  ;;  %v6892_v43 = vld [vmem:[#allocation46_spill] sm:$0xff] }
 0x2f7   :  { %v2633_v31 = vsel %vm1483_vm4, %v2630_v24, %v2632_v42  ;;  %v6398_v53 = vpop.permute.xlu0 %1795  ;;  %v1557_v5 = vpop.permute.xlu1 %1556  ;;  %v2412_v47 = vadd.f32 %v2400_v12, %v2383_v58  ;;  %v2450_v56 = vadd.f32 %v4763_v15, %v6891_v40  ;;  %v2123_v23 = vmax.f32 %v2119_v63, 0.0 }
 0x2f8   :  { %v2114_v17 = vadd.f32 %v2103_v19, %v2082_v18  ;;  %v1737_v52 = vadd.f32 %v6889_v0, %v1705_v29  ;;  %v2578_v49 = vadd.f32 %v6890_v44, %v2553_v9  ;;  %v1568_v36 = vadd.f32 %v1557_v5, %v1499_v25  ;;  %v6893_v19 = vld [vmem:[#allocation43_spill] sm:$0xff] }
 0x2f9   :  { %v2646_v24 = vadd.f32 %v6374_v45, %v2642_v37  ;;  %v2466_v13 = vadd.f32 %v6238_v10, %v2450_v56  ;;  %v2413_v18 = vadd.f32 %v2402_v46, %v6260_v7  ;;  %v1822_v29 = vrot.slane %v6402_v14, 2  ;;  %v6929_v14 = vld [vmem:[#allocation22_spill] sm:$0xff] }
 0x2fa   :  { %v1772_v4 = vadd.f32 %v6892_v43, %v1737_v52  ;;  %v2118_v12 = vadd.f32 %v6374_v45, %v2114_v17  ;;  %v2643_v58 = vadd.f32 %v2633_v31, %v2578_v49  ;;  %v1604_v9 = vadd.f32 %v6220_v11, %v1568_v36  ;;  %v6894_v52 = vld [vmem:[#allocation35_spill] sm:$0xff] }
 0x2fb   :  { %v2475_v61 = vpop.permute.xlu0 %2474  ;;  %v6413_v2 = vpop.permute.xlu1 %2218  ;;  %v2417_v25 = vadd.f32 %v6374_v45, %v2412_v47  ;;  %v1871_v31 = vadd.f32 %v6081_v55, %v6893_v19  ;;  %v2482_v10 = vadd.f32 %v6257_v51, %v2466_v13  ;;  %v1848_v5 = vmax.f32 %v1843_v22, 0.0  ;;  %v6896_v22 = vld [vmem:[#allocation6_spill] sm:$0xff]  ;;  %v6898_v13 = vld [vmem:[#allocation47_spill] sm:$0xff] }
 0x2fc   :  { %v2122_v26 = vmax.f32 %v2118_v12, 0.0  ;;  %v1807_v63 = vadd.f32 %v1794_v54, %v1772_v4  ;;  %v2647_v37 = vadd.f32 %v6374_v45, %v2643_v58  ;;  %v2229_v7 = vadd.f32 %v6309_v34, %v6225_v35  ;;  %v6895_v34 = vld [vmem:[#allocation20_spill] sm:$0xff] }
 0x2fd   :  { %v2650_v46 = vmax.f32 %v2646_v24, 0.0  ;;  %v6422_v0 = vrot.slane %v2123_v23, 2  ;;  %v2418_v47 = vadd.f32 %v6374_v45, %v2413_v18  ;;  %v1672_v44 = vadd.f32 %v6894_v52, %v1604_v9  ;;  %v6897_v12 = vld [vmem:[#allocation16_spill] sm:$0xff]  ;;  %v6899_v18 = vld [vmem:[#allocation50_spill] sm:$0xff] }
 0x2fe   :  { %v2130_v11 = vrot.slane %v2122_v26, 2  ;;  %v1832_v17 = vadd.f32 %v1821_v38, %v1807_v63  ;;  %v2651_v54 = vmax.f32 %v2647_v37, 0.0  ;;  %v2422_v55 = vmax.f32 %v2417_v25, 0.0  ;;  %v6900_v26 = vld [vmem:[#allocation56_spill] sm:$0xff] }
 0x2ff   :  { %v1933_v49 = vpop.permute.xlu0 %1932  ;;  %v6426_v15 = vpop.permute.xlu1 %2571  ;;  %v2170_v38 = vadd.f32 %v6250_v62, %v6895_v34  ;;  %v2256_v56 = vadd.f32 %v6183_v20, %v2229_v7  ;;  %v1738_v23 = vadd.f32 %v6896_v22, %v6302_v41  ;;  %v2658_v24 = vrot.slane %v2650_v46, 2  ;;  %v6901_v62 = vld [vmem:[#allocation62_spill] sm:$0xff]  ;;  %v6902_v46 = vld [vmem:[#allocation41_spill] sm:$0xff] }
 0x300   :  { %v2142_v51 = vmax.f32 %v1848_v5, %v2130_v11  ;;  %v1844_v40 = vadd.f32 %v6374_v45, %v1832_v17  ;;  %v2132_v35 = vsel %vm1483_vm4, %v2130_v11, %v6422_v0  ;;  %v1942_v36 = vadd.f32 %v1933_v49, %v1871_v31  ;;  %v6903_v17 = vld [vmem:[#allocation4_spill] sm:$0xff] }
 0x301   :  { %v2498_v58 = vadd.f32 %v6897_v12, %v2482_v10  ;;  %v1872_v9 = vadd.f32 %v6899_v18, %v6898_v13  ;;  %v6439_v25 = vrot.slane %v2651_v54, 2  ;;  %v1707_v19 = vadd.f32 %v6901_v62, %v1672_v44  ;;  %v6904_v10 = vld [vmem:[#allocation48_spill] sm:$0xff]  ;;  %v6906_v44 = vld [vmem:[#allocation59_spill] sm:$0xff]  ;;  %v6911_v18 = vld [vmem:[#allocation65_spill] sm:$0xff] }
 0x302   :  { %v2427_v43 = vmax.f32 %v2142_v51, %v2422_v55  ;;  %v1849_v4 = vmax.f32 %v1844_v40, 0.0  ;;  %v1958_v63 = vadd.f32 %v6900_v26, %v1942_v36  ;;  %v2423_v7 = vmax.f32 %v2418_v47, 0.0  ;;  %v6905_v55 = vld [vmem:[#allocation37_spill] sm:$0xff]  ;;  %v6912_v26 = vld [vmem:[#allocation51_spill] sm:$0xff]  ;;  %v6913_v62 = vld [vmem:[#allocation64_spill] sm:$0xff] }
 0x303   :  { %v1798_v37 = vpop.permute.xlu0 %1797  ;;  %v2529_v20 = vpop.permute.xlu1 %2528  ;;  %v2190_v11 = vadd.f32 %v6902_v46, %v2170_v38  ;;  %v2324_v52 = vadd.f32 %v6903_v17, %v2256_v56  ;;  %v1773_v49 = vadd.f32 %v6904_v10, %v1738_v23  ;;  %v1569_v54 = vadd.f32 %v6351_v3, %v6390_v60  ;;  %v6908_v56 = vld [vmem:[#allocation63_spill] sm:$0xff]  ;;  %v6909_v23 = vld [vmem:[#allocation45_spill] sm:$0xff] }
 0x304   :  { %v2143_v5 = vmax.f32 %v1849_v4, %v2132_v35  ;;  %v2670_v41 = vmax.f32 %v2427_v43, %v2658_v24  ;;  %v2538_v31 = vadd.f32 %v2529_v20, %v2498_v58  ;;  %v1974_v51 = vadd.f32 %v6905_v55, %v1958_v63  ;;  %v6907_v35 = vld [vmem:[#allocation58_spill] sm:$0xff]  ;;  %v2090_v3 = vld [vmem:[#allocation2 + $0x168] sm:$0x3]  ;;  %v6919_v55 = vld [vmem:[#allocation52_spill] sm:$0xff] }
 0x305   :  { %v2483_v34 = vadd.f32 %v2475_v61, %v6906_v44  ;;  %v2660_v22 = vsel %vm1483_vm4, %v2658_v24, %v6439_v25  ;;  %v1808_v38 = vadd.f32 %v6398_v53, %v1773_v49  ;;  %v1739_v43 = vadd.f32 %v6909_v23, %v1707_v19  ;;  %v6910_v58 = vld [vmem:[#allocation38_spill] sm:$0xff]  ;;  %v6918_v10 = vld [vmem:[#allocation49_spill] sm:$0xff] }
 0x306   :  { %v2428_v40 = vmax.f32 %v2143_v5, %v2423_v7  ;;  %2676 = vst.msk [vmem:[#allocation3 - $0x6] sm:$0xc0] %vm2675_vm8, %v2670_v41  ;;  %v2554_v47 = vadd.f32 %v6907_v35, %v2538_v31  ;;  %v2047_v36 = vadd.f32 %v6908_v56, %v1974_v51  ;;  %v1823_v61 = vsel %vm1483_vm4, %v1820_v8, %v1822_v29  ;;  %v6914_v5 = vld [vmem:[#allocation17_spill] sm:$0xff] }
 0x307   :  { %v1935_v4 = vpop.permute.xlu0 %1934  ;;  %v6457_v12 = vpop.permute.xlu1 %2200  ;;  %v2385_v53 = vadd.f32 %v6911_v18, %v2324_v52  ;;  %v2210_v63 = vadd.f32 %v6912_v26, %v2190_v11  ;;  %v2635_v20 = vsel %vm1483_vm4, %v2632_v42, %v2634_v50  ;;  %v1605_v7 = vadd.f32 %v6914_v5, %v1569_v54  ;;  %v6916_v31 = vld [vmem:[#allocation53_spill] sm:$0xff]  ;;  %v6917_v11 = vld [vmem:[#allocation7_spill] sm:$0xff] }
 0x308   :  { %v2671_v60 = vmax.f32 %v2428_v40, %v2660_v22  ;;  %v2579_v13 = vadd.f32 %v6910_v58, %v2554_v47  ;;  %v1943_v24 = vadd.f32 %v1935_v4, %v1872_v9  ;;  %v2063_v19 = vadd.f32 %v6913_v62, %v2047_v36  ;;  %v6915_v9 = vld [vmem:[#allocation57_spill] sm:$0xff]  ;;  %v6920_v40 = vld [vmem:[#allocation44_spill] sm:$0xff] }
 0x309   :  { %v2499_v46 = vadd.f32 %v6916_v31, %v2483_v34  ;;  %v2095_v17 = vmul.f32 %v2090_v3, %v6917_v11  ;;  %v1833_v52 = vadd.f32 %v1823_v61, %v1808_v38  ;;  %v1774_v21 = vadd.f32 %v6919_v55, %v1739_v43  ;;  %v4281_v47 = vld [vmem:[%s6727_s7 + $0x28] sm:$0xff]  ;;  %v6921_v22 = vld [vmem:[#allocation24_spill] sm:$0xff] }
 0x30a   :  { %2677 = vst.msk [vmem:[#allocation3 + $0x2] sm:$0xff] %vm978_vm2, %v2671_v60  ;;  %v2644_v8 = vadd.f32 %v2635_v20, %v2579_v13  ;;  %v1959_v41 = vadd.f32 %v6915_v9, %v1943_v24  ;;  %v2084_v49 = vadd.f32 %v6918_v10, %v2063_v19  ;;  %v2230_v54 = vadd.f32 %v6413_v2, %v2210_v63  ;;  %v6922_v43 = vld [vmem:[#allocation61_spill] sm:$0xff]  ;;  %v4280_v58 = vld [vmem:[%s6727_s7 + $0x20] sm:$0xff]  ;;  %v4284_v19 = vld [vmem:[%s6727_s7 + $0x38] sm:$0xff] }
 0x30b   :  { %v2314_v51 = vpop.permute.xlu0 %2313  ;;  %v2531_v42 = vpop.permute.xlu1 %2530  ;;  %v2404_v34 = vsel %vm1483_vm4, %v2401_v28, %v2403_v39  ;;  %v1824_v56 = vrot.slane %v6475_v59, 2  ;;  %v2637_v3 = vsel %vm1483_vm4, %v2634_v50, %v2636_v16  ;;  %v6923_v60 = vld [vmem:[#allocation25_spill] sm:$0xff]  ;;  %v6924_v28 = vld [vmem:[#allocation40_spill] sm:$0xff]  ;;  %v2108_v13 = vrot.slane %v2095_v17, 2  ;;  %v6925_v16 = vld [vmem:[#allocation55_spill] sm:$0xff] }
 0x30c   :  { %v1975_v44 = vadd.f32 %v6920_v40, %v1959_v41  ;;  %v2539_v35 = vadd.f32 %v2531_v42, %v2499_v46  ;;  %v2116_v38 = vadd.f32 %v6921_v22, %v2084_v49  ;;  %v2648_v36 = vadd.f32 %v6374_v45, %v2644_v8  ;;  %v6926_v9 = vld [vmem:[#allocation23_spill] sm:$0xff]  ;;  %v6928_v46 = vld [vmem:[#allocation54_spill] sm:$0xff]  ;;  %v6930_v10 = vld [vmem:[#allocation60_spill] sm:$0xff] }
 0x30d   :  { %v2768_v2 = vld [vmem:[#allocation3] sm:$0x3]  ;;  %v2414_v23 = vadd.f32 %v2404_v34, %v2385_v53  ;;  %v1673_v61 = vadd.f32 %v6924_v28, %v1605_v7  ;;  %v1845_v24 = vadd.f32 %v6374_v45, %v1833_v52  ;;  %v1809_v57 = vadd.f32 %v1798_v37, %v1774_v21  ;;  %v4287_v37 = vld [vmem:[%s6727_s7 + $0x48] sm:$0xff]  ;;  %v4283_v40 = vld [vmem:[%s6727_s7 + $0x30] sm:$0xff] }
 0x30e   :  { %v2048_v4 = vadd.f32 %v6922_v43, %v1975_v44  ;;  %v2555_v30 = vadd.f32 %v6923_v60, %v2539_v35  ;;  %4613 = vmatmul.mubr.msk.f32.vlgmr.msra.gmra.mxu1 %vm978_vm2, %v2768_v2  ;;  %v2120_v18 = vadd.f32 %v6374_v45, %v2116_v38  ;;  %v2257_v26 = vadd.f32 %v6925_v16, %v2230_v54  ;;  %v4286_v34 = vld [vmem:[%s6727_s7 + $0x40] sm:$0xff] }
 0x30f   :  { %v1698_v53 = vpop.permute.xlu0 %1697  ;;  %4623 = vmatpush3.msra.mxu1 %v4281_v47  ;;  %v1730_v6 = vpop.permute.xlu1 %1729  ;;  %4626 = vmatprep.mubr.msk.f32.mxu1 %vm4774_vm6, %v6114_v27  ;;  %v2652_v20 = vmax.f32 %v2648_v36, 0.0  ;;  %v2419_v8 = vadd.f32 %v6374_v45, %v2414_v23  ;;  %v6927_v41 = vrot.slane %v6926_v9, 2  ;;  %v2406_v38 = vsel %vm1483_vm4, %v2403_v39, %v2405_v33 }
 0x310   :  { %v2064_v50 = vadd.f32 %v6333_v32, %v2048_v4  ;;  %v2580_v63 = vadd.f32 %v6426_v15, %v2555_v30  ;;  %v1708_v62 = vadd.f32 %v1698_v53, %v1673_v61  ;;  %4624 = vmatprep.subr.mxu1 %v6114_v27  ;;  %v1825_v32 = vsel %vm1483_vm4, %v1822_v29, %v1824_v56 }
 0x311   :  { %4625 = vmatpush3.msra.mxu1 %v4280_v58  ;;  %v2845_v15 = vld [vmem:[#allocation3 + $0x2] sm:$0x3]  ;;  %v2923_v5 = vld [vmem:[#allocation3 + $0x4] sm:$0x3]  ;;  %v2124_v7 = vmax.f32 %v2120_v18, 0.0  ;;  %v2109_v31 = vsel %vm1483_vm4, %v6927_v41, %v2108_v13  ;;  %v2325_v17 = vadd.f32 %v2314_v51, %v2257_v26  ;;  %v2171_v29 = vadd.f32 %v6930_v10, %v6929_v14  ;;  %v4293_v58 = vld [vmem:[%s6727_s7 + $0x68] sm:$0xff] }
 0x312   :  { %v2085_v11 = vadd.f32 %v6928_v46, %v2064_v50  ;;  %v2645_v52 = vadd.f32 %v2637_v3, %v2580_v63  ;;  %4620 = vmatmul.mubr.msk.f32.vlgmr.msra.gmra.mxu0 %vm978_vm2, %v2845_v15  ;;  %v1834_v49 = vadd.f32 %v1825_v32, %v1809_v57  ;;  %v1740_v55 = vadd.f32 %v1730_v6, %v1708_v62  ;;  %v3001_v60 = vld [vmem:[#allocation3 + $0x6] sm:$0x3]  ;;  %v3079_v30 = vld [vmem:[#allocation3 + $0x8] sm:$0x3]  ;;  %v4289_v26 = vld [vmem:[%s6727_s7 + $0x50] sm:$0xff] }
 0x313   :  { %4627 = vmatmul.mubr.msk.f32.vlgmr.msra.gmra.mxu1 %vm978_vm2, %v2923_v5  ;;  %4636 = vmatprep.subr.mxu1 %v6114_v27  ;;  %v2375_v21 = vpop.permute.xlu0 %2374  ;;  %v2133_v42 = vrot.slane %v2124_v7, 2  ;;  %v1765_v54 = vpop.permute.xlu1 %1764  ;;  %v1850_v51 = vmax.f32 %v1845_v24, 0.0  ;;  %v2661_v22 = vrot.slane %v2652_v20, 2  ;;  %v2424_v2 = vmax.f32 %v2419_v8, 0.0  ;;  %v6931_v13 = vld [vmem:[#allocation8_spill] sm:$0xff]  ;;  %v4299_v14 = vld [vmem:[%s6727_s7 + $0x88] sm:$0xff] }
 0x314   :  { %v2117_v44 = vadd.f32 %v2109_v31, %v2085_v11  ;;  %v2649_v35 = vadd.f32 %v6374_v45, %v2645_v52  ;;  %v2386_v47 = vadd.f32 %v2375_v21, %v2325_v17  ;;  %4630 = vmatpush3.msra.mxu0 %v4284_v19  ;;  %4637 = vmatpush3.msra.mxu1 %v4287_v37  ;;  %v4296_v52 = vld [vmem:[%s6727_s7 + $0x78] sm:$0xff]  ;;  %v4295_v21 = vld [vmem:[%s6727_s7 + $0x70] sm:$0xff] }
 0x315   :  { %v2134_v36 = vsel %vm1483_vm4, %v6422_v0, %v2133_v42  ;;  %4631 = vmatprep.subr.mxu0 %v6114_v27  ;;  %4638 = vmatprep.subr.mxu1 %v6114_v27  ;;  %v1846_v39 = vadd.f32 %v6374_v45, %v1834_v49  ;;  %v1775_v0 = vadd.f32 %v1765_v54, %v1740_v55 }
 0x316   :  { %v2121_v23 = vadd.f32 %v6374_v45, %v2117_v44  ;;  %v2653_v43 = vmax.f32 %v2649_v35, 0.0  ;;  %v2144_v4 = vmax.f32 %v1850_v51, %v2134_v36  ;;  %v2415_v3 = vadd.f32 %v2406_v38, %v2386_v47  ;;  %4632 = vmatpush3.msra.mxu0 %v4283_v40  ;;  %4633 = vmatprep.mubr.msk.f32.mxu0 %vm4774_vm6, %v6114_v27  ;;  %v4305_v44 = vld [vmem:[%s6727_s7 + $0xa8] sm:$0xff]  ;;  %v4301_v47 = vld [vmem:[%s6727_s7 + $0x90] sm:$0xff] }
 0x317   :  { %4639 = vmatpush3.msra.mxu1 %v4286_v34  ;;  %4640 = vmatprep.mubr.msk.f32.mxu1 %vm4774_vm6, %v6114_v27  ;;  %v2221_v28 = vpop.permute.xlu0 %2220  ;;  %v1800_v61 = vpop.permute.xlu1 %1799  ;;  %v2191_v24 = vadd.f32 %v6931_v13, %v2171_v29  ;;  %v2662_v6 = vsel %vm1483_vm4, %v6439_v25, %v2661_v22  ;;  %v4292_v25 = vld [vmem:[%s6727_s7 + $0x60] sm:$0xff]  ;;  %v1851_v32 = vmax.f32 %v1846_v39, 0.0  ;;  %v4319_v13 = vld [vmem:[%s6727_s7 + $0xf0] sm:$0xff] }
 0x318   :  { %v6565_v18 = vrot.slane %v2653_v43, 2  ;;  %v2125_v57 = vmax.f32 %v2121_v23, 0.0  ;;  %v2429_v53 = vmax.f32 %v2144_v4, %v2424_v2  ;;  %4634 = vmatmul.mubr.msk.f32.vlgmr.msra.gmra.mxu0 %vm978_vm2, %v3001_v60  ;;  %4641 = vmatmul.mubr.msk.f32.vlgmr.msra.gmra.mxu1 %vm978_vm2, %v3079_v30  ;;  %v2420_v50 = vadd.f32 %v6374_v45, %v2415_v3  ;;  %v4304_v34 = vld [vmem:[%s6727_s7 + $0xa0] sm:$0xff]  ;;  %v4308_v2 = vld [vmem:[%s6727_s7 + $0xb8] sm:$0xff]  ;;  %v4311_v23 = vld [vmem:[%s6727_s7 + $0xc8] sm:$0xff] }
 0x319   :  { %v1810_v16 = vadd.f32 %v1800_v61, %v1775_v0  ;;  %4643 = vmatprep.subr.mxu0 %v6114_v27  ;;  %4650 = vmatprep.subr.mxu1 %v6114_v27  ;;  %v2211_v63 = vadd.f32 %v6457_v12, %v2191_v24  ;;  %v4307_v43 = vld [vmem:[%s6727_s7 + $0xb0] sm:$0xff]  ;;  %v4310_v4 = vld [vmem:[%s6727_s7 + $0xc0] sm:$0xff]  ;;  %v4317_v0 = vld [vmem:[%s6727_s7 + $0xe8] sm:$0xff] }
 0x31a   :  { %v2135_v62 = vrot.slane %v2125_v57, 2  ;;  %v2664_v19 = vsel %vm1483_vm4, %v2661_v22, %v6565_v18  ;;  %v2672_v37 = vmax.f32 %v2429_v53, %v2662_v6  ;;  %4644 = vmatpush3.msra.mxu0 %v4290_v48  ;;  %4651 = vmatpush3.msra.mxu1 %v4293_v58  ;;  %v2425_v8 = vmax.f32 %v2420_v50, 0.0  ;;  %v4764_v3 = vld [vmem:[#allocation2] sm:$0xff]  ;;  %v4313_v60 = vld [vmem:[%s6727_s7 + $0xd0] sm:$0xff]  ;;  %v4320_v58 = vld [vmem:[%s6727_s7 + $0xf8] sm:$0xff] }
 0x31b   :  { %v2248_v20 = vpop.permute.xlu0 %2247  ;;  %4645 = vmatprep.subr.mxu0 %v6114_v27  ;;  %4652 = vmatprep.subr.mxu1 %v6114_v27  ;;  %v2231_v12 = vadd.f32 %v2221_v28, %v2211_v63  ;;  %v1835_v5 = vadd.f32 %v1824_v56, %v1810_v16  ;;  %v2377_v11 = vpop.permute.xlu1 %2376  ;;  %v4316_v30 = vld [vmem:[%s6727_s7 + $0xe0] sm:$0xff]  ;;  %v4023_v53 = vld [vmem:[%s6730_s10 + $0x38] sm:$0xff]  ;;  %v4022_v6 = vld [vmem:[%s6730_s10 + $0x30] sm:$0xff] }
 0x31c   :  { %v2136_v15 = vsel %vm1483_vm4, %v2133_v42, %v2135_v62  ;;  %2678 = vst.msk [vmem:[#allocation3 + $0xa] sm:$0xff] %vm978_vm2, %v2672_v37  ;;  %4646 = vmatpush3.msra.mxu0 %v4289_v26  ;;  %4647 = vmatprep.mubr.msk.f32.mxu0 %vm4774_vm6, %v6114_v27  ;;  %v4298_v42 = vld [vmem:[%s6727_s7 + $0x80] sm:$0xff]  ;;  %v4021_v50 = vld [vmem:[%s6730_s10 + $0x28] sm:$0xff]  ;;  %v4019_v26 = vld [vmem:[%s6730_s10 + $0x18] sm:$0xff] }
 0x31d   :  { %v2145_v7 = vmax.f32 %v1851_v32, %v2136_v15  ;;  %4653 = vmatpush3.msra.mxu1 %v4292_v25  ;;  %4654 = vmatprep.mubr.msk.f32.mxu1 %vm4774_vm6, %v6114_v27  ;;  %v2258_v9 = vadd.f32 %v2248_v20, %v2231_v12  ;;  %v1847_v59 = vadd.f32 %v6374_v45, %v1835_v5  ;;  %v4020_v16 = vld [vmem:[%s6730_s10 + $0x20] sm:$0xff]  ;;  %v4018_v63 = vld [vmem:[%s6730_s10 + $0x10] sm:$0xff] }
 0x31e   :  { %4657 = vmatprep.subr.mxu0 %v6114_v27  ;;  %4664 = vmatprep.subr.mxu1 %v6114_v27  ;;  %v4273_v37 = vld [vmem:[%s6731_s9] ss:$0 sm:$0xff] }
 0x31f   :  { %v2430_v41 = vmax.f32 %v2145_v7, %v2425_v8  ;;  %v2316_v31 = vpop.permute.xlu0 %2315  ;;  %v1852_v49 = vmax.f32 %v1847_v59, 0.0 }
 0x320   :  { %v2326_v56 = vadd.f32 %v2316_v31, %v2258_v9 }
 0x321   :  { %v2673_v46 = vmax.f32 %v2430_v41, %v2664_v19  ;;  %v4016_v19 = vld [vmem:[%s6730_s10] sm:$0xff] }
 0x322   :  { %v2387_v17 = vadd.f32 %v2377_v11, %v2326_v56 }
 0x323   :  { %2679 = vst.msk [vmem:[#allocation3 + $0x12] sm:$0xff] %vm978_vm2, %v2673_v46  ;;  %v3157_v10 = vld [vmem:[#allocation3 + $0xa] sm:$0x3]  ;;  %v3235_v29 = vld [vmem:[#allocation3 + $0xc] sm:$0x3] }
 0x324   :  { %v2416_v55 = vadd.f32 %v2405_v33, %v2387_v17  ;;  %4648 = vmatmul.mubr.msk.f32.vlgmr.msra.gmra.mxu0 %vm978_vm2, %v3157_v10  ;;  %4655 = vmatmul.mubr.msk.f32.vlgmr.msra.gmra.mxu1 %vm978_vm2, %v3235_v29  ;;  %v2146_v33 = vmax.f32 %v1852_v49, %v2135_v62  ;;  %v3313_v51 = vld [vmem:[#allocation3 + $0xe] sm:$0x3] }
 0x325   :  { %4658 = vmatpush3.msra.mxu0 %v4296_v52  ;;  %4665 = vmatpush3.msra.mxu1 %v4299_v14  ;;  %v4017_v62 = vld [vmem:[%s6730_s10 + $0x8] sm:$0xff] }
 0x326   :  { %v2421_v54 = vadd.f32 %v6374_v45, %v2416_v55  ;;  %4659 = vmatprep.subr.mxu0 %v6114_v27  ;;  %4666 = vmatprep.subr.mxu1 %v6114_v27  ;;  %v3391_v45 = vld [vmem:[#allocation3 + $0x10] sm:$0x3] }
 0x327   :  { %4660 = vmatpush3.msra.mxu0 %v4295_v21  ;;  %4661 = vmatprep.mubr.msk.f32.mxu0 %vm4774_vm6, %v6114_v27 }
 0x328   :  { %v2426_v40 = vmax.f32 %v2421_v54, 0.0  ;;  %4667 = vmatpush3.msra.mxu1 %v4298_v42  ;;  %4668 = vmatprep.mubr.msk.f32.mxu1 %vm4774_vm6, %v6114_v27 }
 0x329   :  { %4662 = vmatmul.mubr.msk.f32.vlgmr.msra.gmra.mxu0 %vm978_vm2, %v3313_v51  ;;  %4669 = vmatmul.mubr.msk.f32.vlgmr.msra.gmra.mxu1 %vm978_vm2, %v3391_v45 }
 0x32a   :  { %v2431_v35 = vmax.f32 %v2146_v33, %v2426_v40  ;;  %4671 = vmatprep.subr.mxu0 %v6114_v27  ;;  %4678 = vmatprep.subr.mxu1 %v6114_v27  ;;  %v3469_v38 = vld [vmem:[#allocation3 + $0x12] sm:$0x3]  ;;  %v3547_v36 = vld [vmem:[#allocation3 + $0x14] sm:$0x3]  ;;  %v3625_v48 = vld [vmem:[#allocation3 + $0x16] sm:$0x3] }
 0x32b   :  { %4672 = vmatpush3.msra.mxu0 %v4302_v1  ;;  %4679 = vmatpush3.msra.mxu1 %v4305_v44  ;;  %v3703_v39 = vld [vmem:[#allocation3 + $0x18] sm:$0x3] }
 0x32c   :  { %v2674_v22 = vmax.f32 %v2431_v35, %v6565_v18  ;;  %4673 = vmatprep.subr.mxu0 %v6114_v27  ;;  %4680 = vmatprep.subr.mxu1 %v6114_v27 }
 0x32d   :  { %4674 = vmatpush3.msra.mxu0 %v4301_v47  ;;  %4675 = vmatprep.mubr.msk.f32.mxu0 %vm4774_vm6, %v6114_v27 }
 0x32e   :  { %2681 = vst.msk [vmem:[#allocation3 + $0x1a] sm:$0x3f] %vm2680_vm9, %v2674_v22  ;;  %4681 = vmatpush3.msra.mxu1 %v4304_v34  ;;  %4682 = vmatprep.mubr.msk.f32.mxu1 %vm4774_vm6, %v6114_v27 }
 0x32f   :  { %4676 = vmatmul.mubr.msk.f32.vlgmr.msra.gmra.mxu0 %vm978_vm2, %v3469_v38  ;;  %4683 = vmatmul.mubr.msk.f32.vlgmr.msra.gmra.mxu1 %vm978_vm2, %v3547_v36 }
 0x330   :  { %4685 = vmatprep.subr.mxu0 %v6114_v27  ;;  %4692 = vmatprep.subr.mxu1 %v6114_v27  ;;  %v4314_v27 = vld [vmem:[%s6727_s7 + $0xd8] sm:$0xff] }
 0x331   :  { %4686 = vmatpush3.msra.mxu0 %v4308_v2  ;;  %4693 = vmatpush3.msra.mxu1 %v4311_v23 }
 0x332   :  { %4687 = vmatprep.subr.mxu0 %v4764_v3  ;;  %4694 = vmatprep.subr.mxu1 %v4764_v3 }
 0x333   :  { %4688 = vmatpush3.msra.mxu0 %v4307_v43  ;;  %4689 = vmatprep.mubr.msk.f32.mxu0 %vm4774_vm6, %v4764_v3 }
 0x334   :  { %4695 = vmatpush3.msra.mxu1 %v4310_v4  ;;  %4696 = vmatprep.mubr.msk.f32.mxu1 %vm4774_vm6, %v4764_v3 }
 0x335   :  { %4690 = vmatmul.mubr.msk.f32.vlgmr.msra.gmra.mxu0 %vm978_vm2, %v3625_v48  ;;  %4697 = vmatmul.mubr.msk.f32.vlgmr.msra.gmra.mxu1 %vm978_vm2, %v3703_v39  ;;  %v3781_v28 = vld [vmem:[#allocation3 + $0x1a] sm:$0x3]  ;;  %v3859_v61 = vld [vmem:[#allocation3 + $0x1c] sm:$0x3]  ;;  %v3937_v24 = vld [vmem:[#allocation3 + $0x1e] sm:$0x3] }
 0x336   :  { %4699 = vmatprep.subr.mxu0 %v4764_v3  ;;  %4706 = vmatprep.subr.mxu1 %v4764_v3 }
 0x337   :  { %4700 = vmatpush3.msra.mxu0 %v4314_v27  ;;  %4707 = vmatpush3.msra.mxu1 %v4317_v0 }
 0x338   :  { %4701 = vmatprep.subr.mxu0 %v4764_v3  ;;  %4708 = vmatprep.subr.mxu1 %v4764_v3 }
 0x339   :  { %4702 = vmatpush3.msra.mxu0 %v4313_v60  ;;  %4703 = vmatprep.mubr.msk.f32.mxu0 %vm4774_vm6, %v4764_v3 }
 0x33a   :  { %4709 = vmatpush3.msra.mxu1 %v4316_v30  ;;  %4710 = vmatprep.mubr.msk.f32.mxu1 %vm4774_vm6, %v4764_v3 }
 0x33b   :  { %4704 = vmatmul.mubr.msk.f32.vlgmr.msra.gmra.mxu0 %vm978_vm2, %v3781_v28  ;;  %4711 = vmatmul.mubr.msk.f32.vlgmr.msra.gmra.mxu1 %vm978_vm2, %v3859_v61 }
 0x33c   :  { %4713 = vmatprep.subr.mxu0 %v4764_v3  ;;  %4717 = vmatprep.mubr.msk.f32.mxu0 %vm4774_vm6, %v4764_v3 }
 0x33d   :  { %4714 = vmatpush3.msra.mxu0 %v4320_v58  ;;  %4720 = vmatprep.subr.mxu1 %v4764_v3  ;;  %v4322_v58 = vld [vmem:[%s6732_s11] ss:$0 sm:$0xff] }
 0x33e   :  { %4715 = vmatprep.subr.mxu0 %v4764_v3  ;;  %4736 = vmatprep.mubr.msk.f32.mxu1 %vm4774_vm6, %v4764_v3 }
 0x33f   :  { %4716 = vmatpush3.msra.mxu0 %v4319_v13  ;;  %4721 = vmatpush3.msra.mxu1 %v4023_v53 }
 0x340   :  { %4718 = vmatmul.mubr.msk.f32.vlgmr.msra.gmra.mxu0 %vm978_vm2, %v3937_v24  ;;  %4722 = vmatprep.subr.mxu1 %v4764_v3 }
 0x341   :  { %4723 = vmatpush3.msra.mxu1 %v4022_v6 }
 0x342   :  { %4724 = vmatprep.subr.mxu1 %v4764_v3 }
 0x343   :  { %4725 = vmatpush3.msra.mxu1 %v4021_v50 }
 0x344   :  { %4726 = vmatprep.subr.mxu1 %v4764_v3 }
 0x345   :  { %4727 = vmatpush3.msra.mxu1 %v4020_v16 }
 0x346   :  { %4728 = vmatprep.subr.mxu1 %v4764_v3 }
 0x347   :  { %4729 = vmatpush3.msra.mxu1 %v4019_v26 }
 0x348   :  { %4730 = vmatprep.subr.mxu1 %v4764_v3 }
 0x349   :  { %4731 = vmatpush3.msra.mxu1 %v4018_v63 }
 0x34a   :  { %4732 = vmatprep.subr.mxu1 %v4764_v3 }
 0x34b   :  { %v2764_v18 = vpop.f32.mrf.mxu0  ;;  %4733 = vmatpush3.msra.mxu1 %v4017_v62 }
 0x34c   :  { %4734 = vmatprep.subr.mxu1 %v4764_v3  ;;  %v2765_v20 = vadd.f32 %v4273_v37, %v2764_v18 }
 0x34d   :  { %v4607_v57 = vpop.f32.mrf.mxu0  ;;  %4735 = vmatpush3.msra.mxu1 %v4016_v19 }
 0x3ce   :  { %v2840_v25 = vpop.f32.mrf.mxu1 }
 0x3cf   :  { %v2844_v7 = vadd.f32 %v2840_v25, %v2765_v20 }
 0x3d0   :  { %v4614_v32 = vpop.f32.mrf.mxu1 }
 0x3d2   :  { %v2918_v15 = vpop.f32.mrf.mxu0 }
 0x3d3   :  { %v2996_v12 = vpop.f32.mrf.mxu1  ;;  %v2922_v9 = vadd.f32 %v2918_v15, %v2844_v7 }
 0x3d4   :  { %v4621_v5 = vpop.f32.mrf.mxu0 }
 0x3d5   :  { %v4628_v8 = vpop.f32.mrf.mxu1  ;;  %v3000_v46 = vadd.f32 %v2996_v12, %v2922_v9 }
 0x3d8   :  { %v3074_v41 = vpop.f32.mrf.mxu0  ;;  %v3152_v31 = vpop.f32.mrf.mxu1 }
 0x3d9   :  { %v3078_v11 = vadd.f32 %v3074_v41, %v3000_v46 }
 0x3da   :  { %v4635_v59 = vpop.f32.mrf.mxu0  ;;  %v4642_v56 = vpop.f32.mrf.mxu1 }
 0x3db   :  { %v3156_v17 = vadd.f32 %v3152_v31, %v3078_v11 }
 0x3e4   :  { %v3230_v52 = vpop.f32.mrf.mxu0  ;;  %v3308_v14 = vpop.f32.mrf.mxu1 }
 0x3e5   :  { %v3234_v10 = vadd.f32 %v3230_v52, %v3156_v17 }
 0x3e6   :  { %v4649_v29 = vpop.f32.mrf.mxu0  ;;  %v4656_v49 = vpop.f32.mrf.mxu1 }
 0x3e7   :  { %v3312_v55 = vadd.f32 %v3308_v14, %v3234_v10 }
 0x3e9   :  { %v3386_v21 = vpop.f32.mrf.mxu0  ;;  %v3464_v42 = vpop.f32.mrf.mxu1 }
 0x3ea   :  { %v3390_v54 = vadd.f32 %v3386_v21, %v3312_v55 }
 0x3eb   :  { %v4663_v1 = vpop.f32.mrf.mxu0  ;;  %v4670_v33 = vpop.f32.mrf.mxu1 }
 0x3ec   :  { %v3468_v40 = vadd.f32 %v3464_v42, %v3390_v54 }
 0x3ef   :  { %v3542_v51 = vpop.f32.mrf.mxu0  ;;  %v3620_v45 = vpop.f32.mrf.mxu1 }
 0x3f0   :  { %v3546_v44 = vadd.f32 %v3542_v51, %v3468_v40 }
 0x3f1   :  { %v4677_v35 = vpop.f32.mrf.mxu0  ;;  %v4684_v47 = vpop.f32.mrf.mxu1 }
 0x3f2   :  { %v3624_v34 = vadd.f32 %v3620_v45, %v3546_v44 }
 0x3f5   :  { %v3698_v22 = vpop.f32.mrf.mxu0  ;;  %v3776_v38 = vpop.f32.mrf.mxu1 }
 0x3f6   :  { %v3702_v36 = vadd.f32 %v3698_v22, %v3624_v34 }
 0x3f7   :  { %v4691_v2 = vpop.f32.mrf.mxu0  ;;  %v4698_v23 = vpop.f32.mrf.mxu1 }
 0x3f8   :  { %v3780_v43 = vadd.f32 %v3776_v38, %v3702_v36 }
 0x3fb   :  { %v3854_v4 = vpop.f32.mrf.mxu0  ;;  %v3932_v3 = vpop.f32.mrf.mxu1 }
 0x3fc   :  { %v3858_v27 = vadd.f32 %v3854_v4, %v3780_v43 }
 0x3fd   :  { %v4705_v48 = vpop.f32.mrf.mxu0  ;;  %v4712_v39 = vpop.f32.mrf.mxu1 }
 0x3fe   :  { %v3936_v0 = vadd.f32 %v3932_v3, %v3858_v27 }
 0x400   :  { %v4010_v60 = vpop.f32.mrf.mxu0 }
 0x401   :  { %v4014_v30 = vadd.f32 %v4010_v60, %v3936_v0 }
 0x402   :  { %v4719_v28 = vpop.f32.mrf.mxu0 }
 0x403   :  { %v4015_v61 = vmax.f32 %v4014_v30, 0.0 }
 0x405   :  { %4737 = vmatmul.mubr.msk.f32.vlgmr.msra.gmra.mxu1 %vm4031_vm10, %v4015_v61 }
 0x4c5   :  { %v4101_v13 = vpop.f32.mrf.mxu1 }
 0x4c6   :  { %v4102_v24 = vadd.f32 %v4322_v58, %v4101_v13 }
 0x4c7   :  { %v4738_v18 = vpop.f32.mrf.mxu1 }
 0x4c8   :  { %4106 = vst.msk [vmem:[%s6733_s12] sm:$0x3] %vm4105_vm11, %v4102_v24 }

</bundles_post_ra>
